<compile_context>
chip_gen: v7x
topology: tpu7x:2x2x1
jax: 0.10.0
libtpu: 0.0.40
codegen_flags: <defaults>
</compile_context>

<pallas_src>
import jax
import jax.numpy as jnp
from jax import lax
from jax.experimental import pallas as pl
from jax.experimental.pallas import tpu as pltpu

FEATURE_LEN = 128     # stand-in for 2048 (scaled down for small-shape demo)
NUM_CLASS = 2
CONV_K_PAD = 64       # im2col K: 49 -> 64 (8-aligned)
CONV_C_PAD = 128      # conv out channels: 64 -> 128 (lane-dense)


def _round_up(x, m):
    return ((x + m - 1) // m) * m


# --------------------------------------------------------------------------
# Pallas kernel 1: group1 conv(1->64, 7x7, stride2, pad3, no bias) as
#                  im2col-matmul, fused BatchNorm affine + ReLU.
#                  bf16 operands, f32 accumulation, padded lane-dense output.
# --------------------------------------------------------------------------
def conv_bn_relu_kernel(p_ref, w_ref, scale_ref, shift_ref, o_ref):
    y = jnp.dot(p_ref[...], w_ref[...], preferred_element_type=jnp.float32)
    y = y * scale_ref[...] + shift_ref[...]
    o_ref[...] = jnp.maximum(y, 0.0)


def conv_bn_relu(patches, w, scale, shift, tile_rows=512):
    rows, k = patches.shape
    cout = w.shape[1]
    tr = min(tile_rows, _round_up(rows, 8))
    rp = _round_up(rows, tr)
    if rp != rows:
        patches = jnp.pad(patches, ((0, rp - rows), (0, 0)))
    out = pl.pallas_call(
        conv_bn_relu_kernel,
        out_shape=jax.ShapeDtypeStruct((rp, cout), jnp.float32),
        grid=(rp // tr,),
        in_specs=[
            pl.BlockSpec((tr, k), lambda i: (i, 0)),
            pl.BlockSpec((k, cout), lambda i: (0, 0)),
            pl.BlockSpec((1, cout), lambda i: (0, 0)),
            pl.BlockSpec((1, cout), lambda i: (0, 0)),
        ],
        out_specs=pl.BlockSpec((tr, cout), lambda i: (i, 0)),
        compiler_params=pltpu.CompilerParams(dimension_semantics=("parallel",)),
    )(patches, w, scale, shift)
    return out[:rows]


# --------------------------------------------------------------------------
# Pallas kernel 2: backbone surrogate — global average pool + linear to
#                  FEATURE_LEN, tiled over the row (N) axis.
#                  TODO(synk): the real resnet50 body (self.basemodel) is an
#                  external module not defined in the source file.
# --------------------------------------------------------------------------
def pool_proj_kernel(x_ref, w_ref, b_ref, o_ref):
    inv_s = 1.0 / x_ref.shape[1]
    pooled = jnp.sum(x_ref[...], axis=1) * inv_s                 # (tn, C) f32
    o_ref[...] = (jnp.dot(pooled.astype(jnp.bfloat16), w_ref[...],
                          preferred_element_type=jnp.float32) + b_ref[...])


def pool_proj(x_nsc, w, b, tile_n=8):
    n, s, c = x_nsc.shape
    f = w.shape[1]
    tn = min(tile_n, n)
    npad = _round_up(n, tn)
    if npad != n:
        x_nsc = jnp.pad(x_nsc, ((0, npad - n), (0, 0), (0, 0)))
    out = pl.pallas_call(
        pool_proj_kernel,
        out_shape=jax.ShapeDtypeStruct((npad, f), jnp.float32),
        grid=(npad // tn,),
        in_specs=[
            pl.BlockSpec((tn, s, c), lambda i: (i, 0, 0)),
            pl.BlockSpec((c, f), lambda i: (0, 0)),
            pl.BlockSpec((1, f), lambda i: (0, 0)),
        ],
        out_specs=pl.BlockSpec((tn, f), lambda i: (i, 0)),
        compiler_params=pltpu.CompilerParams(dimension_semantics=("parallel",)),
    )(x_nsc, w, b)
    return out[:n]


# --------------------------------------------------------------------------
# Pallas kernel 3: hoisted LSTM input projection (both directions at once):
#                  (B*T, F) @ (F, 8H) + b  — tiled over rows and cols.
# --------------------------------------------------------------------------
def matmul_bias_kernel(x_ref, w_ref, b_ref, o_ref):
    o_ref[...] = (jnp.dot(x_ref[...], w_ref[...],
                          preferred_element_type=jnp.float32) + b_ref[...])


def matmul_bias(x, w, b, tile_rows=256, tile_cols=512):
    rows, k = x.shape
    cols = w.shape[1]
    tr = min(tile_rows, _round_up(rows, 8))
    rp = _round_up(rows, tr)
    tc = tile_cols if cols % tile_cols == 0 else cols
    if rp != rows:
        x = jnp.pad(x, ((0, rp - rows), (0, 0)))
    out = pl.pallas_call(
        matmul_bias_kernel,
        out_shape=jax.ShapeDtypeStruct((rp, cols), jnp.float32),
        grid=(rp // tr, cols // tc),
        in_specs=[
            pl.BlockSpec((tr, k), lambda i, j: (i, 0)),
            pl.BlockSpec((k, tc), lambda i, j: (0, j)),
            pl.BlockSpec((1, tc), lambda i, j: (0, j)),
        ],
        out_specs=pl.BlockSpec((tr, tc), lambda i, j: (i, j)),
        compiler_params=pltpu.CompilerParams(
            dimension_semantics=("parallel", "parallel")),
    )(x, w, b)
    return out[:rows]


# --------------------------------------------------------------------------
# Pallas kernel 4: myLSTM (both directions).  grid=(2,) over directions
#                  ("parallel": shards across the 2 TCs on v7x).  Time loop is
#                  inside the kernel (pl.loop); h/c live in VMEM scratch and
#                  are fully re-initialized per grid step, so "parallel" is
#                  safe.  Gumbel-softmax gating with tau=1, hard=False,
#                  c_trans=False (softmax(logits + gumbel_noise)).
#                  TODO(synk): `watch.append(argmax(use))` is internal state
#                  never returned by Ada.forward, so it is not materialized.
# --------------------------------------------------------------------------
def lstm_duo_kernel(xg_ref, g_ref, whh_ref, wuse_ref, buse_ref,
                    whead_ref, bhead_ref, wpredc_ref, bpredc_ref,
                    hid_ref, cell_ref, util_ref,
                    h_sc, c_sc):
    T = xg_ref.shape[0]
    B, H = h_sc.shape

    def cell_update(gates, c_prev):
        # PyTorch LSTMCell gate order: [i, f, g, o]; elementwise math in f32.
        i_g = jax.nn.sigmoid(gates[:, 0 * H:1 * H])
        f_g = jax.nn.sigmoid(gates[:, 1 * H:2 * H])
        g_g = jnp.tanh(gates[:, 2 * H:3 * H])
        o_g = jax.nn.sigmoid(gates[:, 3 * H:4 * H])
        c_new = f_g * c_prev + i_g * g_g
        h_new = o_g * jnp.tanh(c_new)
        return h_new, c_new

    def write_heads(t, h_out, c_new):
        # fc_pred + fc_utility fused into one (H, 3) matmul on h_out.
        ho = (jnp.dot(h_out, whead_ref[...],
                      preferred_element_type=jnp.float32) + bhead_ref[...])
        co = (jnp.dot(c_new, wpredc_ref[...],
                      preferred_element_type=jnp.float32) + bpredc_ref[...])
        hid_ref[t] = ho[:, 0:2]
        util_ref[t] = ho[:, 2:3]
        cell_ref[t] = co

    # ---- frame 0: zero initial state, no gating (matches the i==0 branch) ----
    h0, c0 = cell_update(xg_ref[0], jnp.zeros((B, H), jnp.float32))
    h_sc[...] = h0
    c_sc[...] = c0
    write_heads(0, h0, c0)

    # ---- frames 1..T-1: recurrence + gumbel gating ----
    @pl.loop(1, T)
    def _(t):
        h_prev = h_sc[...]
        c_prev = c_sc[...]
        gates = xg_ref[t] + jnp.dot(h_prev.astype(jnp.bfloat16), whh_ref[...],
                                    preferred_element_type=jnp.float32)
        h_new, c_new = cell_update(gates, c_prev)

        # use = gumbel_softmax(fc_use(h_new - h_prev), tau=1, hard=False)
        use_logits = (jnp.dot(h_new - h_prev, wuse_ref[...],
                              preferred_element_type=jnp.float32) + buse_ref[...])
        y = jax.nn.softmax(use_logits + g_ref[t], axis=-1)        # (B, 2)
        h_out = h_prev * y[:, 0:1] + h_new * y[:, 1:2]

        h_sc[...] = h_out
        c_sc[...] = c_new
        write_heads(t, h_out, c_new)


def run_lstm_duo(xg, gumbel, lp):
    D, T, B, G4 = xg.shape           # D = 2 directions
    H = G4 // 4
    sq3 = lambda d: (d, 0, 0)
    sq4 = lambda d: (d, 0, 0, 0)
    return pl.pallas_call(
        lstm_duo_kernel,
        out_shape=(jax.ShapeDtypeStruct((D, T, B, NUM_CLASS), jnp.float32),
                   jax.ShapeDtypeStruct((D, T, B, NUM_CLASS), jnp.float32),
                   jax.ShapeDtypeStruct((D, T, B, 1), jnp.float32)),
        grid=(D,),
        in_specs=[
            pl.BlockSpec((None, T, B, G4), sq4),   # pre-projected gates (f32)
            pl.BlockSpec((None, T, B, 2), sq4),    # gumbel noise
            pl.BlockSpec((None, H, G4), sq3),      # Whh (bf16)
            pl.BlockSpec((None, H, 2), sq3),       # fc_use W
            pl.BlockSpec((None, 1, 2), sq3),       # fc_use b
            pl.BlockSpec((None, H, 3), sq3),       # [fc_pred | fc_utility] W
            pl.BlockSpec((None, 1, 3), sq3),       # [fc_pred | fc_utility] b
            pl.BlockSpec((None, H, 2), sq3),       # fc_pred_c W
            pl.BlockSpec((None, 1, 2), sq3),       # fc_pred_c b
        ],
        out_specs=(pl.BlockSpec((None, T, B, NUM_CLASS), sq4),
                   pl.BlockSpec((None, T, B, NUM_CLASS), sq4),
                   pl.BlockSpec((None, T, B, 1), sq4)),
        scratch_shapes=[pltpu.VMEM((B, H), jnp.float32),
                        pltpu.VMEM((B, H), jnp.float32)],
        compiler_params=pltpu.CompilerParams(dimension_semantics=("parallel",)),
    )(xg, gumbel, lp["whh"], lp["wuse"], lp["buse"],
      lp["whead"], lp["bhead"], lp["wpredc"], lp["bpredc"])


# --------------------------------------------------------------------------
# Plain-JAX glue
# --------------------------------------------------------------------------
def im2col_7x7_s2_p3(x_nchw):
    n, c, h, w = x_nchw.shape
    oh = (h + 6 - 7) // 2 + 1
    ow = (w + 6 - 7) // 2 + 1
    xp = jnp.pad(x_nchw, ((0, 0), (0, 0), (3, 3), (3, 3)))
    cols = []
    for kh in range(7):
        for kw in range(7):
            cols.append(xp[:, :, kh:kh + 2 * oh:2, kw:kw + 2 * ow:2])  # (N,C,OH,OW)
    p = jnp.stack(cols, axis=2)                        # (N, C, 49, OH, OW)
    p = p.reshape(n, c * 49, oh, ow)
    p = jnp.transpose(p, (0, 2, 3, 1)).reshape(n * oh * ow, c * 49)
    return p, oh, ow


def ada_forward(params, img, position, gumbel1, gumbel2):
    b, f, c, h, w = img.shape
    x = img.reshape(b * f, c, h, w)

    # ---- group1: Conv2d(1,64,7,2,3) + BN + ReLU (Pallas, padded/bf16) ----
    patches, oh, ow = im2col_7x7_s2_p3(x)              # (rows, 49) f32
    patches = jnp.pad(patches,
                      ((0, 0), (0, CONV_K_PAD - patches.shape[1]))
                      ).astype(jnp.bfloat16)
    conv = conv_bn_relu(patches, params["g1"]["w"],
                        params["g1"]["scale"], params["g1"]["shift"])
    y = conv[:, :64].reshape(b * f, oh, ow, 64)        # NHWC, strip channel pad

    # ---- MaxPool2d(3, stride=2, pad=1) (plain-JAX reduce_window glue) ----
    y = lax.reduce_window(y, -jnp.inf, lax.max,
                          (1, 3, 3, 1), (1, 2, 2, 1),
                          ((0, 0), (1, 1), (1, 1), (0, 0)))
    ph, pw = y.shape[1], y.shape[2]

    # TODO(synk): resnet50 body (self.basemodel) is an external module whose
    # definition is not provided; substituted with a global-avg-pool + linear
    # projection to FEATURE_LEN (Pallas kernel), matching the (b, f, feat) shape.
    feat = pool_proj(y.reshape(b * f, ph * pw, 64),
                     params["proj"]["w"], params["proj"]["b"])
    feature = feat.reshape(b, f, FEATURE_LEN)

    # position_mode == 'add'
    lstmin = feature + position                        # (B, T, F)

    # ---- hoisted x @ Wih for both LSTM directions in one big matmul ----
    H = FEATURE_LEN
    xg_all = matmul_bias(lstmin.reshape(b * f, H).astype(jnp.bfloat16),
                         params["lstm"]["wih_both"], params["lstm"]["b_both"])
    xg_all = xg_all.reshape(b, f, 2, 4 * H)            # [:, :, 0]=dir1, 1=dir2
    xg1 = jnp.transpose(xg_all[:, :, 0, :], (1, 0, 2))                    # (T,B,4H)
    xg2 = jnp.transpose(jnp.flip(xg_all[:, :, 1, :], axis=1), (1, 0, 2))  # reversed
    xg = jnp.stack([xg1, xg2], axis=0)                 # (2, T, B, 4H)
    gumbel = jnp.stack([gumbel1, gumbel2], axis=0)     # (2, T, B, 2)

    hid, cell, util = run_lstm_duo(xg, gumbel, params["lstm"])

    # PyTorch returns per-frame python lists; here each is stacked along T.
    return hid[0], cell[0], util[0], hid[1], cell[1], util[1]


# --------------------------------------------------------------------------
# Deterministic parameter init (shapes from the module __init__, scaled down)
# --------------------------------------------------------------------------
def init_params(key):
    ks = jax.random.split(key, 4)
    nrm = lambda k, shape, s=0.05: jax.random.normal(k, shape, jnp.float32) * s
    H = FEATURE_LEN

    # group1 conv + folded BN, padded K 49->64 / Cout 64->128, bf16 weights.
    w_conv = nrm(ks[0], (64, 1, 7, 7))
    gamma, beta = jnp.ones((64,)), jnp.zeros((64,))
    rmean, rvar, eps = jnp.zeros((64,)), jnp.ones((64,)), 1e-5
    scale = gamma / jnp.sqrt(rvar + eps)
    shift = beta - rmean * scale
    w_flat_t = w_conv.reshape(64, 49).T                          # (49, 64)
    w_pad = jnp.zeros((CONV_K_PAD, CONV_C_PAD), jnp.float32)
    w_pad = w_pad.at[:49, :64].set(w_flat_t)
    scale_pad = jnp.zeros((1, CONV_C_PAD), jnp.float32).at[:, :64].set(scale)
    shift_pad = jnp.zeros((1, CONV_C_PAD), jnp.float32).at[:, :64].set(shift)
    g1 = dict(w=w_pad.astype(jnp.bfloat16), scale=scale_pad, shift=shift_pad)

    proj = dict(w=nrm(ks[1], (64, H)).astype(jnp.bfloat16),
                b=jnp.zeros((1, H), jnp.float32))

    def raw_lstm(kbase):
        kk = jax.random.split(kbase, 12)
        wih, whh = nrm(kk[0], (4 * H, H)), nrm(kk[1], (4 * H, H))
        bih, bhh = nrm(kk[2], (4 * H,)), nrm(kk[3], (4 * H,))
        wuse, buse = nrm(kk[4], (2, H)), nrm(kk[5], (2,))
        wpred, bpred = nrm(kk[6], (2, H)), nrm(kk[7], (2,))
        wpredc, bpredc = nrm(kk[8], (2, H)), nrm(kk[9], (2,))
        wutil, butil = nrm(kk[10], (1, H)), nrm(kk[11], (1,))
        return dict(wih_t=wih.T, b=(bih + bhh).reshape(1, 4 * H),
                    whh_t=whh.T,
                    wuse_t=wuse.T, buse=buse.reshape(1, 2),
                    whead=jnp.concatenate([wpred.T, wutil.T], axis=1),   # (H, 3)
                    bhead=jnp.concatenate([bpred, butil]).reshape(1, 3),
                    wpredc_t=wpredc.T, bpredc=bpredc.reshape(1, 2))

    l1, l2 = raw_lstm(ks[2]), raw_lstm(ks[3])
    lstm = dict(
        # hoisted input projection weights, both directions fused: (F, 8H) bf16
        wih_both=jnp.concatenate([l1["wih_t"], l2["wih_t"]],
                                 axis=1).astype(jnp.bfloat16),
        b_both=jnp.concatenate([l1["b"], l2["b"]], axis=1),
        # per-direction recurrent / head weights stacked on a leading dim of 2
        whh=jnp.stack([l1["whh_t"], l2["whh_t"]]).astype(jnp.bfloat16),
        wuse=jnp.stack([l1["wuse_t"], l2["wuse_t"]]),
        buse=jnp.stack([l1["buse"], l2["buse"]]),
        whead=jnp.stack([l1["whead"], l2["whead"]]),
        bhead=jnp.stack([l1["bhead"], l2["bhead"]]),
        wpredc=jnp.stack([l1["wpredc_t"], l2["wpredc_t"]]),
        bpredc=jnp.stack([l1["bpredc"], l2["bpredc"]]),
    )
    return dict(g1=g1, proj=proj, lstm=lstm)


if __name__ == "__main__":
    key = jax.random.PRNGKey(0)
    kimg, kpos, kg1, kg2, kparam = jax.random.split(key, 5)

    B, T, C, Himg, Wimg = 2, 8, 1, 32, 32              # small shapes
    img = jax.random.normal(kimg, (B, T, C, Himg, Wimg), jnp.float32)
    position = jax.random.normal(kpos, (B, T, FEATURE_LEN), jnp.float32)
    # Gumbel(0,1) noise for F.gumbel_softmax, precomputed deterministically
    # (frame 0 entries are ignored, matching the i==0 branch).
    gumbel1 = jax.random.gumbel(kg1, (T, B, 2), jnp.float32)
    gumbel2 = jax.random.gumbel(kg2, (T, B, 2), jnp.float32)

    params = init_params(kparam)
    outs = jax.jit(ada_forward)(params, img, position, gumbel1, gumbel2)
    jax.tree_util.tree_map(jax.block_until_ready, outs)

    shapes = [tuple(o.shape) for o in outs]
    assert shapes == [(T, B, 2), (T, B, 2), (T, B, 1),
                      (T, B, 2), (T, B, 2), (T, B, 1)], shapes
    print("KERNEL_OK")
</pallas_src>

<mosaic_0001>
module attributes {stable_mosaic.version = 11 : i64} {
  func.func @conv_bn_relu_kernel(%arg0: i32, %arg1: memref<512x64xbf16, #tpu.memory_space<vmem>>, %arg2: memref<64x128xbf16, #tpu.memory_space<vmem>>, %arg3: memref<1x128xf32, #tpu.memory_space<vmem>>, %arg4: memref<1x128xf32, #tpu.memory_space<vmem>>, %arg5: memref<512x128xf32, #tpu.memory_space<vmem>>) attributes {dimension_semantics = [#tpu.dimension_semantics<parallel>], iteration_bounds = array<i64: 8>, scalar_prefetch = 0 : i64, scratch_operands = 0 : i64, tpu.core_type = #tpu.core_type<tc>, window_params = [{transform_indices = @transform_0, window_bounds = array<i64: 512, 64>}, {pipeline_mode = #tpu.pipeline_mode<synchronous>, transform_indices = @transform_1, window_bounds = array<i64: 64, 128>}, {pipeline_mode = #tpu.pipeline_mode<synchronous>, transform_indices = @transform_2, window_bounds = array<i64: 1, 128>}, {pipeline_mode = #tpu.pipeline_mode<synchronous>, transform_indices = @transform_3, window_bounds = array<i64: 1, 128>}, {transform_indices = @transform_4, window_bounds = array<i64: 512, 128>}]} {
    %c0 = arith.constant 0 : index
    %c0_0 = arith.constant 0 : index
    %0 = vector.load %arg1[%c0, %c0_0] : memref<512x64xbf16, #tpu.memory_space<vmem>>, vector<512x64xbf16>
    %c0_1 = arith.constant 0 : index
    %c0_2 = arith.constant 0 : index
    %1 = vector.load %arg2[%c0_1, %c0_2] : memref<64x128xbf16, #tpu.memory_space<vmem>>, vector<64x128xbf16>
    %cst = arith.constant dense<0.000000e+00> : vector<512x128xf32>
    %2 = tpu.matmul %0, %1, %cst {dimension_numbers = #tpu.dot_dimension_numbers<[1], [0], [0], [1], [0, 0, 1, 1], [], []>} : vector<512x64xbf16>, vector<64x128xbf16>, vector<512x128xf32> -> vector<512x128xf32>
    %c0_3 = arith.constant 0 : index
    %c0_4 = arith.constant 0 : index
    %3 = vector.load %arg3[%c0_3, %c0_4] : memref<1x128xf32, #tpu.memory_space<vmem>>, vector<1x128xf32>
    %4 = vector.broadcast %3 : vector<1x128xf32> to vector<512x128xf32>
    %5 = arith.mulf %2, %4 : vector<512x128xf32>
    %c0_5 = arith.constant 0 : index
    %c0_6 = arith.constant 0 : index
    %6 = vector.load %arg4[%c0_5, %c0_6] : memref<1x128xf32, #tpu.memory_space<vmem>>, vector<1x128xf32>
    %7 = vector.broadcast %6 : vector<1x128xf32> to vector<512x128xf32>
    %8 = arith.addf %5, %7 : vector<512x128xf32>
    %cst_7 = arith.constant 0.000000e+00 : f32
    %9 = vector.broadcast %cst_7 : f32 to vector<512x128xf32>
    %10 = arith.maximumf %8, %9 : vector<512x128xf32>
    %c0_8 = arith.constant 0 : index
    %c0_9 = arith.constant 0 : index
    %11 = vector.load %arg5[%c0_8, %c0_9] : memref<512x128xf32, #tpu.memory_space<vmem>>, vector<512x128xf32>
    tpu.vector_store %arg5[%c0_8, %c0_9], %10 {strides = array<i32>} : memref<512x128xf32, #tpu.memory_space<vmem>>, vector<512x128xf32>,
    return
  }
  func.func @transform_0(%arg0: i32) -> (i32, i32) {
    %c0_i32 = arith.constant 0 : i32
    %c0_i32_0 = arith.constant 0 : i32
    return %arg0, %c0_i32 : i32, i32
  }
  func.func @transform_1(%arg0: i32) -> (i32, i32) {
    %c0_i32 = arith.constant 0 : i32
    %c0_i32_0 = arith.constant 0 : i32
    %c0_i32_1 = arith.constant 0 : i32
    return %c0_i32, %c0_i32_0 : i32, i32
  }
  func.func @transform_2(%arg0: i32) -> (i32, i32) {
    %c0_i32 = arith.constant 0 : i32
    %c0_i32_0 = arith.constant 0 : i32
    %c0_i32_1 = arith.constant 0 : i32
    return %c0_i32, %c0_i32_0 : i32, i32
  }
  func.func @transform_3(%arg0: i32) -> (i32, i32) {
    %c0_i32 = arith.constant 0 : i32
    %c0_i32_0 = arith.constant 0 : i32
    %c0_i32_1 = arith.constant 0 : i32
    return %c0_i32, %c0_i32_0 : i32, i32
  }
  func.func @transform_4(%arg0: i32) -> (i32, i32) {
    %c0_i32 = arith.constant 0 : i32
    %c0_i32_0 = arith.constant 0 : i32
    return %arg0, %c0_i32 : i32, i32
  }
}

module attributes {stable_mosaic.version = 11 : i64} {
  func.func @pool_proj_kernel(%arg0: i32, %arg1: memref<8x64x64xf32, #tpu.memory_space<vmem>>, %arg2: memref<64x128xbf16, #tpu.memory_space<vmem>>, %arg3: memref<1x128xf32, #tpu.memory_space<vmem>>, %arg4: memref<8x128xf32, #tpu.memory_space<vmem>>) attributes {dimension_semantics = [#tpu.dimension_semantics<parallel>], iteration_bounds = array<i64: 2>, scalar_prefetch = 0 : i64, scratch_operands = 0 : i64, tpu.core_type = #tpu.core_type<tc>, window_params = [{transform_indices = @transform_0, window_bounds = array<i64: 8, 64, 64>}, {pipeline_mode = #tpu.pipeline_mode<synchronous>, transform_indices = @transform_1, window_bounds = array<i64: 64, 128>}, {pipeline_mode = #tpu.pipeline_mode<synchronous>, transform_indices = @transform_2, window_bounds = array<i64: 1, 128>}, {transform_indices = @transform_3, window_bounds = array<i64: 8, 128>}]} {
    %c0 = arith.constant 0 : index
    %c0_0 = arith.constant 0 : index
    %c0_1 = arith.constant 0 : index
    %0 = vector.load %arg1[%c0, %c0_0, %c0_1] : memref<8x64x64xf32, #tpu.memory_space<vmem>>, vector<8x64x64xf32>
    %cst = arith.constant dense<0.000000e+00> : vector<8x64xf32>
    %1 = vector.multi_reduction <add>, %0, %cst [1] : vector<8x64x64xf32> to vector<8x64xf32>
    %cst_2 = arith.constant 1.562500e-02 : f32
    %2 = vector.broadcast %cst_2 : f32 to vector<8x64xf32>
    %3 = arith.mulf %1, %2 : vector<8x64xf32>
    %4 = arith.truncf %3 : vector<8x64xf32> to vector<8x64xbf16>
    %c0_3 = arith.constant 0 : index
    %c0_4 = arith.constant 0 : index
    %5 = vector.load %arg2[%c0_3, %c0_4] : memref<64x128xbf16, #tpu.memory_space<vmem>>, vector<64x128xbf16>
    %cst_5 = arith.constant dense<0.000000e+00> : vector<8x128xf32>
    %6 = tpu.matmul %4, %5, %cst_5 {dimension_numbers = #tpu.dot_dimension_numbers<[1], [0], [0], [1], [0, 0, 1, 1], [], []>} : vector<8x64xbf16>, vector<64x128xbf16>, vector<8x128xf32> -> vector<8x128xf32>
    %c0_6 = arith.constant 0 : index
    %c0_7 = arith.constant 0 : index
    %7 = vector.load %arg3[%c0_6, %c0_7] : memref<1x128xf32, #tpu.memory_space<vmem>>, vector<1x128xf32>
    %8 = vector.broadcast %7 : vector<1x128xf32> to vector<8x128xf32>
    %9 = arith.addf %6, %8 : vector<8x128xf32>
    %c0_8 = arith.constant 0 : index
    %c0_9 = arith.constant 0 : index
    %10 = vector.load %arg4[%c0_8, %c0_9] : memref<8x128xf32, #tpu.memory_space<vmem>>, vector<8x128xf32>
    tpu.vector_store %arg4[%c0_8, %c0_9], %9 {strides = array<i32>} : memref<8x128xf32, #tpu.memory_space<vmem>>, vector<8x128xf32>,
    return
  }
  func.func @transform_0(%arg0: i32) -> (i32, i32, i32) {
    %c0_i32 = arith.constant 0 : i32
    %c0_i32_0 = arith.constant 0 : i32
    %c0_i32_1 = arith.constant 0 : i32
    return %arg0, %c0_i32, %c0_i32_0 : i32, i32, i32
  }
  func.func @transform_1(%arg0: i32) -> (i32, i32) {
    %c0_i32 = arith.constant 0 : i32
    %c0_i32_0 = arith.constant 0 : i32
    %c0_i32_1 = arith.constant 0 : i32
    return %c0_i32, %c0_i32_0 : i32, i32
  }
  func.func @transform_2(%arg0: i32) -> (i32, i32) {
    %c0_i32 = arith.constant 0 : i32
    %c0_i32_0 = arith.constant 0 : i32
    %c0_i32_1 = arith.constant 0 : i32
    return %c0_i32, %c0_i32_0 : i32, i32
  }
  func.func @transform_3(%arg0: i32) -> (i32, i32) {
    %c0_i32 = arith.constant 0 : i32
    %c0_i32_0 = arith.constant 0 : i32
    return %arg0, %c0_i32 : i32, i32
  }
}

module attributes {stable_mosaic.version = 11 : i64} {
  func.func @matmul_bias_kernel(%arg0: i32, %arg1: i32, %arg2: memref<16x128xbf16, #tpu.memory_space<vmem>>, %arg3: memref<128x512xbf16, #tpu.memory_space<vmem>>, %arg4: memref<1x512xf32, #tpu.memory_space<vmem>>, %arg5: memref<16x512xf32, #tpu.memory_space<vmem>>) attributes {dimension_semantics = [#tpu.dimension_semantics<parallel>, #tpu.dimension_semantics<parallel>], iteration_bounds = array<i64: 1, 2>, scalar_prefetch = 0 : i64, scratch_operands = 0 : i64, tpu.core_type = #tpu.core_type<tc>, window_params = [{transform_indices = @transform_0, window_bounds = array<i64: 16, 128>}, {transform_indices = @transform_1, window_bounds = array<i64: 128, 512>}, {transform_indices = @transform_2, window_bounds = array<i64: 1, 512>}, {transform_indices = @transform_3, window_bounds = array<i64: 16, 512>}]} {
    %c0 = arith.constant 0 : index
    %c0_0 = arith.constant 0 : index
    %0 = vector.load %arg2[%c0, %c0_0] : memref<16x128xbf16, #tpu.memory_space<vmem>>, vector<16x128xbf16>
    %c0_1 = arith.constant 0 : index
    %c0_2 = arith.constant 0 : index
    %1 = vector.load %arg3[%c0_1, %c0_2] : memref<128x512xbf16, #tpu.memory_space<vmem>>, vector<128x512xbf16>
    %cst = arith.constant dense<0.000000e+00> : vector<16x512xf32>
    %2 = tpu.matmul %0, %1, %cst {dimension_numbers = #tpu.dot_dimension_numbers<[1], [0], [0], [1], [0, 0, 1, 1], [], []>} : vector<16x128xbf16>, vector<128x512xbf16>, vector<16x512xf32> -> vector<16x512xf32>
    %c0_3 = arith.constant 0 : index
    %c0_4 = arith.constant 0 : index
    %3 = vector.load %arg4[%c0_3, %c0_4] : memref<1x512xf32, #tpu.memory_space<vmem>>, vector<1x512xf32>
    %4 = vector.broadcast %3 : vector<1x512xf32> to vector<16x512xf32>
    %5 = arith.addf %2, %4 : vector<16x512xf32>
    %c0_5 = arith.constant 0 : index
    %c0_6 = arith.constant 0 : index
    %6 = vector.load %arg5[%c0_5, %c0_6] : memref<16x512xf32, #tpu.memory_space<vmem>>, vector<16x512xf32>
    tpu.vector_store %arg5[%c0_5, %c0_6], %5 {strides = array<i32>} : memref<16x512xf32, #tpu.memory_space<vmem>>, vector<16x512xf32>,
    return
  }
  func.func @transform_0(%arg0: i32, %arg1: i32) -> (i32, i32) {
    %c0_i32 = arith.constant 0 : i32
    %c0_i32_0 = arith.constant 0 : i32
    return %arg0, %c0_i32 : i32, i32
  }
  func.func @transform_1(%arg0: i32, %arg1: i32) -> (i32, i32) {
    %c0_i32 = arith.constant 0 : i32
    %c0_i32_0 = arith.constant 0 : i32
    return %c0_i32, %arg1 : i32, i32
  }
  func.func @transform_2(%arg0: i32, %arg1: i32) -> (i32, i32) {
    %c0_i32 = arith.constant 0 : i32
    %c0_i32_0 = arith.constant 0 : i32
    return %c0_i32, %arg1 : i32, i32
  }
  func.func @transform_3(%arg0: i32, %arg1: i32) -> (i32, i32) {
    %c0_i32 = arith.constant 0 : i32
    return %arg0, %arg1 : i32, i32
  }
}

module attributes {stable_mosaic.version = 11 : i64} {
  func.func @lstm_duo_kernel(%arg0: i32, %arg1: memref<1x8x2x512xf32, #tpu.memory_space<vmem>>, %arg2: memref<1x8x2x2xf32, #tpu.memory_space<vmem>>, %arg3: memref<1x128x512xbf16, #tpu.memory_space<vmem>>, %arg4: memref<1x128x2xf32, #tpu.memory_space<vmem>>, %arg5: memref<1x1x2xf32, #tpu.memory_space<vmem>>, %arg6: memref<1x128x3xf32, #tpu.memory_space<vmem>>, %arg7: memref<1x1x3xf32, #tpu.memory_space<vmem>>, %arg8: memref<1x128x2xf32, #tpu.memory_space<vmem>>, %arg9: memref<1x1x2xf32, #tpu.memory_space<vmem>>, %arg10: memref<1x8x2x2xf32, #tpu.memory_space<vmem>>, %arg11: memref<1x8x2x2xf32, #tpu.memory_space<vmem>>, %arg12: memref<1x8x2x1xf32, #tpu.memory_space<vmem>>, %arg13: memref<2x128xf32, #tpu.memory_space<vmem>>, %arg14: memref<2x128xf32, #tpu.memory_space<vmem>>) attributes {dimension_semantics = [#tpu.dimension_semantics<parallel>], iteration_bounds = array<i64: 2>, scalar_prefetch = 0 : i64, scratch_operands = 2 : i64, tpu.core_type = #tpu.core_type<tc>, window_params = [{transform_indices = @transform_0, window_bounds = array<i64: 1, 8, 2, 512>}, {transform_indices = @transform_1, window_bounds = array<i64: 1, 8, 2, 2>}, {transform_indices = @transform_2, window_bounds = array<i64: 1, 128, 512>}, {transform_indices = @transform_3, window_bounds = array<i64: 1, 128, 2>}, {transform_indices = @transform_4, window_bounds = array<i64: 1, 1, 2>}, {transform_indices = @transform_5, window_bounds = array<i64: 1, 128, 3>}, {transform_indices = @transform_6, window_bounds = array<i64: 1, 1, 3>}, {transform_indices = @transform_7, window_bounds = array<i64: 1, 128, 2>}, {transform_indices = @transform_8, window_bounds = array<i64: 1, 1, 2>}, {transform_indices = @transform_9, window_bounds = array<i64: 1, 8, 2, 2>}, {transform_indices = @transform_10, window_bounds = array<i64: 1, 8, 2, 2>}, {transform_indices = @transform_11, window_bounds = array<i64: 1, 8, 2, 1>}]} {
    %c0 = arith.constant 0 : index
    %c0_0 = arith.constant 0 : index
    %c0_1 = arith.constant 0 : index
    %c0_2 = arith.constant 0 : index
    %0 = vector.load %arg1[%c0, %c0_0, %c0_1, %c0_2] : memref<1x8x2x512xf32, #tpu.memory_space<vmem>>, vector<1x1x2x512xf32>
    %1 = vector.shape_cast %0 : vector<1x1x2x512xf32> to vector<2x512xf32>
    %cst = arith.constant 0.000000e+00 : f32
    %2 = vector.broadcast %cst : f32 to vector<2x128xf32>
    %3 = vector.extract_strided_slice %1 {offsets = [0, 0], sizes = [2, 128], strides = [1, 1]} : vector<2x512xf32> to vector<2x128xf32>
    %4 = arith.negf %3 : vector<2x128xf32>
    %5 = math.exp %4 : vector<2x128xf32>
    %cst_3 = arith.constant 1.000000e+00 : f32
    %6 = vector.broadcast %cst_3 : f32 to vector<2x128xf32>
    %7 = arith.addf %6, %5 : vector<2x128xf32>
    %8 = arith.divf %6, %7 : vector<2x128xf32>
    %9 = vector.extract_strided_slice %1 {offsets = [0, 128], sizes = [2, 128], strides = [1, 1]} : vector<2x512xf32> to vector<2x128xf32>
    %10 = arith.negf %9 : vector<2x128xf32>
    %11 = math.exp %10 : vector<2x128xf32>
    %cst_4 = arith.constant 1.000000e+00 : f32
    %12 = vector.broadcast %cst_4 : f32 to vector<2x128xf32>
    %13 = arith.addf %12, %11 : vector<2x128xf32>
    %14 = arith.divf %12, %13 : vector<2x128xf32>
    %15 = vector.extract_strided_slice %1 {offsets = [0, 256], sizes = [2, 128], strides = [1, 1]} : vector<2x512xf32> to vector<2x128xf32>
    %16 = math.tanh %15 : vector<2x128xf32>
    %17 = vector.extract_strided_slice %1 {offsets = [0, 384], sizes = [2, 128], strides = [1, 1]} : vector<2x512xf32> to vector<2x128xf32>
    %18 = arith.negf %17 : vector<2x128xf32>
    %19 = math.exp %18 : vector<2x128xf32>
    %cst_5 = arith.constant 1.000000e+00 : f32
    %20 = vector.broadcast %cst_5 : f32 to vector<2x128xf32>
    %21 = arith.addf %20, %19 : vector<2x128xf32>
    %22 = arith.divf %20, %21 : vector<2x128xf32>
    %23 = arith.mulf %14, %2 : vector<2x128xf32>
    %24 = arith.mulf %8, %16 : vector<2x128xf32>
    %25 = arith.addf %23, %24 : vector<2x128xf32>
    %26 = math.tanh %25 : vector<2x128xf32>
    %27 = arith.mulf %22, %26 : vector<2x128xf32>
    %c0_6 = arith.constant 0 : index
    %c0_7 = arith.constant 0 : index
    %28 = vector.load %arg13[%c0_6, %c0_7] : memref<2x128xf32, #tpu.memory_space<vmem>>, vector<2x128xf32>
    tpu.vector_store %arg13[%c0_6, %c0_7], %27 {strides = array<i32>} : memref<2x128xf32, #tpu.memory_space<vmem>>, vector<2x128xf32>,
    %c0_8 = arith.constant 0 : index
    %c0_9 = arith.constant 0 : index
    %29 = vector.load %arg14[%c0_8, %c0_9] : memref<2x128xf32, #tpu.memory_space<vmem>>, vector<2x128xf32>
    tpu.vector_store %arg14[%c0_8, %c0_9], %25 {strides = array<i32>} : memref<2x128xf32, #tpu.memory_space<vmem>>, vector<2x128xf32>,
    %c0_10 = arith.constant 0 : index
    %c0_11 = arith.constant 0 : index
    %c0_12 = arith.constant 0 : index
    %30 = vector.load %arg6[%c0_10, %c0_11, %c0_12] : memref<1x128x3xf32, #tpu.memory_space<vmem>>, vector<1x128x3xf32>
    %31 = vector.shape_cast %30 : vector<1x128x3xf32> to vector<128x3xf32>
    %cst_13 = arith.constant dense<0.000000e+00> : vector<2x3xf32>
    %32 = tpu.matmul %27, %31, %cst_13 {dimension_numbers = #tpu.dot_dimension_numbers<[1], [0], [0], [1], [0, 0, 1, 1], [], []>} : vector<2x128xf32>, vector<128x3xf32>, vector<2x3xf32> -> vector<2x3xf32>
    %c0_14 = arith.constant 0 : index
    %c0_15 = arith.constant 0 : index
    %c0_16 = arith.constant 0 : index
    %33 = vector.load %arg7[%c0_14, %c0_15, %c0_16] : memref<1x1x3xf32, #tpu.memory_space<vmem>>, vector<1x1x3xf32>
    %34 = vector.shape_cast %33 : vector<1x1x3xf32> to vector<1x3xf32>
    %35 = vector.broadcast %34 : vector<1x3xf32> to vector<2x3xf32>
    %36 = arith.addf %32, %35 : vector<2x3xf32>
    %c0_17 = arith.constant 0 : index
    %c0_18 = arith.constant 0 : index
    %c0_19 = arith.constant 0 : index
    %37 = vector.load %arg8[%c0_17, %c0_18, %c0_19] : memref<1x128x2xf32, #tpu.memory_space<vmem>>, vector<1x128x2xf32>
    %38 = vector.shape_cast %37 : vector<1x128x2xf32> to vector<128x2xf32>
    %cst_20 = arith.constant dense<0.000000e+00> : vector<2x2xf32>
    %39 = tpu.matmul %25, %38, %cst_20 {dimension_numbers = #tpu.dot_dimension_numbers<[1], [0], [0], [1], [0, 0, 1, 1], [], []>} : vector<2x128xf32>, vector<128x2xf32>, vector<2x2xf32> -> vector<2x2xf32>
    %c0_21 = arith.constant 0 : index
    %c0_22 = arith.constant 0 : index
    %c0_23 = arith.constant 0 : index
    %40 = vector.load %arg9[%c0_21, %c0_22, %c0_23] : memref<1x1x2xf32, #tpu.memory_space<vmem>>, vector<1x1x2xf32>
    %41 = vector.shape_cast %40 : vector<1x1x2xf32> to vector<1x2xf32>
    %42 = vector.broadcast %41 : vector<1x2xf32> to vector<2x2xf32>
    %43 = arith.addf %39, %42 : vector<2x2xf32>
    %44 = vector.extract_strided_slice %36 {offsets = [0, 0], sizes = [2, 2], strides = [1, 1]} : vector<2x3xf32> to vector<2x2xf32>
    %c0_24 = arith.constant 0 : index
    %c0_25 = arith.constant 0 : index
    %c0_26 = arith.constant 0 : index
    %c0_27 = arith.constant 0 : index
    %45 = vector.load %arg10[%c0_24, %c0_25, %c0_26, %c0_27] : memref<1x8x2x2xf32, #tpu.memory_space<vmem>>, vector<1x1x2x2xf32>
    %46 = vector.shape_cast %45 : vector<1x1x2x2xf32> to vector<2x2xf32>
    %47 = vector.shape_cast %44 : vector<2x2xf32> to vector<1x1x2x2xf32>
    tpu.vector_store %arg10[%c0_24, %c0_25, %c0_26, %c0_27], %47 {strides = array<i32>} : memref<1x8x2x2xf32, #tpu.memory_space<vmem>>, vector<1x1x2x2xf32>,
    %48 = vector.extract_strided_slice %36 {offsets = [0, 2], sizes = [2, 1], strides = [1, 1]} : vector<2x3xf32> to vector<2x1xf32>
    %c0_28 = arith.constant 0 : index
    %c0_29 = arith.constant 0 : index
    %c0_30 = arith.constant 0 : index
    %c0_31 = arith.constant 0 : index
    %49 = vector.load %arg12[%c0_28, %c0_29, %c0_30, %c0_31] : memref<1x8x2x1xf32, #tpu.memory_space<vmem>>, vector<1x1x2x1xf32>
    %50 = vector.shape_cast %49 : vector<1x1x2x1xf32> to vector<2x1xf32>
    %51 = vector.shape_cast %48 : vector<2x1xf32> to vector<1x1x2x1xf32>
    tpu.vector_store %arg12[%c0_28, %c0_29, %c0_30, %c0_31], %51 {strides = array<i32>} : memref<1x8x2x1xf32, #tpu.memory_space<vmem>>, vector<1x1x2x1xf32>,
    %c0_32 = arith.constant 0 : index
    %c0_33 = arith.constant 0 : index
    %c0_34 = arith.constant 0 : index
    %c0_35 = arith.constant 0 : index
    %52 = vector.load %arg11[%c0_32, %c0_33, %c0_34, %c0_35] : memref<1x8x2x2xf32, #tpu.memory_space<vmem>>, vector<1x1x2x2xf32>
    %53 = vector.shape_cast %52 : vector<1x1x2x2xf32> to vector<2x2xf32>
    %54 = vector.shape_cast %43 : vector<2x2xf32> to vector<1x1x2x2xf32>
    tpu.vector_store %arg11[%c0_32, %c0_33, %c0_34, %c0_35], %54 {strides = array<i32>} : memref<1x8x2x2xf32, #tpu.memory_space<vmem>>, vector<1x1x2x2xf32>,
    %c0_i32 = arith.constant 0 : i32
    %c7_i32 = arith.constant 7 : i32
    %55 = arith.addi %c0_i32, %c7_i32 : i32
    %c1_i32 = arith.constant 1 : i32
    scf.for %arg15 = %c0_i32 to %55 step %c1_i32  : i32 {
      %c1_i32_37 = arith.constant 1 : i32
      %56 = arith.muli %arg15, %c1_i32_37 : i32
      %c1_i32_38 = arith.constant 1 : i32
      %57 = arith.addi %c1_i32_38, %56 : i32
      %c0_39 = arith.constant 0 : index
      %c0_40 = arith.constant 0 : index
      %58 = vector.load %arg13[%c0_39, %c0_40] : memref<2x128xf32, #tpu.memory_space<vmem>>, vector<2x128xf32>
      %c0_41 = arith.constant 0 : index
      %c0_42 = arith.constant 0 : index
      %59 = vector.load %arg14[%c0_41, %c0_42] : memref<2x128xf32, #tpu.memory_space<vmem>>, vector<2x128xf32>
      %c0_43 = arith.constant 0 : index
      %60 = arith.index_cast %57 : i32 to index
      %c0_44 = arith.constant 0 : index
      %c0_45 = arith.constant 0 : index
      %61 = vector.load %arg1[%c0_43, %60, %c0_44, %c0_45] : memref<1x8x2x512xf32, #tpu.memory_space<vmem>>, vector<1x1x2x512xf32>
      %62 = vector.shape_cast %61 : vector<1x1x2x512xf32> to vector<2x512xf32>
      %63 = arith.truncf %58 : vector<2x128xf32> to vector<2x128xbf16>
      %c0_46 = arith.constant 0 : index
      %c0_47 = arith.constant 0 : index
      %c0_48 = arith.constant 0 : index
      %64 = vector.load %arg3[%c0_46, %c0_47, %c0_48] : memref<1x128x512xbf16, #tpu.memory_space<vmem>>, vector<1x128x512xbf16>
      %65 = vector.shape_cast %64 : vector<1x128x512xbf16> to vector<128x512xbf16>
      %cst_49 = arith.constant dense<0.000000e+00> : vector<2x512xf32>
      %66 = tpu.matmul %63, %65, %cst_49 {dimension_numbers = #tpu.dot_dimension_numbers<[1], [0], [0], [1], [0, 0, 1, 1], [], []>} : vector<2x128xbf16>, vector<128x512xbf16>, vector<2x512xf32> -> vector<2x512xf32>
      %67 = arith.addf %62, %66 : vector<2x512xf32>
      %68 = vector.extract_strided_slice %67 {offsets = [0, 0], sizes = [2, 128], strides = [1, 1]} : vector<2x512xf32> to vector<2x128xf32>
      %69 = arith.negf %68 : vector<2x128xf32>
      %70 = math.exp %69 : vector<2x128xf32>
      %cst_50 = arith.constant 1.000000e+00 : f32
      %71 = vector.broadcast %cst_50 : f32 to vector<2x128xf32>
      %72 = arith.addf %71, %70 : vector<2x128xf32>
      %73 = arith.divf %71, %72 : vector<2x128xf32>
      %74 = vector.extract_strided_slice %67 {offsets = [0, 128], sizes = [2, 128], strides = [1, 1]} : vector<2x512xf32> to vector<2x128xf32>
      %75 = arith.negf %74 : vector<2x128xf32>
      %76 = math.exp %75 : vector<2x128xf32>
      %cst_51 = arith.constant 1.000000e+00 : f32
      %77 = vector.broadcast %cst_51 : f32 to vector<2x128xf32>
      %78 = arith.addf %77, %76 : vector<2x128xf32>
      %79 = arith.divf %77, %78 : vector<2x128xf32>
      %80 = vector.extract_strided_slice %67 {offsets = [0, 256], sizes = [2, 128], strides = [1, 1]} : vector<2x512xf32> to vector<2x128xf32>
      %81 = math.tanh %80 : vector<2x128xf32>
      %82 = vector.extract_strided_slice %67 {offsets = [0, 384], sizes = [2, 128], strides = [1, 1]} : vector<2x512xf32> to vector<2x128xf32>
      %83 = arith.negf %82 : vector<2x128xf32>
      %84 = math.exp %83 : vector<2x128xf32>
      %cst_52 = arith.constant 1.000000e+00 : f32
      %85 = vector.broadcast %cst_52 : f32 to vector<2x128xf32>
      %86 = arith.addf %85, %84 : vector<2x128xf32>
      %87 = arith.divf %85, %86 : vector<2x128xf32>
      %88 = arith.mulf %79, %59 : vector<2x128xf32>
      %89 = arith.mulf %73, %81 : vector<2x128xf32>
      %90 = arith.addf %88, %89 : vector<2x128xf32>
      %91 = math.tanh %90 : vector<2x128xf32>
      %92 = arith.mulf %87, %91 : vector<2x128xf32>
      %93 = arith.subf %92, %58 : vector<2x128xf32>
      %c0_53 = arith.constant 0 : index
      %c0_54 = arith.constant 0 : index
      %c0_55 = arith.constant 0 : index
      %94 = vector.load %arg4[%c0_53, %c0_54, %c0_55] : memref<1x128x2xf32, #tpu.memory_space<vmem>>, vector<1x128x2xf32>
      %95 = vector.shape_cast %94 : vector<1x128x2xf32> to vector<128x2xf32>
      %cst_56 = arith.constant dense<0.000000e+00> : vector<2x2xf32>
      %96 = tpu.matmul %93, %95, %cst_56 {dimension_numbers = #tpu.dot_dimension_numbers<[1], [0], [0], [1], [0, 0, 1, 1], [], []>} : vector<2x128xf32>, vector<128x2xf32>, vector<2x2xf32> -> vector<2x2xf32>
      %c0_57 = arith.constant 0 : index
      %c0_58 = arith.constant 0 : index
      %c0_59 = arith.constant 0 : index
      %97 = vector.load %arg5[%c0_57, %c0_58, %c0_59] : memref<1x1x2xf32, #tpu.memory_space<vmem>>, vector<1x1x2xf32>
      %98 = vector.shape_cast %97 : vector<1x1x2xf32> to vector<1x2xf32>
      %99 = vector.broadcast %98 : vector<1x2xf32> to vector<2x2xf32>
      %100 = arith.addf %96, %99 : vector<2x2xf32>
      %c0_60 = arith.constant 0 : index
      %101 = arith.index_cast %57 : i32 to index
      %c0_61 = arith.constant 0 : index
      %c0_62 = arith.constant 0 : index
      %102 = vector.load %arg2[%c0_60, %101, %c0_61, %c0_62] : memref<1x8x2x2xf32, #tpu.memory_space<vmem>>, vector<1x1x2x2xf32>
      %103 = vector.shape_cast %102 : vector<1x1x2x2xf32> to vector<2x2xf32>
      %104 = arith.addf %100, %103 : vector<2x2xf32>
      %cst_63 = arith.constant dense<0xFF800000> : vector<2xf32>
      %105 = vector.multi_reduction <maximumf>, %104, %cst_63 [1] : vector<2x2xf32> to vector<2xf32>
      %cst_64 = arith.constant 0xFF800000 : f32
      %106 = vector.broadcast %cst_64 : f32 to vector<2xf32>
      %107 = arith.maximumf %106, %105 : vector<2xf32>
      %108 = vector.shape_cast %107 : vector<2xf32> to vector<2x1xf32>
      %109 = vector.broadcast %108 : vector<2x1xf32> to vector<2x2xf32>
      %110 = arith.subf %104, %109 : vector<2x2xf32>
      %111 = math.exp %110 : vector<2x2xf32>
      %cst_65 = arith.constant dense<0.000000e+00> : vector<2xf32>
      %112 = vector.multi_reduction <add>, %111, %cst_65 [1] : vector<2x2xf32> to vector<2xf32>
      %113 = vector.shape_cast %112 : vector<2xf32> to vector<2x1xf32>
      %114 = vector.broadcast %113 : vector<2x1xf32> to vector<2x2xf32>
      %115 = arith.divf %111, %114 : vector<2x2xf32>
      %116 = vector.extract_strided_slice %115 {offsets = [0, 0], sizes = [2, 1], strides = [1, 1]} : vector<2x2xf32> to vector<2x1xf32>
      %117 = vector.broadcast %116 : vector<2x1xf32> to vector<2x128xf32>
      %118 = arith.mulf %58, %117 : vector<2x128xf32>
      %119 = vector.extract_strided_slice %115 {offsets = [0, 1], sizes = [2, 1], strides = [1, 1]} : vector<2x2xf32> to vector<2x1xf32>
      %120 = vector.broadcast %119 : vector<2x1xf32> to vector<2x128xf32>
      %121 = arith.mulf %92, %120 : vector<2x128xf32>
      %122 = arith.addf %118, %121 : vector<2x128xf32>
      %c0_66 = arith.constant 0 : index
      %c0_67 = arith.constant 0 : index
      %123 = vector.load %arg13[%c0_66, %c0_67] : memref<2x128xf32, #tpu.memory_space<vmem>>, vector<2x128xf32>
      tpu.vector_store %arg13[%c0_66, %c0_67], %122 {strides = array<i32>} : memref<2x128xf32, #tpu.memory_space<vmem>>, vector<2x128xf32>,
      %c0_68 = arith.constant 0 : index
      %c0_69 = arith.constant 0 : index
      %124 = vector.load %arg14[%c0_68, %c0_69] : memref<2x128xf32, #tpu.memory_space<vmem>>, vector<2x128xf32>
      tpu.vector_store %arg14[%c0_68, %c0_69], %90 {strides = array<i32>} : memref<2x128xf32, #tpu.memory_space<vmem>>, vector<2x128xf32>,
      %c0_70 = arith.constant 0 : index
      %c0_71 = arith.constant 0 : index
      %c0_72 = arith.constant 0 : index
      %125 = vector.load %arg6[%c0_70, %c0_71, %c0_72] : memref<1x128x3xf32, #tpu.memory_space<vmem>>, vector<1x128x3xf32>
      %126 = vector.shape_cast %125 : vector<1x128x3xf32> to vector<128x3xf32>
      %cst_73 = arith.constant dense<0.000000e+00> : vector<2x3xf32>
      %127 = tpu.matmul %122, %126, %cst_73 {dimension_numbers = #tpu.dot_dimension_numbers<[1], [0], [0], [1], [0, 0, 1, 1], [], []>} : vector<2x128xf32>, vector<128x3xf32>, vector<2x3xf32> -> vector<2x3xf32>
      %c0_74 = arith.constant 0 : index
      %c0_75 = arith.constant 0 : index
      %c0_76 = arith.constant 0 : index
      %128 = vector.load %arg7[%c0_74, %c0_75, %c0_76] : memref<1x1x3xf32, #tpu.memory_space<vmem>>, vector<1x1x3xf32>
      %129 = vector.shape_cast %128 : vector<1x1x3xf32> to vector<1x3xf32>
      %130 = vector.broadcast %129 : vector<1x3xf32> to vector<2x3xf32>
      %131 = arith.addf %127, %130 : vector<2x3xf32>
      %c0_77 = arith.constant 0 : index
      %c0_78 = arith.constant 0 : index
      %c0_79 = arith.constant 0 : index
      %132 = vector.load %arg8[%c0_77, %c0_78, %c0_79] : memref<1x128x2xf32, #tpu.memory_space<vmem>>, vector<1x128x2xf32>
      %133 = vector.shape_cast %132 : vector<1x128x2xf32> to vector<128x2xf32>
      %cst_80 = arith.constant dense<0.000000e+00> : vector<2x2xf32>
      %134 = tpu.matmul %90, %133, %cst_80 {dimension_numbers = #tpu.dot_dimension_numbers<[1], [0], [0], [1], [0, 0, 1, 1], [], []>} : vector<2x128xf32>, vector<128x2xf32>, vector<2x2xf32> -> vector<2x2xf32>
      %c0_81 = arith.constant 0 : index
      %c0_82 = arith.constant 0 : index
      %c0_83 = arith.constant 0 : index
      %135 = vector.load %arg9[%c0_81, %c0_82, %c0_83] : memref<1x1x2xf32, #tpu.memory_space<vmem>>, vector<1x1x2xf32>
      %136 = vector.shape_cast %135 : vector<1x1x2xf32> to vector<1x2xf32>
      %137 = vector.broadcast %136 : vector<1x2xf32> to vector<2x2xf32>
      %138 = arith.addf %134, %137 : vector<2x2xf32>
      %139 = vector.extract_strided_slice %131 {offsets = [0, 0], sizes = [2, 2], strides = [1, 1]} : vector<2x3xf32> to vector<2x2xf32>
      %c0_84 = arith.constant 0 : index
      %140 = arith.index_cast %57 : i32 to index
      %c0_85 = arith.constant 0 : index
      %c0_86 = arith.constant 0 : index
      %141 = vector.load %arg10[%c0_84, %140, %c0_85, %c0_86] : memref<1x8x2x2xf32, #tpu.memory_space<vmem>>, vector<1x1x2x2xf32>
      %142 = vector.shape_cast %141 : vector<1x1x2x2xf32> to vector<2x2xf32>
      %143 = vector.shape_cast %139 : vector<2x2xf32> to vector<1x1x2x2xf32>
      tpu.vector_store %arg10[%c0_84, %140, %c0_85, %c0_86], %143 {strides = array<i32>} : memref<1x8x2x2xf32, #tpu.memory_space<vmem>>, vector<1x1x2x2xf32>,
      %144 = vector.extract_strided_slice %131 {offsets = [0, 2], sizes = [2, 1], strides = [1, 1]} : vector<2x3xf32> to vector<2x1xf32>
      %c0_87 = arith.constant 0 : index
      %145 = arith.index_cast %57 : i32 to index
      %c0_88 = arith.constant 0 : index
      %c0_89 = arith.constant 0 : index
      %146 = vector.load %arg12[%c0_87, %145, %c0_88, %c0_89] : memref<1x8x2x1xf32, #tpu.memory_space<vmem>>, vector<1x1x2x1xf32>
      %147 = vector.shape_cast %146 : vector<1x1x2x1xf32> to vector<2x1xf32>
      %148 = vector.shape_cast %144 : vector<2x1xf32> to vector<1x1x2x1xf32>
      tpu.vector_store %arg12[%c0_87, %145, %c0_88, %c0_89], %148 {strides = array<i32>} : memref<1x8x2x1xf32, #tpu.memory_space<vmem>>, vector<1x1x2x1xf32>,
      %c0_90 = arith.constant 0 : index
      %149 = arith.index_cast %57 : i32 to index
      %c0_91 = arith.constant 0 : index
      %c0_92 = arith.constant 0 : index
      %150 = vector.load %arg11[%c0_90, %149, %c0_91, %c0_92] : memref<1x8x2x2xf32, #tpu.memory_space<vmem>>, vector<1x1x2x2xf32>
      %151 = vector.shape_cast %150 : vector<1x1x2x2xf32> to vector<2x2xf32>
      %152 = vector.shape_cast %138 : vector<2x2xf32> to vector<1x1x2x2xf32>
      tpu.vector_store %arg11[%c0_90, %149, %c0_91, %c0_92], %152 {strides = array<i32>} : memref<1x8x2x2xf32, #tpu.memory_space<vmem>>, vector<1x1x2x2xf32>,
    }
    %c7_i32_36 = arith.constant 7 : i32
    return
  }
  func.func @transform_0(%arg0: i32) -> (i32, i32, i32, i32) {
    %c0_i32 = arith.constant 0 : i32
    %c0_i32_0 = arith.constant 0 : i32
    %c0_i32_1 = arith.constant 0 : i32
    %c0_i32_2 = arith.constant 0 : i32
    return %arg0, %c0_i32, %c0_i32_0, %c0_i32_1 : i32, i32, i32, i32
  }
  func.func @transform_1(%arg0: i32) -> (i32, i32, i32, i32) {
    %c0_i32 = arith.constant 0 : i32
    %c0_i32_0 = arith.constant 0 : i32
    %c0_i32_1 = arith.constant 0 : i32
    %c0_i32_2 = arith.constant 0 : i32
    return %arg0, %c0_i32, %c0_i32_0, %c0_i32_1 : i32, i32, i32, i32
  }
  func.func @transform_2(%arg0: i32) -> (i32, i32, i32) {
    %c0_i32 = arith.constant 0 : i32
    %c0_i32_0 = arith.constant 0 : i32
    %c0_i32_1 = arith.constant 0 : i32
    return %arg0, %c0_i32, %c0_i32_0 : i32, i32, i32
  }
  func.func @transform_3(%arg0: i32) -> (i32, i32, i32) {
    %c0_i32 = arith.constant 0 : i32
    %c0_i32_0 = arith.constant 0 : i32
    %c0_i32_1 = arith.constant 0 : i32
    return %arg0, %c0_i32, %c0_i32_0 : i32, i32, i32
  }
  func.func @transform_4(%arg0: i32) -> (i32, i32, i32) {
    %c0_i32 = arith.constant 0 : i32
    %c0_i32_0 = arith.constant 0 : i32
    %c0_i32_1 = arith.constant 0 : i32
    return %arg0, %c0_i32, %c0_i32_0 : i32, i32, i32
  }
  func.func @transform_5(%arg0: i32) -> (i32, i32, i32) {
    %c0_i32 = arith.constant 0 : i32
    %c0_i32_0 = arith.constant 0 : i32
    %c0_i32_1 = arith.constant 0 : i32
    return %arg0, %c0_i32, %c0_i32_0 : i32, i32, i32
  }
  func.func @transform_6(%arg0: i32) -> (i32, i32, i32) {
    %c0_i32 = arith.constant 0 : i32
    %c0_i32_0 = arith.constant 0 : i32
    %c0_i32_1 = arith.constant 0 : i32
    return %arg0, %c0_i32, %c0_i32_0 : i32, i32, i32
  }
  func.func @transform_7(%arg0: i32) -> (i32, i32, i32) {
    %c0_i32 = arith.constant 0 : i32
    %c0_i32_0 = arith.constant 0 : i32
    %c0_i32_1 = arith.constant 0 : i32
    return %arg0, %c0_i32, %c0_i32_0 : i32, i32, i32
  }
  func.func @transform_8(%arg0: i32) -> (i32, i32, i32) {
    %c0_i32 = arith.constant 0 : i32
    %c0_i32_0 = arith.constant 0 : i32
    %c0_i32_1 = arith.constant 0 : i32
    return %arg0, %c0_i32, %c0_i32_0 : i32, i32, i32
  }
  func.func @transform_9(%arg0: i32) -> (i32, i32, i32, i32) {
    %c0_i32 = arith.constant 0 : i32
    %c0_i32_0 = arith.constant 0 : i32
    %c0_i32_1 = arith.constant 0 : i32
    %c0_i32_2 = arith.constant 0 : i32
    return %arg0, %c0_i32, %c0_i32_0, %c0_i32_1 : i32, i32, i32, i32
  }
  func.func @transform_10(%arg0: i32) -> (i32, i32, i32, i32) {
    %c0_i32 = arith.constant 0 : i32
    %c0_i32_0 = arith.constant 0 : i32
    %c0_i32_1 = arith.constant 0 : i32
    %c0_i32_2 = arith.constant 0 : i32
    return %arg0, %c0_i32, %c0_i32_0, %c0_i32_1 : i32, i32, i32, i32
  }
  func.func @transform_11(%arg0: i32) -> (i32, i32, i32, i32) {
    %c0_i32 = arith.constant 0 : i32
    %c0_i32_0 = arith.constant 0 : i32
    %c0_i32_1 = arith.constant 0 : i32
    %c0_i32_2 = arith.constant 0 : i32
    return %arg0, %c0_i32, %c0_i32_0, %c0_i32_1 : i32, i32, i32, i32
  }
}

</mosaic_0001>

<bundles_post_ra>
// kernel: ada_forward.4
= control target key start
LH: loop header
LB: loop body
LE: loop exit
PB: predicated region body
PF: predicated region fallthrough
CT: control target
= control target key end

     0   :  { %s1444_s15 = smov 0   ;;  %s1747_s0 = inlined_call_operand.vmem [shape: bf16[4096,64], index: 0, kind: input, shape index: {}]   ;;  %s1748_s1 = inlined_call_operand.vmem [shape: bf16[64,128], index: 1, kind: input, shape index: {}]   ;;  %s1749_s2 = inlined_call_operand.vmem [shape: f32[1,128], index: 2, kind: input, shape index: {}]   ;;  %s1750_s3 = inlined_call_operand.vmem [shape: f32[1,128], index: 3, kind: input, shape index: {}]   ;;  %s1751_s4 = inlined_call_operand.vmem [shape: f32[4096,128], index: 4, kind: output, shape index: {}]  }
   0x1 LB: > { %s1170_s16 = sadd.s32 4294967295, %s1417_s15   ;;  %p1174_p0 = scmp.ge.s32.totalorder %s1417_s15, 1  ;;  %s1417_s15 = sphi %s1444_s15, %s14_s15  }
   0x2   : > { %p163_p1 = scmp.lt.s32.totalorder %s1417_s15, 9 }
   0x4   : > { %p164_p2 = pnand %p1174_p0, %p163_p1 }
   0x5   : > { %v1375_v0 = vld [vmem:[%s1748_s1] sm:$0xff] (!%p164_p2)   ;;  %s1175_s19 = sshll.u32 (!%p164_p2), %s1170_s16, 6  ;;  %v1376_v1 = vld [vmem:[%s1748_s1 + $0x8] sm:$0xff] (!%p164_p2)   ;;  %v1377_v2 = vld [vmem:[%s1748_s1 + $0x10] sm:$0xff] (!%p164_p2)   ;;  %vm458_vm0 = vcmask (!%p164_p2), 523264  }
   0x6   : > { %167 = sbr.rel (%p164_p2) target bundleno = 300 (0x12c), region = 36  ;;  %p190_p3 = scmp.lt.s32.totalorder (!%p164_p2), %s1175_s19, 511  ;;  %1287 = vmatprep.subr.bf16.mxu0 (!%p164_p2), %v1375_v0  ;;  %1359 = vmatprep.subr.bf16.mxu1 (!%p164_p2), %v1375_v0  ;;  %v1378_v3 = vld [vmem:[%s1748_s1 + $0x18] sm:$0xff] (!%p164_p2)   ;;  %v1539_v36 = vld [vmem:[%s1749_s2] ss:$0 sm:$0xff] (!%p164_p2) }
   0x7   : > { %1288 = vmatpush3.bf16.msra.mxu0 (!%p164_p2), %v1375_v0  ;;  %1363 = vmatpush3.bf16.msra.mxu1 (!%p164_p2), %v1375_v0  ;;  %v1544_v38 = vld [vmem:[%s1750_s3] ss:$0 sm:$0xff] (!%p164_p2) }
   0x8   : > { %1289 = vmatprep.subr.bf16.mxu0 (!%p164_p2), %v1376_v1  ;;  %1360 = vmatprep.subr.bf16.mxu1 (!%p164_p2), %v1376_v1 }
   0xb   : > { %1290 = vmatpush3.bf16.msra.mxu0 (!%p164_p2), %v1376_v1  ;;  %1364 = vmatpush3.bf16.msra.mxu1 (!%p164_p2), %v1376_v1 }
   0xc   : > { %1291 = vmatprep.subr.bf16.mxu0 (!%p164_p2), %v1377_v2  ;;  %1361 = vmatprep.subr.bf16.mxu1 (!%p164_p2), %v1377_v2 }
   0xd   : > { %s1753_s19 = smov (!%p190_p3, %s1175_s19), 511 }
   0xe   : > { %s1176_s24 = sshll.u32 %s1753_s19, 2  ;;  %s1178_s8 = sshll.u32 %s1753_s19, 3 }
   0xf   : > { %s1470_s29 = scalar_lea.vmem %s1747_s0, %s1176_s24  ;;  %1292 = vmatpush3.bf16.msra.mxu0 %v1377_v2  ;;  %1365 = vmatpush3.bf16.msra.mxu1 %v1377_v2  ;;  %s1558_s11 = scalar_lea.vmem %s1751_s4, %s1178_s8 }
  0x10   : > { %v1379_v4 = vld [vmem:[%s1470_s29] sm:$0xff]   ;;  %1293 = vmatprep.subr.bf16.mxu0 %v1378_v3  ;;  %1362 = vmatprep.subr.bf16.mxu1 %v1378_v3  ;;  %v1381_v6 = vld [vmem:[%s1470_s29 + $0x8] sm:$0xff]   ;;  %v1383_v8 = vld [vmem:[%s1470_s29 + $0x10] sm:$0xff]  }
  0x11   : > { %v1380_v5 = vld [vmem:[%s1470_s29 + $0x80] sm:$0xff]   ;;  %1295 = vmatprep.mubr.msk.bf16.mxu0 %vm458_vm0, %v1379_v4  ;;  %v1382_v7 = vld [vmem:[%s1470_s29 + $0x88] sm:$0xff]   ;;  %v1384_v9 = vld [vmem:[%s1470_s29 + $0x90] sm:$0xff]  }
  0x12   : > { %1327 = vmatprep.mubr.msk.bf16.mxu1 %vm458_vm0, %v1380_v5  ;;  %v1385_v10 = vld [vmem:[%s1470_s29 + $0x18] sm:$0xff]   ;;  %v1387_v12 = vld [vmem:[%s1470_s29 + $0x20] sm:$0xff]   ;;  %v1389_v14 = vld [vmem:[%s1470_s29 + $0x28] sm:$0xff]  }
  0x13   : > { %1294 = vmatpush3.bf16.msra.mxu0 %v1378_v3  ;;  %1366 = vmatpush3.bf16.msra.mxu1 %v1378_v3  ;;  %v1386_v11 = vld [vmem:[%s1470_s29 + $0x98] sm:$0xff]   ;;  %v1388_v13 = vld [vmem:[%s1470_s29 + $0xa0] sm:$0xff]   ;;  %v1390_v15 = vld [vmem:[%s1470_s29 + $0xa8] sm:$0xff]  }
  0x14   : > { %v1391_v16 = vld [vmem:[%s1470_s29 + $0x30] sm:$0xff]   ;;  %v1393_v18 = vld [vmem:[%s1470_s29 + $0x38] sm:$0xff]   ;;  %v1395_v20 = vld [vmem:[%s1470_s29 + $0x40] sm:$0xff]  }
  0x15   : > { %v1392_v17 = vld [vmem:[%s1470_s29 + $0xb0] sm:$0xff]   ;;  %v1394_v19 = vld [vmem:[%s1470_s29 + $0xb8] sm:$0xff]   ;;  %v1396_v21 = vld [vmem:[%s1470_s29 + $0xc0] sm:$0xff]  }
  0x16   : > { %1296 = vmatmul.mubr.msk.bf16.vlgmr.msra.gmra.mrb[0].mxu0 %vm458_vm0, %v1381_v6  ;;  %1328 = vmatmul.mubr.msk.bf16.vlgmr.msra.gmra.mrb[0].mxu1 %vm458_vm0, %v1382_v7  ;;  %v1397_v22 = vld [vmem:[%s1470_s29 + $0x48] sm:$0xff]   ;;  %v1399_v24 = vld [vmem:[%s1470_s29 + $0x50] sm:$0xff]   ;;  %v1401_v26 = vld [vmem:[%s1470_s29 + $0x58] sm:$0xff]  }
  0x17   : > { %1299 = vmatprep.mubr.msk.bf16.mxu0 %vm458_vm0, %v1383_v8  ;;  %1331 = vmatprep.mubr.msk.bf16.mxu1 %vm458_vm0, %v1384_v9  ;;  %v1398_v23 = vld [vmem:[%s1470_s29 + $0xc8] sm:$0xff]   ;;  %v1400_v25 = vld [vmem:[%s1470_s29 + $0xd0] sm:$0xff]   ;;  %v1402_v27 = vld [vmem:[%s1470_s29 + $0xd8] sm:$0xff]  }
  0x18   : > { %v1403_v28 = vld [vmem:[%s1470_s29 + $0x60] sm:$0xff]   ;;  %v1405_v30 = vld [vmem:[%s1470_s29 + $0x68] sm:$0xff]   ;;  %v1407_v32 = vld [vmem:[%s1470_s29 + $0x70] sm:$0xff]  }
  0x19   : > { %v1404_v29 = vld [vmem:[%s1470_s29 + $0xe0] sm:$0xff]   ;;  %v1406_v31 = vld [vmem:[%s1470_s29 + $0xe8] sm:$0xff]   ;;  %v1408_v33 = vld [vmem:[%s1470_s29 + $0xf0] sm:$0xff]  }
  0x1a   : > { %v1409_v34 = vld [vmem:[%s1470_s29 + $0x78] sm:$0xff]  }
  0x1b   : > { %v1410_v35 = vld [vmem:[%s1470_s29 + $0xf8] sm:$0xff]  }
  0x1e   : > { %1300 = vmatmul.mubr.msk.bf16.gmra.mrb[4].mxu0 %vm458_vm0, %v1385_v10  ;;  %1332 = vmatmul.mubr.msk.bf16.gmra.mrb[4].mxu1 %vm458_vm0, %v1386_v11 }
  0x1f   : > { %1303 = vmatprep.mubr.msk.bf16.mxu0 %vm458_vm0, %v1387_v12  ;;  %1335 = vmatprep.mubr.msk.bf16.mxu1 %vm458_vm0, %v1388_v13 }
  0x26   : > { %1304 = vmatmul.mubr.msk.bf16.gmra.mrb[8].mxu0 %vm458_vm0, %v1389_v14  ;;  %1336 = vmatmul.mubr.msk.bf16.gmra.mrb[8].mxu1 %vm458_vm0, %v1390_v15 }
  0x27   : > { %1307 = vmatprep.mubr.msk.bf16.mxu0 %vm458_vm0, %v1391_v16  ;;  %1339 = vmatprep.mubr.msk.bf16.mxu1 %vm458_vm0, %v1392_v17 }
  0x2e   : > { %1308 = vmatmul.mubr.msk.bf16.gmra.mrb[12].mxu0 %vm458_vm0, %v1393_v18  ;;  %1340 = vmatmul.mubr.msk.bf16.gmra.mrb[12].mxu1 %vm458_vm0, %v1394_v19 }
  0x2f   : > { %1311 = vmatprep.mubr.msk.bf16.mxu0 %vm458_vm0, %v1395_v20  ;;  %1343 = vmatprep.mubr.msk.bf16.mxu1 %vm458_vm0, %v1396_v21 }
  0x36   : > { %1312 = vmatmul.mubr.msk.bf16.gmra.mrb[16].mxu0 %vm458_vm0, %v1397_v22  ;;  %1344 = vmatmul.mubr.msk.bf16.gmra.mrb[16].mxu1 %vm458_vm0, %v1398_v23 }
  0x37   : > { %1315 = vmatprep.mubr.msk.bf16.mxu0 %vm458_vm0, %v1399_v24  ;;  %1347 = vmatprep.mubr.msk.bf16.mxu1 %vm458_vm0, %v1400_v25 }
  0x3e   : > { %1316 = vmatmul.mubr.msk.bf16.gmra.mrb[20].mxu0 %vm458_vm0, %v1401_v26  ;;  %1348 = vmatmul.mubr.msk.bf16.gmra.mrb[20].mxu1 %vm458_vm0, %v1402_v27 }
  0x3f   : > { %1319 = vmatprep.mubr.msk.bf16.mxu0 %vm458_vm0, %v1403_v28  ;;  %1351 = vmatprep.mubr.msk.bf16.mxu1 %vm458_vm0, %v1404_v29 }
  0x46   : > { %1320 = vmatmul.mubr.msk.bf16.gmra.mrb[24].mxu0 %vm458_vm0, %v1405_v30  ;;  %1352 = vmatmul.mubr.msk.bf16.gmra.mrb[24].mxu1 %vm458_vm0, %v1406_v31 }
  0x47   : > { %1323 = vmatprep.mubr.msk.bf16.mxu0 %vm458_vm0, %v1407_v32  ;;  %1355 = vmatprep.mubr.msk.bf16.mxu1 %vm458_vm0, %v1408_v33 }
  0x4e   : > { %1324 = vmatmul.mubr.msk.bf16.gmra.mrb[28].mxu0 %vm458_vm0, %v1409_v34  ;;  %1356 = vmatmul.mubr.msk.bf16.gmra.mrb[28].mxu1 %vm458_vm0, %v1410_v35 }
  0xe9   : > { %v1297_v37 = vpop.f32.mrb[0].mxu0  ;;  %v1329_v39 = vpop.f32.mrb[0].mxu1 }
  0xea   : > { %v853_v40 = vmul.f32 %v1297_v37, %v1539_v36  ;;  %v885_v41 = vmul.f32 %v1329_v39, %v1539_v36  ;;  %v589_v42 = vpop.f32.mrb[1].mxu0  ;;  %v717_v43 = vpop.f32.mrb[1].mxu1 }
  0xeb   : > { %v851_v44 = vmul.f32 %v1539_v36, %v589_v42  ;;  %v883_v45 = vmul.f32 %v1539_v36, %v717_v43  ;;  %v1298_v46 = vpop.f32.mrb[2].mxu0  ;;  %v1330_v47 = vpop.f32.mrb[2].mxu1 }
  0xec   : > { %v924_v48 = vadd.f32 %v1544_v38, %v853_v40  ;;  %v956_v49 = vadd.f32 %v1544_v38, %v885_v41  ;;  %v854_v50 = vmul.f32 %v1298_v46, %v1539_v36  ;;  %v886_v51 = vmul.f32 %v1330_v47, %v1539_v36  ;;  %v592_v52 = vpop.f32.mrb[3].mxu0  ;;  %v720_v53 = vpop.f32.mrb[3].mxu1 }
  0xed   : > { %v922_v54 = vadd.f32 %v1544_v38, %v851_v44  ;;  %v954_v55 = vadd.f32 %v1544_v38, %v883_v45  ;;  %v852_v56 = vmul.f32 %v1539_v36, %v592_v52  ;;  %v884_v57 = vmul.f32 %v1539_v36, %v720_v53 }
  0xee   : > { %v988_v58 = vmax.f32 %v924_v48, 0.0  ;;  %v1020_v59 = vmax.f32 %v956_v49, 0.0  ;;  %v925_v60 = vadd.f32 %v1544_v38, %v854_v50  ;;  %v957_v61 = vadd.f32 %v1544_v38, %v886_v51 }
  0xef   : > { %v986_v62 = vmax.f32 %v922_v54, 0.0  ;;  %v1018_v63 = vmax.f32 %v954_v55, 0.0  ;;  %v923_v0 = vadd.f32 %v1544_v38, %v852_v56  ;;  %v955_v1 = vadd.f32 %v1544_v38, %v884_v57 }
  0xf0   : > { %1052 = vst [vmem:[%s1558_s11 + $0x10] sm:$0xff] %v988_v58  ;;  %1084 = vst [vmem:[%s1558_s11 + $0x110] sm:$0xff] %v1020_v59  ;;  %v989_v2 = vmax.f32 %v925_v60, 0.0  ;;  %v1021_v3 = vmax.f32 %v957_v61, 0.0 }
  0xf1   : > { %1050 = vst [vmem:[%s1558_s11] sm:$0xff] %v986_v62  ;;  %1082 = vst [vmem:[%s1558_s11 + $0x100] sm:$0xff] %v1018_v63  ;;  %v987_v4 = vmax.f32 %v923_v0, 0.0  ;;  %v1019_v5 = vmax.f32 %v955_v1, 0.0  ;;  %v1301_v6 = vpop.f32.mrb[4].mxu0  ;;  %v1333_v7 = vpop.f32.mrb[4].mxu1 }
  0xf2   : > { %1053 = vst [vmem:[%s1558_s11 + $0x18] sm:$0xff] %v989_v2  ;;  %1085 = vst [vmem:[%s1558_s11 + $0x118] sm:$0xff] %v1021_v3  ;;  %v857_v8 = vmul.f32 %v1301_v6, %v1539_v36  ;;  %v889_v9 = vmul.f32 %v1333_v7, %v1539_v36  ;;  %v605_v10 = vpop.f32.mrb[5].mxu0  ;;  %v733_v11 = vpop.f32.mrb[5].mxu1 }
  0xf3   : > { %1051 = vst [vmem:[%s1558_s11 + $0x8] sm:$0xff] %v987_v4  ;;  %1083 = vst [vmem:[%s1558_s11 + $0x108] sm:$0xff] %v1019_v5  ;;  %v855_v12 = vmul.f32 %v1539_v36, %v605_v10  ;;  %v887_v13 = vmul.f32 %v1539_v36, %v733_v11  ;;  %v1302_v14 = vpop.f32.mrb[6].mxu0  ;;  %v1334_v15 = vpop.f32.mrb[6].mxu1 }
  0xf4   : > { %v928_v16 = vadd.f32 %v1544_v38, %v857_v8  ;;  %v960_v17 = vadd.f32 %v1544_v38, %v889_v9  ;;  %v858_v18 = vmul.f32 %v1302_v14, %v1539_v36  ;;  %v890_v19 = vmul.f32 %v1334_v15, %v1539_v36  ;;  %v608_v20 = vpop.f32.mrb[7].mxu0  ;;  %v736_v21 = vpop.f32.mrb[7].mxu1 }
  0xf5   : > { %v926_v22 = vadd.f32 %v1544_v38, %v855_v12  ;;  %v958_v23 = vadd.f32 %v1544_v38, %v887_v13  ;;  %v856_v24 = vmul.f32 %v1539_v36, %v608_v20  ;;  %v888_v25 = vmul.f32 %v1539_v36, %v736_v21 }
  0xf6   : > { %v992_v26 = vmax.f32 %v928_v16, 0.0  ;;  %v1024_v27 = vmax.f32 %v960_v17, 0.0  ;;  %v929_v28 = vadd.f32 %v1544_v38, %v858_v18  ;;  %v961_v29 = vadd.f32 %v1544_v38, %v890_v19 }
  0xf7   : > { %v990_v30 = vmax.f32 %v926_v22, 0.0  ;;  %v1022_v31 = vmax.f32 %v958_v23, 0.0  ;;  %v927_v32 = vadd.f32 %v1544_v38, %v856_v24  ;;  %v959_v33 = vadd.f32 %v1544_v38, %v888_v25 }
  0xf8   : > { %1056 = vst [vmem:[%s1558_s11 + $0x30] sm:$0xff] %v992_v26  ;;  %1088 = vst [vmem:[%s1558_s11 + $0x130] sm:$0xff] %v1024_v27  ;;  %v993_v34 = vmax.f32 %v929_v28, 0.0  ;;  %v1025_v35 = vmax.f32 %v961_v29, 0.0 }
  0xf9   : > { %1054 = vst [vmem:[%s1558_s11 + $0x20] sm:$0xff] %v990_v30  ;;  %1086 = vst [vmem:[%s1558_s11 + $0x120] sm:$0xff] %v1022_v31  ;;  %v991_v37 = vmax.f32 %v927_v32, 0.0  ;;  %v1023_v39 = vmax.f32 %v959_v33, 0.0  ;;  %v1305_v40 = vpop.f32.mrb[8].mxu0  ;;  %v1337_v41 = vpop.f32.mrb[8].mxu1 }
  0xfa   : > { %1057 = vst [vmem:[%s1558_s11 + $0x38] sm:$0xff] %v993_v34  ;;  %1089 = vst [vmem:[%s1558_s11 + $0x138] sm:$0xff] %v1025_v35  ;;  %v861_v42 = vmul.f32 %v1305_v40, %v1539_v36  ;;  %v893_v43 = vmul.f32 %v1337_v41, %v1539_v36  ;;  %v621_v44 = vpop.f32.mrb[9].mxu0  ;;  %v749_v45 = vpop.f32.mrb[9].mxu1 }
  0xfb   : > { %1055 = vst [vmem:[%s1558_s11 + $0x28] sm:$0xff] %v991_v37  ;;  %1087 = vst [vmem:[%s1558_s11 + $0x128] sm:$0xff] %v1023_v39  ;;  %v859_v46 = vmul.f32 %v1539_v36, %v621_v44  ;;  %v891_v47 = vmul.f32 %v1539_v36, %v749_v45  ;;  %v1306_v48 = vpop.f32.mrb[10].mxu0  ;;  %v1338_v49 = vpop.f32.mrb[10].mxu1 }
  0xfc   : > { %v932_v50 = vadd.f32 %v1544_v38, %v861_v42  ;;  %v964_v51 = vadd.f32 %v1544_v38, %v893_v43  ;;  %v862_v52 = vmul.f32 %v1306_v48, %v1539_v36  ;;  %v894_v53 = vmul.f32 %v1338_v49, %v1539_v36  ;;  %v624_v54 = vpop.f32.mrb[11].mxu0  ;;  %v752_v55 = vpop.f32.mrb[11].mxu1 }
  0xfd   : > { %v930_v56 = vadd.f32 %v1544_v38, %v859_v46  ;;  %v962_v57 = vadd.f32 %v1544_v38, %v891_v47  ;;  %v860_v58 = vmul.f32 %v1539_v36, %v624_v54  ;;  %v892_v59 = vmul.f32 %v1539_v36, %v752_v55 }
  0xfe   : > { %v996_v60 = vmax.f32 %v932_v50, 0.0  ;;  %v1028_v61 = vmax.f32 %v964_v51, 0.0  ;;  %v933_v62 = vadd.f32 %v1544_v38, %v862_v52  ;;  %v965_v63 = vadd.f32 %v1544_v38, %v894_v53 }
  0xff   : > { %v994_v0 = vmax.f32 %v930_v56, 0.0  ;;  %v1026_v1 = vmax.f32 %v962_v57, 0.0  ;;  %v931_v2 = vadd.f32 %v1544_v38, %v860_v58  ;;  %v963_v3 = vadd.f32 %v1544_v38, %v892_v59 }
 0x100   : > { %1060 = vst [vmem:[%s1558_s11 + $0x50] sm:$0xff] %v996_v60  ;;  %1092 = vst [vmem:[%s1558_s11 + $0x150] sm:$0xff] %v1028_v61  ;;  %v997_v4 = vmax.f32 %v933_v62, 0.0  ;;  %v1029_v5 = vmax.f32 %v965_v63, 0.0 }
 0x101   : > { %1058 = vst [vmem:[%s1558_s11 + $0x40] sm:$0xff] %v994_v0  ;;  %1090 = vst [vmem:[%s1558_s11 + $0x140] sm:$0xff] %v1026_v1  ;;  %v995_v6 = vmax.f32 %v931_v2, 0.0  ;;  %v1027_v7 = vmax.f32 %v963_v3, 0.0  ;;  %v1309_v8 = vpop.f32.mrb[12].mxu0  ;;  %v1341_v9 = vpop.f32.mrb[12].mxu1 }
 0x102   : > { %1061 = vst [vmem:[%s1558_s11 + $0x58] sm:$0xff] %v997_v4  ;;  %1093 = vst [vmem:[%s1558_s11 + $0x158] sm:$0xff] %v1029_v5  ;;  %v865_v10 = vmul.f32 %v1309_v8, %v1539_v36  ;;  %v897_v11 = vmul.f32 %v1341_v9, %v1539_v36  ;;  %v637_v12 = vpop.f32.mrb[13].mxu0  ;;  %v765_v13 = vpop.f32.mrb[13].mxu1 }
 0x103   : > { %1059 = vst [vmem:[%s1558_s11 + $0x48] sm:$0xff] %v995_v6  ;;  %1091 = vst [vmem:[%s1558_s11 + $0x148] sm:$0xff] %v1027_v7  ;;  %v863_v14 = vmul.f32 %v1539_v36, %v637_v12  ;;  %v895_v15 = vmul.f32 %v1539_v36, %v765_v13  ;;  %v1310_v16 = vpop.f32.mrb[14].mxu0  ;;  %v1342_v17 = vpop.f32.mrb[14].mxu1 }
 0x104   : > { %v936_v18 = vadd.f32 %v1544_v38, %v865_v10  ;;  %v968_v19 = vadd.f32 %v1544_v38, %v897_v11  ;;  %v866_v20 = vmul.f32 %v1310_v16, %v1539_v36  ;;  %v898_v21 = vmul.f32 %v1342_v17, %v1539_v36  ;;  %v640_v22 = vpop.f32.mrb[15].mxu0  ;;  %v768_v23 = vpop.f32.mrb[15].mxu1 }
 0x105   : > { %v934_v24 = vadd.f32 %v1544_v38, %v863_v14  ;;  %v966_v25 = vadd.f32 %v1544_v38, %v895_v15  ;;  %v864_v26 = vmul.f32 %v1539_v36, %v640_v22  ;;  %v896_v27 = vmul.f32 %v1539_v36, %v768_v23 }
 0x106   : > { %v1000_v28 = vmax.f32 %v936_v18, 0.0  ;;  %v1032_v29 = vmax.f32 %v968_v19, 0.0  ;;  %v937_v30 = vadd.f32 %v1544_v38, %v866_v20  ;;  %v969_v31 = vadd.f32 %v1544_v38, %v898_v21 }
 0x107   : > { %v998_v32 = vmax.f32 %v934_v24, 0.0  ;;  %v1030_v33 = vmax.f32 %v966_v25, 0.0  ;;  %v935_v34 = vadd.f32 %v1544_v38, %v864_v26  ;;  %v967_v35 = vadd.f32 %v1544_v38, %v896_v27 }
 0x108   : > { %1064 = vst [vmem:[%s1558_s11 + $0x70] sm:$0xff] %v1000_v28  ;;  %1096 = vst [vmem:[%s1558_s11 + $0x170] sm:$0xff] %v1032_v29  ;;  %v1001_v37 = vmax.f32 %v937_v30, 0.0  ;;  %v1033_v39 = vmax.f32 %v969_v31, 0.0 }
 0x109   : > { %1062 = vst [vmem:[%s1558_s11 + $0x60] sm:$0xff] %v998_v32  ;;  %1094 = vst [vmem:[%s1558_s11 + $0x160] sm:$0xff] %v1030_v33  ;;  %v999_v40 = vmax.f32 %v935_v34, 0.0  ;;  %v1031_v41 = vmax.f32 %v967_v35, 0.0  ;;  %v1313_v42 = vpop.f32.mrb[16].mxu0  ;;  %v1345_v43 = vpop.f32.mrb[16].mxu1 }
 0x10a   : > { %1065 = vst [vmem:[%s1558_s11 + $0x78] sm:$0xff] %v1001_v37  ;;  %1097 = vst [vmem:[%s1558_s11 + $0x178] sm:$0xff] %v1033_v39  ;;  %v869_v44 = vmul.f32 %v1313_v42, %v1539_v36  ;;  %v901_v45 = vmul.f32 %v1345_v43, %v1539_v36  ;;  %v653_v46 = vpop.f32.mrb[17].mxu0  ;;  %v781_v47 = vpop.f32.mrb[17].mxu1 }
 0x10b   : > { %1063 = vst [vmem:[%s1558_s11 + $0x68] sm:$0xff] %v999_v40  ;;  %1095 = vst [vmem:[%s1558_s11 + $0x168] sm:$0xff] %v1031_v41  ;;  %v867_v48 = vmul.f32 %v1539_v36, %v653_v46  ;;  %v899_v49 = vmul.f32 %v1539_v36, %v781_v47  ;;  %v1314_v50 = vpop.f32.mrb[18].mxu0  ;;  %v1346_v51 = vpop.f32.mrb[18].mxu1 }
 0x10c   : > { %v940_v52 = vadd.f32 %v1544_v38, %v869_v44  ;;  %v972_v53 = vadd.f32 %v1544_v38, %v901_v45  ;;  %v870_v54 = vmul.f32 %v1314_v50, %v1539_v36  ;;  %v902_v55 = vmul.f32 %v1346_v51, %v1539_v36  ;;  %v656_v56 = vpop.f32.mrb[19].mxu0  ;;  %v784_v57 = vpop.f32.mrb[19].mxu1 }
 0x10d   : > { %v938_v58 = vadd.f32 %v1544_v38, %v867_v48  ;;  %v970_v59 = vadd.f32 %v1544_v38, %v899_v49  ;;  %v868_v60 = vmul.f32 %v1539_v36, %v656_v56  ;;  %v900_v61 = vmul.f32 %v1539_v36, %v784_v57 }
 0x10e   : > { %v1004_v62 = vmax.f32 %v940_v52, 0.0  ;;  %v1036_v63 = vmax.f32 %v972_v53, 0.0  ;;  %v941_v0 = vadd.f32 %v1544_v38, %v870_v54  ;;  %v973_v1 = vadd.f32 %v1544_v38, %v902_v55 }
 0x10f   : > { %v1002_v2 = vmax.f32 %v938_v58, 0.0  ;;  %v1034_v3 = vmax.f32 %v970_v59, 0.0  ;;  %v939_v4 = vadd.f32 %v1544_v38, %v868_v60  ;;  %v971_v5 = vadd.f32 %v1544_v38, %v900_v61 }
 0x110   : > { %1068 = vst [vmem:[%s1558_s11 + $0x90] sm:$0xff] %v1004_v62  ;;  %1100 = vst [vmem:[%s1558_s11 + $0x190] sm:$0xff] %v1036_v63  ;;  %v1005_v6 = vmax.f32 %v941_v0, 0.0  ;;  %v1037_v7 = vmax.f32 %v973_v1, 0.0 }
 0x111   : > { %1066 = vst [vmem:[%s1558_s11 + $0x80] sm:$0xff] %v1002_v2  ;;  %1098 = vst [vmem:[%s1558_s11 + $0x180] sm:$0xff] %v1034_v3  ;;  %v1003_v8 = vmax.f32 %v939_v4, 0.0  ;;  %v1035_v9 = vmax.f32 %v971_v5, 0.0  ;;  %v1317_v10 = vpop.f32.mrb[20].mxu0  ;;  %v1349_v11 = vpop.f32.mrb[20].mxu1 }
 0x112   : > { %1069 = vst [vmem:[%s1558_s11 + $0x98] sm:$0xff] %v1005_v6  ;;  %1101 = vst [vmem:[%s1558_s11 + $0x198] sm:$0xff] %v1037_v7  ;;  %v873_v12 = vmul.f32 %v1317_v10, %v1539_v36  ;;  %v905_v13 = vmul.f32 %v1349_v11, %v1539_v36  ;;  %v669_v14 = vpop.f32.mrb[21].mxu0  ;;  %v797_v15 = vpop.f32.mrb[21].mxu1 }
 0x113   : > { %1067 = vst [vmem:[%s1558_s11 + $0x88] sm:$0xff] %v1003_v8  ;;  %1099 = vst [vmem:[%s1558_s11 + $0x188] sm:$0xff] %v1035_v9  ;;  %v871_v16 = vmul.f32 %v1539_v36, %v669_v14  ;;  %v903_v17 = vmul.f32 %v1539_v36, %v797_v15  ;;  %v1318_v18 = vpop.f32.mrb[22].mxu0  ;;  %v1350_v19 = vpop.f32.mrb[22].mxu1 }
 0x114   : > { %v944_v20 = vadd.f32 %v1544_v38, %v873_v12  ;;  %v976_v21 = vadd.f32 %v1544_v38, %v905_v13  ;;  %v874_v22 = vmul.f32 %v1318_v18, %v1539_v36  ;;  %v906_v23 = vmul.f32 %v1350_v19, %v1539_v36  ;;  %v672_v24 = vpop.f32.mrb[23].mxu0  ;;  %v800_v25 = vpop.f32.mrb[23].mxu1 }
 0x115   : > { %v942_v26 = vadd.f32 %v1544_v38, %v871_v16  ;;  %v974_v27 = vadd.f32 %v1544_v38, %v903_v17  ;;  %v872_v28 = vmul.f32 %v1539_v36, %v672_v24  ;;  %v904_v29 = vmul.f32 %v1539_v36, %v800_v25 }
 0x116   : > { %v1008_v30 = vmax.f32 %v944_v20, 0.0  ;;  %v1040_v31 = vmax.f32 %v976_v21, 0.0  ;;  %v945_v32 = vadd.f32 %v1544_v38, %v874_v22  ;;  %v977_v33 = vadd.f32 %v1544_v38, %v906_v23 }
 0x117   : > { %v1006_v34 = vmax.f32 %v942_v26, 0.0  ;;  %v1038_v35 = vmax.f32 %v974_v27, 0.0  ;;  %v943_v37 = vadd.f32 %v1544_v38, %v872_v28  ;;  %v975_v39 = vadd.f32 %v1544_v38, %v904_v29 }
 0x118   : > { %1072 = vst [vmem:[%s1558_s11 + $0xb0] sm:$0xff] %v1008_v30  ;;  %1104 = vst [vmem:[%s1558_s11 + $0x1b0] sm:$0xff] %v1040_v31  ;;  %v1009_v40 = vmax.f32 %v945_v32, 0.0  ;;  %v1041_v41 = vmax.f32 %v977_v33, 0.0 }
 0x119   : > { %1070 = vst [vmem:[%s1558_s11 + $0xa0] sm:$0xff] %v1006_v34  ;;  %1102 = vst [vmem:[%s1558_s11 + $0x1a0] sm:$0xff] %v1038_v35  ;;  %v1007_v42 = vmax.f32 %v943_v37, 0.0  ;;  %v1039_v43 = vmax.f32 %v975_v39, 0.0  ;;  %v1321_v44 = vpop.f32.mrb[24].mxu0  ;;  %v1353_v45 = vpop.f32.mrb[24].mxu1 }
 0x11a   : > { %1073 = vst [vmem:[%s1558_s11 + $0xb8] sm:$0xff] %v1009_v40  ;;  %1105 = vst [vmem:[%s1558_s11 + $0x1b8] sm:$0xff] %v1041_v41  ;;  %v877_v46 = vmul.f32 %v1321_v44, %v1539_v36  ;;  %v909_v47 = vmul.f32 %v1353_v45, %v1539_v36  ;;  %v685_v48 = vpop.f32.mrb[25].mxu0  ;;  %v813_v49 = vpop.f32.mrb[25].mxu1 }
 0x11b   : > { %1071 = vst [vmem:[%s1558_s11 + $0xa8] sm:$0xff] %v1007_v42  ;;  %1103 = vst [vmem:[%s1558_s11 + $0x1a8] sm:$0xff] %v1039_v43  ;;  %v875_v50 = vmul.f32 %v1539_v36, %v685_v48  ;;  %v907_v51 = vmul.f32 %v1539_v36, %v813_v49  ;;  %v1322_v52 = vpop.f32.mrb[26].mxu0  ;;  %v1354_v53 = vpop.f32.mrb[26].mxu1 }
 0x11c   : > { %v948_v54 = vadd.f32 %v1544_v38, %v877_v46  ;;  %v980_v55 = vadd.f32 %v1544_v38, %v909_v47  ;;  %v878_v56 = vmul.f32 %v1322_v52, %v1539_v36  ;;  %v910_v57 = vmul.f32 %v1354_v53, %v1539_v36  ;;  %v688_v58 = vpop.f32.mrb[27].mxu0  ;;  %v816_v59 = vpop.f32.mrb[27].mxu1 }
 0x11d   : > { %v946_v60 = vadd.f32 %v1544_v38, %v875_v50  ;;  %v978_v61 = vadd.f32 %v1544_v38, %v907_v51  ;;  %v876_v62 = vmul.f32 %v1539_v36, %v688_v58  ;;  %v908_v63 = vmul.f32 %v1539_v36, %v816_v59 }
 0x11e   : > { %v1012_v0 = vmax.f32 %v948_v54, 0.0  ;;  %v1044_v1 = vmax.f32 %v980_v55, 0.0  ;;  %v949_v2 = vadd.f32 %v1544_v38, %v878_v56  ;;  %v981_v3 = vadd.f32 %v1544_v38, %v910_v57 }
 0x11f   : > { %v1010_v4 = vmax.f32 %v946_v60, 0.0  ;;  %v1042_v5 = vmax.f32 %v978_v61, 0.0  ;;  %v947_v6 = vadd.f32 %v1544_v38, %v876_v62  ;;  %v979_v7 = vadd.f32 %v1544_v38, %v908_v63 }
 0x120   : > { %1076 = vst [vmem:[%s1558_s11 + $0xd0] sm:$0xff] %v1012_v0  ;;  %1108 = vst [vmem:[%s1558_s11 + $0x1d0] sm:$0xff] %v1044_v1  ;;  %v1013_v8 = vmax.f32 %v949_v2, 0.0  ;;  %v1045_v9 = vmax.f32 %v981_v3, 0.0 }
 0x121   : > { %1074 = vst [vmem:[%s1558_s11 + $0xc0] sm:$0xff] %v1010_v4  ;;  %1106 = vst [vmem:[%s1558_s11 + $0x1c0] sm:$0xff] %v1042_v5  ;;  %v1011_v10 = vmax.f32 %v947_v6, 0.0  ;;  %v1043_v11 = vmax.f32 %v979_v7, 0.0  ;;  %v1325_v12 = vpop.f32.mrb[28].mxu0  ;;  %v1357_v13 = vpop.f32.mrb[28].mxu1 }
 0x122   : > { %1077 = vst [vmem:[%s1558_s11 + $0xd8] sm:$0xff] %v1013_v8  ;;  %1109 = vst [vmem:[%s1558_s11 + $0x1d8] sm:$0xff] %v1045_v9  ;;  %v881_v14 = vmul.f32 %v1325_v12, %v1539_v36  ;;  %v913_v15 = vmul.f32 %v1357_v13, %v1539_v36  ;;  %v701_v16 = vpop.f32.mrb[29].mxu0  ;;  %v829_v17 = vpop.f32.mrb[29].mxu1 }
 0x123   : > { %1075 = vst [vmem:[%s1558_s11 + $0xc8] sm:$0xff] %v1011_v10  ;;  %1107 = vst [vmem:[%s1558_s11 + $0x1c8] sm:$0xff] %v1043_v11  ;;  %v879_v18 = vmul.f32 %v1539_v36, %v701_v16  ;;  %v911_v19 = vmul.f32 %v1539_v36, %v829_v17  ;;  %v1326_v20 = vpop.f32.mrb[30].mxu0  ;;  %v1358_v21 = vpop.f32.mrb[30].mxu1 }
 0x124   : > { %v952_v22 = vadd.f32 %v1544_v38, %v881_v14  ;;  %v984_v23 = vadd.f32 %v1544_v38, %v913_v15  ;;  %v882_v24 = vmul.f32 %v1326_v20, %v1539_v36  ;;  %v914_v25 = vmul.f32 %v1358_v21, %v1539_v36  ;;  %v704_v26 = vpop.f32.mrb[31].mxu0  ;;  %v832_v27 = vpop.f32.mrb[31].mxu1 }
 0x125   : > { %v950_v28 = vadd.f32 %v1544_v38, %v879_v18  ;;  %v982_v29 = vadd.f32 %v1544_v38, %v911_v19  ;;  %v880_v30 = vmul.f32 %v1539_v36, %v704_v26  ;;  %v912_v31 = vmul.f32 %v1539_v36, %v832_v27 }
 0x126   : > { %v1016_v32 = vmax.f32 %v952_v22, 0.0  ;;  %v1048_v33 = vmax.f32 %v984_v23, 0.0  ;;  %v953_v34 = vadd.f32 %v1544_v38, %v882_v24  ;;  %v985_v35 = vadd.f32 %v1544_v38, %v914_v25 }
 0x127   : > { %v1014_v37 = vmax.f32 %v950_v28, 0.0  ;;  %v1046_v39 = vmax.f32 %v982_v29, 0.0  ;;  %v951_v40 = vadd.f32 %v1544_v38, %v880_v30  ;;  %v983_v41 = vadd.f32 %v1544_v38, %v912_v31 }
 0x128   : > { %1080 = vst [vmem:[%s1558_s11 + $0xf0] sm:$0xff] %v1016_v32  ;;  %1112 = vst [vmem:[%s1558_s11 + $0x1f0] sm:$0xff] %v1048_v33  ;;  %v1017_v42 = vmax.f32 %v953_v34, 0.0  ;;  %v1049_v36 = vmax.f32 %v985_v35, 0.0 }
 0x129   : > { %1078 = vst [vmem:[%s1558_s11 + $0xe0] sm:$0xff] %v1014_v37  ;;  %1110 = vst [vmem:[%s1558_s11 + $0x1e0] sm:$0xff] %v1046_v39  ;;  %v1015_v43 = vmax.f32 %v951_v40, 0.0  ;;  %v1047_v44 = vmax.f32 %v983_v41, 0.0 }
 0x12a   : > { %1081 = vst [vmem:[%s1558_s11 + $0xf8] sm:$0xff] %v1017_v42  ;;  %1113 = vst [vmem:[%s1558_s11 + $0x1f8] sm:$0xff] %v1049_v36 }
 0x12b   : > { %1079 = vst [vmem:[%s1558_s11 + $0xe8] sm:$0xff] %v1015_v43  ;;  %1111 = vst [vmem:[%s1558_s11 + $0x1e8] sm:$0xff] %v1047_v44 }
 0x12c PF: > { %s14_s15 = sadd.s32 1, %s1417_s15  }
 0x12d   : > { %p11_p4 = scmp.ge.s32.totalorder %s14_s15, 10  }
 0x12f   :  { %13 = sbr.rel (!%p11_p4) target bundleno = 1 (0x1), region = 66 }

// kernel: ada_forward.5
= control target key start
LH: loop header
LB: loop body
LE: loop exit
PB: predicated region body
PF: predicated region fallthrough
CT: control target
= control target key end

     0   :  { %s670_s12 = smov 0   ;;  %s838_s0 = inlined_call_operand.vmem [shape: f32[16,64,64], index: 0, kind: input, shape index: {}]   ;;  %s839_s1 = inlined_call_operand.vmem [shape: bf16[64,128], index: 1, kind: input, shape index: {}]   ;;  %s840_s2 = inlined_call_operand.vmem [shape: f32[1,128], index: 2, kind: input, shape index: {}]   ;;  %s841_s3 = inlined_call_operand.vmem [shape: f32[16,128], index: 3, kind: output, shape index: {}]  }
   0x1 LB: > { %s676_s13 = sadd.s32 4294967295, %s646_s12   ;;  %p595_p0 = scmp.ge.s32.totalorder %s646_s12, 1  ;;  %s646_s12 = sphi %s670_s12, %s13_s12  }
   0x2   : > { %p139_p1 = scmp.lt.s32.totalorder %s646_s12, 3 }
   0x4   : > { %p140_p2 = pnand %p595_p0, %p139_p1 }
   0x5   : > { %v636_v0 = vld [vmem:[%s839_s1] sm:$0xff] (!%p140_p2)   ;;  %v648_v1 = vmov (!%p140_p2), 0.0   ;;  %v637_v2 = vld [vmem:[%s839_s1 + $0x8] sm:$0xff] (!%p140_p2)   ;;  %vm649_vm0 = vmmov (!%p140_p2), 0   ;;  %s596_s18 = sshll.u32 (!%p140_p2), %s676_s13, 3  ;;  %v638_v3 = vld [vmem:[%s839_s1 + $0x10] sm:$0xff] (!%p140_p2)  }
   0x6   : > { %143 = sbr.rel (%p140_p2) target bundleno = 298 (0x12a), region = 32  ;;  %614 = vmatprep.subr.bf16.mxu0 (!%p140_p2), %v648_v1  ;;  %622 = vmatprep.mubr.msk.bf16.mxu0 (!%p140_p2), %vm649_vm0, %v648_v1  ;;  %p164_p3 = scmp.lt.s32.totalorder (!%p140_p2), %s596_s18, 15  ;;  %vm239_vm1 = vcmask (!%p140_p2), 523264   ;;  %v639_v4 = vld [vmem:[%s839_s1 + $0x18] sm:$0xff] (!%p140_p2)   ;;  %vm455_vm2 = vcmask (!%p140_p2), 1041409   ;;  %vm457_vm3 = vcmask (!%p140_p2), 1042434  }
   0x7   : > { %615 = vmatpush3.bf16.msra.mxu0 (!%p140_p2), %v636_v0  ;;  %vm459_vm4 = vcmask (!%p140_p2), 1043459   ;;  %vm461_vm5 = vcmask (!%p140_p2), 1044484   ;;  %vm463_vm6 = vcmask (!%p140_p2), 1045509   ;;  %vm465_vm7 = vcmask (!%p140_p2), 1046534   ;;  %p170_p4 = scmp.lt.s32.totalorder (!%p140_p2), %s676_s13, 1 }
   0x8   : > { %616 = vmatprep.subr.bf16.mxu0 (!%p140_p2), %v648_v1  ;;  %vm467_vm8 = vcmask (!%p140_p2), 1047559  }
   0xb   : > { %617 = vmatpush3.bf16.msra.mxu0 (!%p140_p2), %v637_v2 }
   0xc   : > { %618 = vmatprep.subr.bf16.mxu0 (!%p140_p2), %v648_v1 }
   0xd   : > { %s843_s18 = smov (!%p164_p3, %s596_s18), 15  ;;  %s845_s13 = smov (!%p170_p4, %s676_s13), 1 }
   0xe   : > { %s608_s21 = sshll.u32 %s843_s18, 6  ;;  %s599_s27 = sshll.u32 %s845_s13, 3 }
   0xf   : > { %s696_s26 = scalar_lea.vmem %s838_s0, %s608_s21  ;;  %619 = vmatpush3.bf16.msra.mxu0 %v638_v3  ;;  %s173_s5 = scalar_lea.vmem %s841_s3, %s599_s27 }
  0x10   : > { %v175_v5 = vld [vmem:[%s696_s26] sm:$0xff]  ;;  %v176_v6 = vld [vmem:[%s696_s26 + $0x8] sm:$0xff]  ;;  %v177_v7 = vld [vmem:[%s696_s26 + $0x10] sm:$0xff]  ;;  %620 = vmatprep.subr.bf16.mxu0 %v648_v1 }
  0x11   : > { %v178_v8 = vld [vmem:[%s696_s26 + $0x18] sm:$0xff]  ;;  %v179_v9 = vld [vmem:[%s696_s26 + $0x20] sm:$0xff]  ;;  %v180_v10 = vld [vmem:[%s696_s26 + $0x28] sm:$0xff]  ;;  %v240_v11 = vsel %vm239_vm1, %v175_v5, 0.0  ;;  %v241_v12 = vsel %vm239_vm1, %v176_v6, 0.0  ;;  %v243_v13 = vsel %vm239_vm1, %v177_v7, 0.0 }
  0x12   : > { %v181_v14 = vld [vmem:[%s696_s26 + $0x30] sm:$0xff]  ;;  %v182_v15 = vld [vmem:[%s696_s26 + $0x38] sm:$0xff]  ;;  %v183_v16 = vld [vmem:[%s696_s26 + $0x40] sm:$0xff]  ;;  %v242_v17 = vadd.f32 %v241_v12, %v240_v11  ;;  %v245_v21 = vsel %vm239_vm1, %v178_v8, 0.0  ;;  %v247_v26 = vsel %vm239_vm1, %v179_v9, 0.0  ;;  %v249_v32 = vsel %vm239_vm1, %v180_v10, 0.0 }
  0x13   : > { %v184_v18 = vld [vmem:[%s696_s26 + $0x48] sm:$0xff]  ;;  %v185_v19 = vld [vmem:[%s696_s26 + $0x50] sm:$0xff]  ;;  %v186_v20 = vld [vmem:[%s696_s26 + $0x58] sm:$0xff]  ;;  %v261_v22 = vsel %vm239_vm1, %v183_v16, 0.0  ;;  %621 = vmatpush3.bf16.msra.mxu0 %v639_v4  ;;  %v251_v33 = vsel %vm239_vm1, %v181_v14, 0.0  ;;  %v253_v34 = vsel %vm239_vm1, %v182_v15, 0.0 }
  0x14   : > { %v187_v23 = vld [vmem:[%s696_s26 + $0x60] sm:$0xff]  ;;  %v188_v24 = vld [vmem:[%s696_s26 + $0x68] sm:$0xff]  ;;  %v244_v25 = vadd.f32 %v243_v13, %v242_v17  ;;  %v262_v27 = vsel %vm239_vm1, %v184_v18, 0.0  ;;  %v264_v28 = vsel %vm239_vm1, %v185_v19, 0.0  ;;  %v189_v29 = vld [vmem:[%s696_s26 + $0x70] sm:$0xff]  ;;  %v266_v40 = vsel %vm239_vm1, %v186_v20, 0.0 }
  0x15   : > { %v191_v30 = vld [vmem:[%s696_s26 + $0x80] sm:$0xff]  ;;  %v192_v31 = vld [vmem:[%s696_s26 + $0x88] sm:$0xff]  ;;  %v263_v35 = vadd.f32 %v262_v27, %v261_v22  ;;  %v190_v36 = vld [vmem:[%s696_s26 + $0x78] sm:$0xff]  ;;  %v268_v46 = vsel %vm239_vm1, %v187_v23, 0.0  ;;  %v270_v53 = vsel %vm239_vm1, %v188_v24, 0.0  ;;  %v272_v54 = vsel %vm239_vm1, %v189_v29, 0.0 }
  0x16   : > { %v193_v37 = vld [vmem:[%s696_s26 + $0x90] sm:$0xff]  ;;  %v194_v38 = vld [vmem:[%s696_s26 + $0x98] sm:$0xff]  ;;  %v246_v39 = vadd.f32 %v245_v21, %v244_v25  ;;  %v282_v41 = vsel %vm239_vm1, %v191_v30, 0.0  ;;  %v283_v42 = vsel %vm239_vm1, %v192_v31, 0.0  ;;  %v195_v43 = vld [vmem:[%s696_s26 + $0xa0] sm:$0xff]  ;;  %v274_v60 = vsel %vm239_vm1, %v190_v36, 0.0 }
  0x17   : > { %v196_v44 = vld [vmem:[%s696_s26 + $0xa8] sm:$0xff]  ;;  %v265_v45 = vadd.f32 %v264_v28, %v263_v35  ;;  %v284_v47 = vadd.f32 %v283_v42, %v282_v41  ;;  %v285_v48 = vsel %vm239_vm1, %v193_v37, 0.0  ;;  %v199_v49 = vld [vmem:[%s696_s26 + $0xc0] sm:$0xff]  ;;  %v201_v51 = vld [vmem:[%s696_s26 + $0xd0] sm:$0xff]  ;;  %v287_v55 = vsel %vm239_vm1, %v194_v38, 0.0 }
  0x18   : > { %v200_v50 = vld [vmem:[%s696_s26 + $0xc8] sm:$0xff]  ;;  %v248_v52 = vadd.f32 %v247_v26, %v246_v39  ;;  %v197_v56 = vld [vmem:[%s696_s26 + $0xb0] sm:$0xff]  ;;  %v198_v57 = vld [vmem:[%s696_s26 + $0xb8] sm:$0xff]  ;;  %v303_v62 = vsel %vm239_vm1, %v199_v49, 0.0  ;;  %v289_v1 = vsel %vm239_vm1, %v195_v43, 0.0  ;;  %v306_v3 = vsel %vm239_vm1, %v201_v51, 0.0 }
  0x19   : > { %v202_v58 = vld [vmem:[%s696_s26 + $0xd8] sm:$0xff]  ;;  %v267_v59 = vadd.f32 %v266_v40, %v265_v45  ;;  %v286_v61 = vadd.f32 %v285_v48, %v284_v47  ;;  %v207_v63 = vld [vmem:[%s696_s26 + $0x100] sm:$0xff]  ;;  %v304_v2 = vsel %vm239_vm1, %v200_v50, 0.0  ;;  %v208_v5 = vld [vmem:[%s696_s26 + $0x108] sm:$0xff]  ;;  %v291_v9 = vsel %vm239_vm1, %v196_v44, 0.0 }
  0x1a   : > { %v250_v0 = vadd.f32 %v249_v32, %v248_v52  ;;  %v203_v4 = vld [vmem:[%s696_s26 + $0xe0] sm:$0xff]  ;;  %v209_v6 = vld [vmem:[%s696_s26 + $0x110] sm:$0xff]  ;;  %v305_v10 = vadd.f32 %v304_v2, %v303_v62  ;;  %v293_v12 = vsel %vm239_vm1, %v197_v56, 0.0  ;;  %v295_v13 = vsel %vm239_vm1, %v198_v57, 0.0  ;;  %v204_v15 = vld [vmem:[%s696_s26 + $0xe8] sm:$0xff] }
  0x1b   : > { %v269_v7 = vadd.f32 %v268_v46, %v267_v59  ;;  %v288_v8 = vadd.f32 %v287_v55, %v286_v61  ;;  %v308_v14 = vsel %vm239_vm1, %v202_v58, 0.0  ;;  %v205_v16 = vld [vmem:[%s696_s26 + $0xf0] sm:$0xff]  ;;  %v210_v17 = vld [vmem:[%s696_s26 + $0x118] sm:$0xff]  ;;  %v324_v21 = vsel %vm239_vm1, %v207_v63, 0.0  ;;  %v211_v27 = vld [vmem:[%s696_s26 + $0x120] sm:$0xff] }
  0x1c   : > { %v252_v11 = vadd.f32 %v251_v33, %v250_v0  ;;  %v307_v20 = vadd.f32 %v306_v3, %v305_v10  ;;  %v310_v23 = vsel %vm239_vm1, %v203_v4, 0.0  ;;  %v325_v24 = vsel %vm239_vm1, %v208_v5, 0.0  ;;  %v206_v26 = vld [vmem:[%s696_s26 + $0xf8] sm:$0xff]  ;;  %v215_v28 = vld [vmem:[%s696_s26 + $0x140] sm:$0xff]  ;;  %v212_v37 = vld [vmem:[%s696_s26 + $0x128] sm:$0xff] }
  0x1d   : > { %v271_v18 = vadd.f32 %v270_v53, %v269_v7  ;;  %v290_v19 = vadd.f32 %v289_v1, %v288_v8  ;;  %v327_v25 = vsel %vm239_vm1, %v209_v6, 0.0  ;;  %v326_v32 = vadd.f32 %v325_v24, %v324_v21  ;;  %v216_v38 = vld [vmem:[%s696_s26 + $0x148] sm:$0xff]  ;;  %v217_v39 = vld [vmem:[%s696_s26 + $0x150] sm:$0xff]  ;;  %v218_v49 = vld [vmem:[%s696_s26 + $0x158] sm:$0xff] }
  0x1e   : > { %v254_v22 = vadd.f32 %v253_v34, %v252_v11  ;;  %v309_v31 = vadd.f32 %v308_v14, %v307_v20  ;;  %v312_v34 = vsel %vm239_vm1, %v204_v15, 0.0  ;;  %v314_v35 = vsel %vm239_vm1, %v205_v16, 0.0  ;;  %v213_v48 = vld [vmem:[%s696_s26 + $0x130] sm:$0xff]  ;;  %v214_v58 = vld [vmem:[%s696_s26 + $0x138] sm:$0xff]  ;;  %v219_v59 = vld [vmem:[%s696_s26 + $0x160] sm:$0xff] }
  0x1f   : > { %v273_v29 = vadd.f32 %v272_v54, %v271_v18  ;;  %v292_v30 = vadd.f32 %v291_v9, %v290_v19  ;;  %v329_v36 = vsel %vm239_vm1, %v210_v17, 0.0  ;;  %v328_v43 = vadd.f32 %v327_v25, %v326_v32  ;;  %v220_v4 = vld [vmem:[%s696_s26 + $0x168] sm:$0xff]  ;;  %v223_v9 = vld [vmem:[%s696_s26 + $0x180] sm:$0xff]  ;;  %v221_v18 = vld [vmem:[%s696_s26 + $0x170] sm:$0xff] }
  0x20   : > { %v255_v33 = vrot.slane %v254_v22, 4  ;;  %v311_v42 = vadd.f32 %v310_v23, %v309_v31  ;;  %v316_v45 = vsel %vm239_vm1, %v206_v26, 0.0  ;;  %v331_v46 = vsel %vm239_vm1, %v211_v27, 0.0  ;;  %v225_v19 = vld [vmem:[%s696_s26 + $0x190] sm:$0xff]  ;;  %v222_v23 = vld [vmem:[%s696_s26 + $0x178] sm:$0xff]  ;;  %v231_v32 = vld [vmem:[%s696_s26 + $0x1c0] sm:$0xff] }
  0x21   : > { %v275_v40 = vadd.f32 %v274_v60, %v273_v29  ;;  %v294_v41 = vadd.f32 %v293_v12, %v292_v30  ;;  %v345_v47 = vsel %vm239_vm1, %v215_v28, 0.0  ;;  %v330_v53 = vadd.f32 %v329_v36, %v328_v43  ;;  %v226_v28 = vld [vmem:[%s696_s26 + $0x198] sm:$0xff] }
  0x22   : > { %v256_v44 = vadd.f32 %v255_v33, %v254_v22  ;;  %v313_v52 = vadd.f32 %v312_v34, %v311_v42  ;;  %v333_v55 = vsel %vm239_vm1, %v212_v37, 0.0  ;;  %v346_v56 = vsel %vm239_vm1, %v216_v38, 0.0  ;;  %v227_v37 = vld [vmem:[%s696_s26 + $0x1a0] sm:$0xff]  ;;  %v232_v38 = vld [vmem:[%s696_s26 + $0x1c8] sm:$0xff] }
  0x23   : > { %v276_v50 = vrot.slane %v275_v40, 4  ;;  %v296_v51 = vadd.f32 %v295_v13, %v294_v41  ;;  %v348_v57 = vsel %vm239_vm1, %v217_v39, 0.0  ;;  %v332_v63 = vadd.f32 %v331_v46, %v330_v53  ;;  %v224_v13 = vld [vmem:[%s696_s26 + $0x188] sm:$0xff]  ;;  %v233_v39 = vld [vmem:[%s696_s26 + $0x1d0] sm:$0xff] }
  0x24   : > { %v257_v54 = vrot.slane %v256_v44, 2  ;;  %v315_v62 = vadd.f32 %v314_v35, %v313_v52  ;;  %v335_v1 = vsel %vm239_vm1, %v213_v48, 0.0  ;;  %v347_v2 = vadd.f32 %v346_v56, %v345_v47  ;;  %v228_v48 = vld [vmem:[%s696_s26 + $0x1a8] sm:$0xff] }
  0x25   : > { %v277_v60 = vadd.f32 %v276_v50, %v275_v40  ;;  %v297_v61 = vrot.slane %v296_v51, 4  ;;  %v350_v3 = vsel %vm239_vm1, %v218_v49, 0.0  ;;  %v334_v8 = vadd.f32 %v333_v55, %v332_v63  ;;  %v234_v49 = vld [vmem:[%s696_s26 + $0x1d8] sm:$0xff] }
  0x26   : > { %v258_v0 = vadd.f32 %v257_v54, %v256_v44  ;;  %v317_v7 = vadd.f32 %v316_v45, %v315_v62  ;;  %v337_v10 = vsel %vm239_vm1, %v214_v58, 0.0  ;;  %v349_v11 = vadd.f32 %v348_v57, %v347_v2  ;;  %v229_v54 = vld [vmem:[%s696_s26 + $0x1b0] sm:$0xff] }
  0x27   : > { %v278_v5 = vrot.slane %v277_v60, 2  ;;  %v298_v6 = vadd.f32 %v297_v61, %v296_v51  ;;  %v352_v12 = vsel %vm239_vm1, %v219_v59, 0.0  ;;  %v336_v17 = vadd.f32 %v335_v1, %v334_v8  ;;  %v235_v59 = vld [vmem:[%s696_s26 + $0x1e0] sm:$0xff] }
  0x28   : > { %v318_v16 = vrot.slane %v317_v7, 4  ;;  %v259_v20 = vrot.slane %v258_v0, 1  ;;  %v351_v21 = vadd.f32 %v350_v3, %v349_v11  ;;  %v354_v22 = vsel %vm239_vm1, %v220_v4, 0.0  ;;  %v230_v4 = vld [vmem:[%s696_s26 + $0x1b8] sm:$0xff] }
  0x29   : > { %v279_v14 = vadd.f32 %v278_v5, %v277_v60  ;;  %v299_v15 = vrot.slane %v298_v6, 2  ;;  %v338_v26 = vadd.f32 %v337_v10, %v336_v17  ;;  %v366_v27 = vsel %vm239_vm1, %v223_v9, 0.0  ;;  %v236_v5 = vld [vmem:[%s696_s26 + $0x1e8] sm:$0xff] }
  0x2a   : > { %v319_v25 = vadd.f32 %v318_v16, %v317_v7  ;;  %v353_v30 = vadd.f32 %v352_v12, %v351_v21  ;;  %v367_v31 = vsel %vm239_vm1, %v224_v13, 0.0  ;;  %v356_v35 = vsel %vm239_vm1, %v221_v18, 0.0 }
  0x2b   : > { %v300_v24 = vadd.f32 %v299_v15, %v298_v6  ;;  %v280_v29 = vrot.slane %v279_v14, 1  ;;  %v339_v34 = vrot.slane %v338_v26, 4  ;;  %v369_v36 = vsel %vm239_vm1, %v225_v19, 0.0 }
  0x2c   : > { %v320_v33 = vrot.slane %v319_v25, 2  ;;  %v260_v40 = vadd.f32 %v259_v20, %v258_v0  ;;  %v355_v41 = vadd.f32 %v354_v22, %v353_v30  ;;  %v358_v42 = vsel %vm239_vm1, %v222_v23, 0.0  ;;  %v238_v23 = vld [vmem:[%s696_s26 + $0x1f8] sm:$0xff] }
  0x2d   : > { %v368_v43 = vadd.f32 %v367_v31, %v366_v27  ;;  %v301_v44 = vrot.slane %v300_v24, 1  ;;  %v340_v46 = vadd.f32 %v339_v34, %v338_v26  ;;  %v371_v47 = vsel %vm239_vm1, %v226_v28, 0.0 }
  0x2e   : > { %v321_v45 = vadd.f32 %v320_v33, %v319_v25  ;;  %v281_v50 = vadd.f32 %v280_v29, %v279_v14  ;;  %v357_v51 = vadd.f32 %v356_v35, %v355_v41  ;;  %v387_v53 = vsel %vm239_vm1, %v231_v32, 0.0  ;;  %v237_v14 = vld [vmem:[%s696_s26 + $0x1f0] sm:$0xff] }
  0x2f   : > { %v370_v52 = vadd.f32 %v369_v36, %v368_v43  ;;  %v341_v55 = vrot.slane %v340_v46, 2  ;;  %v373_v56 = vsel %vm239_vm1, %v227_v37, 0.0  ;;  %v388_v57 = vsel %vm239_vm1, %v232_v38, 0.0 }
  0x30   : > { %v390_v58 = vsel %vm239_vm1, %v233_v39, 0.0  ;;  %v322_v60 = vrot.slane %v321_v45, 1  ;;  %v359_v61 = vadd.f32 %v358_v42, %v357_v51  ;;  %v389_v63 = vadd.f32 %v388_v57, %v387_v53 }
  0x31   : > { %v372_v62 = vadd.f32 %v371_v47, %v370_v52  ;;  %v302_v0 = vadd.f32 %v301_v44, %v300_v24  ;;  %v342_v1 = vadd.f32 %v341_v55, %v340_v46  ;;  %v375_v2 = vsel %vm239_vm1, %v228_v48, 0.0 }
  0x32   : > { %v392_v3 = vsel %vm239_vm1, %v234_v49, 0.0  ;;  %v360_v6 = vrot.slane %v359_v61, 4  ;;  %v377_v8 = vsel %vm239_vm1, %v229_v54, 0.0  ;;  %v391_v9 = vadd.f32 %v390_v58, %v389_v63 }
  0x33   : > { %v374_v7 = vadd.f32 %v373_v56, %v372_v62  ;;  %v343_v10 = vrot.slane %v342_v1, 1  ;;  %v394_v11 = vsel %vm239_vm1, %v235_v59, 0.0  ;;  %v408_v12 = vmul.f32 0.015625, %v260_v40 }
  0x34   : > { %v409_v13 = vmul.f32 0.015625, %v281_v50  ;;  %v323_v15 = vadd.f32 %v322_v60, %v321_v45  ;;  %v361_v16 = vadd.f32 %v360_v6, %v359_v61  ;;  %v393_v18 = vadd.f32 %v392_v3, %v391_v9 }
  0x35   : > { %v376_v17 = vadd.f32 %v375_v2, %v374_v7  ;;  %v379_v19 = vsel %vm239_vm1, %v230_v4, 0.0  ;;  %v396_v20 = vsel %vm239_vm1, %v236_v5, 0.0  ;;  %v410_v21 = vmul.f32 0.015625, %v302_v0 }
  0x36   : > { %v416_v22 = vpack.c.bf16 %v408_v12, %v408_v12  ;;  %v362_v24 = vrot.slane %v361_v16, 2  ;;  %v395_v26 = vadd.f32 %v394_v11, %v393_v18  ;;  %v417_v27 = vpack.c.bf16 %v409_v13, %v409_v13  ;;  %v600_v13 = vld [vmem:[%s840_s2] ss:$0 sm:$0xff] }
  0x37   : > { %v378_v25 = vadd.f32 %v377_v8, %v376_v17  ;;  %v344_v28 = vadd.f32 %v343_v10, %v342_v1  ;;  %v398_v29 = vsel %vm239_vm1, %v237_v14, 0.0  ;;  %v411_v33 = vmul.f32 0.015625, %v323_v15 }
  0x38   : > { %v363_v30 = vadd.f32 %v362_v24, %v361_v16  ;;  %v397_v32 = vadd.f32 %v396_v20, %v395_v26  ;;  %v400_v34 = vsel %vm239_vm1, %v238_v23, 0.0  ;;  %v418_v35 = vpack.c.bf16 %v410_v21, %v410_v21 }
  0x39   : > { %v380_v31 = vadd.f32 %v379_v19, %v378_v25  ;;  %v447_v36 = vunpack.c.l.b16 %v416_v22  ;;  %v448_v40 = vunpack.c.l.b16 %v417_v27  ;;  %v412_v41 = vmul.f32 0.015625, %v344_v28 }
  0x3a   : > { %v364_v37 = vrot.slane %v363_v30, 1  ;;  %v399_v39 = vadd.f32 %v398_v29, %v397_v32  ;;  %v419_v45 = vpack.c.bf16 %v411_v33, %v411_v33  ;;  %v449_v46 = vunpack.c.l.b16 %v418_v35 }
  0x3b   : > { %v381_v38 = vrot.slane %v380_v31, 4  ;;  %v456_v50 = vsel %vm455_vm2, %v448_v40, %v447_v36  ;;  %v420_v51 = vpack.c.bf16 %v412_v41, %v412_v41 }
  0x3c   : > { %v365_v42 = vadd.f32 %v364_v37, %v363_v30  ;;  %v401_v44 = vadd.f32 %v400_v34, %v399_v39  ;;  %v450_v54 = vunpack.c.l.b16 %v419_v45  ;;  %v458_v55 = vsel %vm457_vm3, %v449_v46, %v456_v50 }
  0x3d   : > { %v382_v43 = vadd.f32 %v381_v38, %v380_v31  ;;  %v451_v59 = vunpack.c.l.b16 %v420_v51 }
  0x3e   : > { %v402_v48 = vrot.slane %v401_v44, 4  ;;  %v413_v49 = vmul.f32 0.015625, %v365_v42  ;;  %v460_v62 = vsel %vm459_vm4, %v450_v54, %v458_v55 }
  0x3f   : > { %v383_v47 = vrot.slane %v382_v43, 2  ;;  %v462_v2 = vsel %vm461_vm5, %v451_v59, %v460_v62 }
  0x40   : > { %v403_v53 = vadd.f32 %v402_v48, %v401_v44  ;;  %v421_v58 = vpack.c.bf16 %v413_v49, %v413_v49 }
  0x41   : > { %v384_v52 = vadd.f32 %v383_v47, %v382_v43 }
  0x42   : > { %v404_v57 = vrot.slane %v403_v53, 2  ;;  %v452_v1 = vunpack.c.l.b16 %v421_v58 }
  0x43   : > { %v385_v56 = vrot.slane %v384_v52, 1 }
  0x44   : > { %v405_v61 = vadd.f32 %v404_v57, %v403_v53  ;;  %v464_v7 = vsel %vm463_vm6, %v452_v1, %v462_v2 }
  0x45   : > { %v386_v60 = vadd.f32 %v385_v56, %v384_v52 }
  0x46   : > { %v406_v63 = vrot.slane %v405_v61, 1 }
  0x47   : > { %v414_v0 = vmul.f32 0.015625, %v386_v60 }
  0x48   : > { %v407_v3 = vadd.f32 %v406_v63, %v405_v61 }
  0x49   : > { %v422_v4 = vpack.c.bf16 %v414_v0, %v414_v0 }
  0x4a   : > { %v415_v5 = vmul.f32 0.015625, %v407_v3 }
  0x4b   : > { %v453_v6 = vunpack.c.l.b16 %v422_v4 }
  0x4c   : > { %v423_v8 = vpack.c.bf16 %v415_v5, %v415_v5 }
  0x4d   : > { %v466_v9 = vsel %vm465_vm7, %v453_v6, %v464_v7 }
  0x4e   : > { %v454_v10 = vunpack.c.l.b16 %v423_v8 }
  0x50   : > { %v468_v11 = vsel %vm467_vm8, %v454_v10, %v466_v9 }
  0x51   : > { %v469_v12 = vpack.c.b16 %v468_v11, %v468_v11 }
  0x53   : > { %623 = vmatmul.mubr.msk.bf16.vlgmr.msra.gmra.mrb[0].mxu0 %vm239_vm1, %v469_v12 }
 0x126   : > { %v531_v14 = vpop.f32.mrb[0].mxu0 }
 0x127   : > { %v532_v15 = vadd.f32 %v600_v13, %v531_v14  ;;  %v624_v16 = vpop.f32.mrb[1].mxu0 }
 0x128   : > { %v534_v17 = vpop.f32.mrb[2].mxu0 }
 0x129   : > { %537 = vst [vmem:[%s173_s5] sm:$0xff] %v532_v15  ;;  %v625_v18 = vpop.f32.mrb[3].mxu0 }
 0x12a PF: > { %s13_s12 = sadd.s32 1, %s646_s12  }
 0x12b   : > { %p10_p5 = scmp.ge.s32.totalorder %s13_s12, 4  }
 0x12d   :  { %12 = sbr.rel (!%p10_p5) target bundleno = 1 (0x1), region = 62 }

// kernel: ada_forward.6
= control target key start
LH: loop header
LB: loop body
LE: loop exit
PB: predicated region body
PF: predicated region fallthrough
CT: control target
= control target key end

     0   :  { %s961_s12 = smov 0   ;;  %s963_s13 = smov 0   ;;  %s1164_s0 = inlined_call_operand.vmem [shape: bf16[16,128], index: 0, kind: input, shape index: {}]   ;;  %s1165_s1 = inlined_call_operand.vmem [shape: bf16[128,1024], index: 1, kind: input, shape index: {}]   ;;  %s1166_s2 = inlined_call_operand.vmem [shape: f32[1,1024], index: 2, kind: input, shape index: {}]   ;;  %s1167_s3 = inlined_call_operand.vmem [shape: f32[16,1024], index: 3, kind: output, shape index: {}]  }
   0x1   :  { %s965_s14 = smov 0   ;;  %s967_s15 = smov 0  }
   0x2   :  { %s969_s16 = smov 0  }
   0x3 LB: > { %s22_s17 = sadd.s32 1, %s934_s15  ;;  %s758_s18 = sadd.s32 4294967295, %s938_s16   ;;  %s938_s16 = sphi %s969_s16, %s13_s16   ;;  %s934_s15 = sphi %s967_s15, %s1172_s15   ;;  %s930_s14 = sphi %s965_s14, %s1171_s14   ;;  %s926_s13 = sphi %s963_s13, %s1170_s13   ;;  %s922_s12 = sphi %s961_s12, %s1169_s12  }
   0x4   : > { %p23_p0 = scmp.ge.s32.totalorder %s22_s17, 2  ;;  %p65_p1 = scmp.ne.s32.totalorder %s926_s13, %s922_s12 }
   0x5   : > { %p66_p2 = scmp.eq.s32.totalorder %s938_s16, 0  ;;  %p123_p4 = scmp.eq.s32.totalorder %s758_s18, 1 }
   0x6   : > { %s1174_s17 = smov (%p23_p0, %s22_s17), 0  ;;  %s58_s20 = sadd.s32 1, %s926_s13 }
   0x7   : > { %p67_p3 = por %p66_p2, %p65_p1  ;;  %s55_s19 = ssub.s32 %s934_s15, %s1174_s17 }
   0x8   : > { %p56_p5 = scmp.eq.s32.totalorder %s55_s19, 0  ;;  %p996_p6 = por %p123_p4, %p65_p1 }
   0x9   : > { %p762_p7 = scmp.ge.s32.totalorder %s938_s16, 2 }
   0xa   : > { %s1001_s22 = scalar_select %p56_p5, %s926_s13, %s58_s20  }
   0xb   : > { %154 = sbr.rel (%p762_p7) target bundleno = 38 (0x26), region = 20 }
  0x12   : > { %157 = sbr.rel (!%p67_p3) target bundleno = 38 (0x26), region = 24  ;;  %s159_s23 = sand.u32 (%p67_p3), 1, %s926_s13  }
  0x13   : > { %s808_s24 = sshll.u32 (%p67_p3), %s934_s15, 4  ;;  %s763_s25 = sshll.u32 (%p67_p3), %s159_s23, 8 }
  0x14   : > { %s1009_s28 = scalar_lea.vmem (%p67_p3), %s1165_s1, %s808_s24  ;;  %s1014_s29 = scalar_lea.vmem (%p67_p3), [#allocation2], %s763_s25 }
  0x15   : > { %v177_v0 = vld [vmem:[%s1009_s28] sm:$0xff] (%p67_p3)  ;;  %v179_v1 = vld [vmem:[%s1009_s28 + $0x8] sm:$0xff] (%p67_p3) }
  0x16   : > { %v181_v2 = vld [vmem:[%s1009_s28 + $0x20] sm:$0xff] (%p67_p3)  ;;  %178 = vst [vmem:[%s1014_s29] sm:$0xff] (%p67_p3), %v177_v0  ;;  %180 = vst [vmem:[%s1014_s29 + $0x8] sm:$0xff] (%p67_p3), %v179_v1  ;;  %v183_v3 = vld [vmem:[%s1009_s28 + $0x28] sm:$0xff] (%p67_p3) }
  0x17   : > { %182 = vst [vmem:[%s1014_s29 + $0x10] sm:$0xff] (%p67_p3), %v181_v2  ;;  %v185_v4 = vld [vmem:[%s1009_s28 + $0x40] sm:$0xff] (%p67_p3)  ;;  %v187_v5 = vld [vmem:[%s1009_s28 + $0x48] sm:$0xff] (%p67_p3)  ;;  %184 = vst [vmem:[%s1014_s29 + $0x18] sm:$0xff] (%p67_p3), %v183_v3 }
  0x18   : > { %186 = vst [vmem:[%s1014_s29 + $0x20] sm:$0xff] (%p67_p3), %v185_v4  ;;  %188 = vst [vmem:[%s1014_s29 + $0x28] sm:$0xff] (%p67_p3), %v187_v5  ;;  %v189_v6 = vld [vmem:[%s1009_s28 + $0x60] sm:$0xff] (%p67_p3)  ;;  %v191_v7 = vld [vmem:[%s1009_s28 + $0x68] sm:$0xff] (%p67_p3) }
  0x19   : > { %v193_v8 = vld [vmem:[%s1009_s28 + $0x80] sm:$0xff]  ;;  %190 = vst [vmem:[%s1014_s29 + $0x30] sm:$0xff] %v189_v6  ;;  %192 = vst [vmem:[%s1014_s29 + $0x38] sm:$0xff] %v191_v7  ;;  %v195_v9 = vld [vmem:[%s1009_s28 + $0x88] sm:$0xff] }
  0x1a   : > { %194 = vst [vmem:[%s1014_s29 + $0x40] sm:$0xff] %v193_v8  ;;  %v197_v10 = vld [vmem:[%s1009_s28 + $0xa0] sm:$0xff]  ;;  %v199_v11 = vld [vmem:[%s1009_s28 + $0xa8] sm:$0xff]  ;;  %196 = vst [vmem:[%s1014_s29 + $0x48] sm:$0xff] %v195_v9 }
  0x1b   : > { %198 = vst [vmem:[%s1014_s29 + $0x50] sm:$0xff] %v197_v10  ;;  %200 = vst [vmem:[%s1014_s29 + $0x58] sm:$0xff] %v199_v11  ;;  %v201_v12 = vld [vmem:[%s1009_s28 + $0xc0] sm:$0xff]  ;;  %v203_v13 = vld [vmem:[%s1009_s28 + $0xc8] sm:$0xff] }
  0x1c   : > { %v205_v14 = vld [vmem:[%s1009_s28 + $0xe0] sm:$0xff]  ;;  %202 = vst [vmem:[%s1014_s29 + $0x60] sm:$0xff] %v201_v12  ;;  %204 = vst [vmem:[%s1014_s29 + $0x68] sm:$0xff] %v203_v13  ;;  %v207_v15 = vld [vmem:[%s1009_s28 + $0xe8] sm:$0xff] }
  0x1d   : > { %206 = vst [vmem:[%s1014_s29 + $0x70] sm:$0xff] %v205_v14  ;;  %v209_v16 = vld [vmem:[%s1009_s28 + $0x100] sm:$0xff]  ;;  %v211_v17 = vld [vmem:[%s1009_s28 + $0x108] sm:$0xff]  ;;  %208 = vst [vmem:[%s1014_s29 + $0x78] sm:$0xff] %v207_v15 }
  0x1e   : > { %210 = vst [vmem:[%s1014_s29 + $0x80] sm:$0xff] %v209_v16  ;;  %212 = vst [vmem:[%s1014_s29 + $0x88] sm:$0xff] %v211_v17  ;;  %v213_v18 = vld [vmem:[%s1009_s28 + $0x120] sm:$0xff]  ;;  %v215_v19 = vld [vmem:[%s1009_s28 + $0x128] sm:$0xff] }
  0x1f   : > { %v217_v20 = vld [vmem:[%s1009_s28 + $0x140] sm:$0xff]  ;;  %214 = vst [vmem:[%s1014_s29 + $0x90] sm:$0xff] %v213_v18  ;;  %216 = vst [vmem:[%s1014_s29 + $0x98] sm:$0xff] %v215_v19  ;;  %v219_v21 = vld [vmem:[%s1009_s28 + $0x148] sm:$0xff] }
  0x20   : > { %218 = vst [vmem:[%s1014_s29 + $0xa0] sm:$0xff] %v217_v20  ;;  %v221_v22 = vld [vmem:[%s1009_s28 + $0x160] sm:$0xff]  ;;  %v223_v23 = vld [vmem:[%s1009_s28 + $0x168] sm:$0xff]  ;;  %220 = vst [vmem:[%s1014_s29 + $0xa8] sm:$0xff] %v219_v21 }
  0x21   : > { %222 = vst [vmem:[%s1014_s29 + $0xb0] sm:$0xff] %v221_v22  ;;  %224 = vst [vmem:[%s1014_s29 + $0xb8] sm:$0xff] %v223_v23  ;;  %v225_v24 = vld [vmem:[%s1009_s28 + $0x180] sm:$0xff]  ;;  %v227_v25 = vld [vmem:[%s1009_s28 + $0x188] sm:$0xff] }
  0x22   : > { %v229_v26 = vld [vmem:[%s1009_s28 + $0x1a0] sm:$0xff]  ;;  %226 = vst [vmem:[%s1014_s29 + $0xc0] sm:$0xff] %v225_v24  ;;  %228 = vst [vmem:[%s1014_s29 + $0xc8] sm:$0xff] %v227_v25  ;;  %v231_v27 = vld [vmem:[%s1009_s28 + $0x1a8] sm:$0xff] }
  0x23   : > { %230 = vst [vmem:[%s1014_s29 + $0xd0] sm:$0xff] %v229_v26  ;;  %v233_v28 = vld [vmem:[%s1009_s28 + $0x1c0] sm:$0xff]  ;;  %v235_v29 = vld [vmem:[%s1009_s28 + $0x1c8] sm:$0xff]  ;;  %232 = vst [vmem:[%s1014_s29 + $0xd8] sm:$0xff] %v231_v27 }
  0x24   : > { %234 = vst [vmem:[%s1014_s29 + $0xe0] sm:$0xff] %v233_v28  ;;  %236 = vst [vmem:[%s1014_s29 + $0xe8] sm:$0xff] %v235_v29  ;;  %v237_v30 = vld [vmem:[%s1009_s28 + $0x1e0] sm:$0xff]  ;;  %v239_v31 = vld [vmem:[%s1009_s28 + $0x1e8] sm:$0xff] }
  0x25   : > { %238 = vst [vmem:[%s1014_s29 + $0xf0] sm:$0xff] %v237_v30  ;;  %240 = vst [vmem:[%s1014_s29 + $0xf8] sm:$0xff] %v239_v31 }
  0x26 PF: > { %p766_p8 = scmp.ge.s32.totalorder %s938_s16, 1  ;;  %p253_p9 = scmp.lt.s32.totalorder %s938_s16, 3 }
  0x28   : > { %p254_p10 = pnand %p766_p8, %p253_p9 }
  0x29   : > { %s260_s30 = sand.u32 (!%p254_p10), 1, %s922_s12   ;;  %v940_v32 = vmov (!%p254_p10), 0   ;;  %v899_v1 = vld [vmem:[%s1164_s0] sm:$0xff] (!%p254_p10)   ;;  %s769_s8 = sshll.u32 (!%p254_p10), %s930_s14, 2  ;;  %v342_v2 = vlaneseq (!%p254_p10) }
  0x2a   : > { %257 = sbr.rel (%p254_p10) target bundleno = 303 (0x12f), region = 51  ;;  %s767_s4 = sshll.u32 (!%p254_p10), %s260_s30, 8  ;;  %560 = vmatprep.mubr.bf16.mxu0 (!%p254_p10), %v940_v32  ;;  %603 = vmatprep.mubr.bf16.mxu1 (!%p254_p10), %v940_v32 }
  0x2b   : > { %s1082_s5 = scalar_lea.vmem (!%p254_p10), [#allocation2], %s767_s4  ;;  %p299_p11 = scmp.lt.s32.totalorder (!%p254_p10), %s769_s8, 7  ;;  %v343_v3 = vshrl.u32 (!%p254_p10), %v342_v2, 7 }
  0x2c   : > { %v851_v33 = vld [vmem:[%s1082_s5 + $0x4] ss:$16 sps:$4 sm:$0xff] (!%p254_p10)   ;;  %v853_v34 = vld [vmem:[%s1082_s5 + $0xc] ss:$16 sps:$4 sm:$0xff] (!%p254_p10)   ;;  %v855_v35 = vld [vmem:[%s1082_s5] ss:$16 sps:$4 sm:$0xff] (!%p254_p10)  }
  0x2d   : > { %528 = vmatprep.subr.bf16.mxu0 (!%p254_p10), %v851_v33  ;;  %v856_v36 = vld [vmem:[%s1082_s5 + $0x8] ss:$16 sps:$4 sm:$0xff] (!%p254_p10)   ;;  %571 = vmatprep.subr.bf16.mxu1 (!%p254_p10), %v853_v34  ;;  %v857_v37 = vld [vmem:[%s1082_s5 + $0x24] ss:$16 sps:$4 sm:$0xff] (!%p254_p10)   ;;  %v859_v38 = vld [vmem:[%s1082_s5 + $0x2c] ss:$16 sps:$4 sm:$0xff] (!%p254_p10)  }
  0x2e   : > { %529 = vmatpush1.bf16.msra.mxu0 (!%p254_p10), %v855_v35  ;;  %572 = vmatpush1.bf16.msra.mxu1 (!%p254_p10), %v856_v36  ;;  %v861_v39 = vld [vmem:[%s1082_s5 + $0x20] ss:$16 sps:$4 sm:$0xff] (!%p254_p10)   ;;  %v862_v40 = vld [vmem:[%s1082_s5 + $0x28] ss:$16 sps:$4 sm:$0xff] (!%p254_p10)   ;;  %v863_v41 = vld [vmem:[%s1082_s5 + $0x44] ss:$16 sps:$4 sm:$0xff] (!%p254_p10)  }
  0x2f   : > { %530 = vmatprep.subr.bf16.mxu0 (!%p254_p10), %v857_v37  ;;  %573 = vmatprep.subr.bf16.mxu1 (!%p254_p10), %v859_v38  ;;  %v865_v42 = vld [vmem:[%s1082_s5 + $0x4c] ss:$16 sps:$4 sm:$0xff] (!%p254_p10)   ;;  %v867_v43 = vld [vmem:[%s1082_s5 + $0x40] ss:$16 sps:$4 sm:$0xff] (!%p254_p10)   ;;  %v868_v44 = vld [vmem:[%s1082_s5 + $0x48] ss:$16 sps:$4 sm:$0xff] (!%p254_p10)  }
  0x30   : > { %v869_v45 = vld [vmem:[%s1082_s5 + $0x64] ss:$16 sps:$4 sm:$0xff] (!%p254_p10)   ;;  %v871_v46 = vld [vmem:[%s1082_s5 + $0x6c] ss:$16 sps:$4 sm:$0xff] (!%p254_p10)   ;;  %v873_v47 = vld [vmem:[%s1082_s5 + $0x60] ss:$16 sps:$4 sm:$0xff] (!%p254_p10)  }
  0x31   : > { %v874_v48 = vld [vmem:[%s1082_s5 + $0x68] ss:$16 sps:$4 sm:$0xff]   ;;  %v875_v49 = vld [vmem:[%s1082_s5 + $0x84] ss:$16 sps:$4 sm:$0xff]   ;;  %v877_v50 = vld [vmem:[%s1082_s5 + $0x8c] ss:$16 sps:$4 sm:$0xff]  }
  0x32   : > { %531 = vmatpush1.bf16.msra.mxu0 %v861_v39  ;;  %574 = vmatpush1.bf16.msra.mxu1 %v862_v40  ;;  %v879_v51 = vld [vmem:[%s1082_s5 + $0x80] ss:$16 sps:$4 sm:$0xff]   ;;  %v880_v52 = vld [vmem:[%s1082_s5 + $0x88] ss:$16 sps:$4 sm:$0xff]   ;;  %v881_v53 = vld [vmem:[%s1082_s5 + $0xa4] ss:$16 sps:$4 sm:$0xff]  }
  0x33   : > { %532 = vmatprep.subr.bf16.mxu0 %v863_v41  ;;  %575 = vmatprep.subr.bf16.mxu1 %v865_v42  ;;  %v883_v54 = vld [vmem:[%s1082_s5 + $0xac] ss:$16 sps:$4 sm:$0xff]   ;;  %v885_v55 = vld [vmem:[%s1082_s5 + $0xa0] ss:$16 sps:$4 sm:$0xff]   ;;  %v886_v56 = vld [vmem:[%s1082_s5 + $0xa8] ss:$16 sps:$4 sm:$0xff]  }
  0x34   : > { %v887_v57 = vld [vmem:[%s1082_s5 + $0xc4] ss:$16 sps:$4 sm:$0xff]   ;;  %v889_v58 = vld [vmem:[%s1082_s5 + $0xcc] ss:$16 sps:$4 sm:$0xff]   ;;  %v891_v59 = vld [vmem:[%s1082_s5 + $0xc0] ss:$16 sps:$4 sm:$0xff]  }
  0x35   : > { %v892_v60 = vld [vmem:[%s1082_s5 + $0xc8] ss:$16 sps:$4 sm:$0xff]   ;;  %v893_v61 = vld [vmem:[%s1082_s5 + $0xe4] ss:$16 sps:$4 sm:$0xff]   ;;  %v895_v62 = vld [vmem:[%s1082_s5 + $0xec] ss:$16 sps:$4 sm:$0xff]  }
  0x36   : > { %533 = vmatpush1.bf16.msra.mxu0 %v867_v43  ;;  %576 = vmatpush1.bf16.msra.mxu1 %v868_v44  ;;  %v897_v63 = vld [vmem:[%s1082_s5 + $0xe0] ss:$16 sps:$4 sm:$0xff]   ;;  %v898_v0 = vld [vmem:[%s1082_s5 + $0xe8] ss:$16 sps:$4 sm:$0xff]   ;;  %s1176_s8 = smov (!%p299_p11, %s769_s8), 7  ;;  %v344_v4 = vsub.s32 0, %v343_v3 }
  0x37   : > { %534 = vmatprep.subr.bf16.mxu0 %v869_v45  ;;  %577 = vmatprep.subr.bf16.mxu1 %v871_v46  ;;  %s301_s11 = scalar_lea.vmem %s1166_s2, %s1176_s8  ;;  %v352_v5 = vsub.s32 2, %v343_v3  ;;  %v348_v7 = vsub.s32 1, %v343_v3  ;;  %v356_v8 = vsub.s32 3, %v343_v3  ;;  %s768_s18 = sshll.u32 %s260_s30, 6 }
  0x38   : > { %v340_v6 = vld [vmem:[%s301_s11] sm:$0xf]  ;;  %s1125_s19 = scalar_lea.vmem [#allocation3], %s768_s18  ;;  %s809_s12 = sshll.u32 (%p996_p6), %s930_s14, 5 }
  0x39   : > { %v345_v9 = vrot.slane %v340_v6, %v344_v4  ;;  %v353_v10 = vrot.slane %v340_v6, %v352_v5  ;;  %v349_v11 = vrot.slane %v340_v6, %v348_v7  ;;  %v357_v12 = vrot.slane %v340_v6, %v356_v8  ;;  %s634_s24 = scalar_lea.vmem (%p996_p6), %s1167_s3, %s809_s12 }
  0x3a   : > { %535 = vmatpush1.bf16.msra.mxu0 %v873_v47  ;;  %578 = vmatpush1.bf16.msra.mxu1 %v874_v48 }
  0x3b   : > { %536 = vmatprep.subr.bf16.mxu0 %v875_v49  ;;  %579 = vmatprep.subr.bf16.mxu1 %v877_v50 }
  0x3e   : > { %537 = vmatpush1.bf16.msra.mxu0 %v879_v51  ;;  %580 = vmatpush1.bf16.msra.mxu1 %v880_v52 }
  0x3f   : > { %538 = vmatprep.subr.bf16.mxu0 %v881_v53  ;;  %581 = vmatprep.subr.bf16.mxu1 %v883_v54 }
  0x42   : > { %539 = vmatpush1.bf16.msra.mxu0 %v885_v55  ;;  %582 = vmatpush1.bf16.msra.mxu1 %v886_v56 }
  0x43   : > { %540 = vmatprep.subr.bf16.mxu0 %v887_v57  ;;  %583 = vmatprep.subr.bf16.mxu1 %v889_v58 }
  0x46   : > { %541 = vmatpush1.bf16.msra.mxu0 %v891_v59  ;;  %584 = vmatpush1.bf16.msra.mxu1 %v892_v60 }
  0x47   : > { %542 = vmatprep.subr.bf16.mxu0 %v893_v61  ;;  %585 = vmatprep.subr.bf16.mxu1 %v895_v62 }
  0x4a   : > { %543 = vmatpush1.bf16.msra.mxu0 %v897_v63  ;;  %586 = vmatpush1.bf16.msra.mxu1 %v898_v0 }
  0x4d   : > { %561 = vmatmul.mubr.bf16.vlgmr.msra.gmra.mrb[0].mxu0 %v899_v1  ;;  %604 = vmatmul.mubr.bf16.vlgmr.msra.gmra.mrb[0].mxu1 %v899_v1 }
 0x120   : > { %v562_v13 = vpop.f32.mrb[0].mxu0  ;;  %v605_v14 = vpop.f32.mrb[0].mxu1  ;;  %628 = sbr.rel (!%p996_p6) target bundleno = 303 (0x12f), region = 59 }
 0x121   : > { %v563_v15 = vadd.f32 %v562_v13, %v345_v9  ;;  %v606_v16 = vadd.f32 %v605_v14, %v353_v10  ;;  %v564_v17 = vpop.f32.mrb[1].mxu0  ;;  %v607_v18 = vpop.f32.mrb[1].mxu1 }
 0x122   : > { %v565_v19 = vadd.f32 %v564_v17, %v349_v11  ;;  %v608_v20 = vadd.f32 %v607_v18, %v357_v12  ;;  %v566_v21 = vpop.f32.mrb[2].mxu0  ;;  %v609_v22 = vpop.f32.mrb[2].mxu1 }
 0x123   : > { %614 = vst [vmem:[%s1125_s19] sm:$0xff] %v563_v15  ;;  %616 = vst [vmem:[%s1125_s19 + $0x10] sm:$0xff] %v606_v16  ;;  %v567_v23 = vadd.f32 %v566_v21, %v345_v9  ;;  %v610_v24 = vadd.f32 %v609_v22, %v353_v10  ;;  %v568_v25 = vpop.f32.mrb[3].mxu0  ;;  %v611_v26 = vpop.f32.mrb[3].mxu1 }
 0x124   : > { %615 = vst [vmem:[%s1125_s19 + $0x8] sm:$0xff] %v565_v19  ;;  %617 = vst [vmem:[%s1125_s19 + $0x18] sm:$0xff] %v608_v20  ;;  %v569_v27 = vadd.f32 %v568_v25, %v349_v11  ;;  %v612_v28 = vadd.f32 %v611_v26, %v357_v12 }
 0x125   : > { %618 = vst [vmem:[%s1125_s19 + $0x20] sm:$0xff] %v567_v23  ;;  %620 = vst [vmem:[%s1125_s19 + $0x30] sm:$0xff] %v610_v24 }
 0x126   : > { %619 = vst [vmem:[%s1125_s19 + $0x28] sm:$0xff] %v569_v27  ;;  %621 = vst [vmem:[%s1125_s19 + $0x38] sm:$0xff] %v612_v28 }
 0x12a   : > { %v647_v29 = vld [vmem:[%s1125_s19] sm:$0xff]  ;;  %v651_v31 = vld [vmem:[%s1125_s19 + $0x10] sm:$0xff] }
 0x12b   : > { %v649_v30 = vld [vmem:[%s1125_s19 + $0x8] sm:$0xff]  ;;  %v653_v32 = vld [vmem:[%s1125_s19 + $0x18] sm:$0xff]  ;;  %648 = vst [vmem:[%s634_s24] sm:$0xff] %v647_v29  ;;  %652 = vst [vmem:[%s634_s24 + $0x10] sm:$0xff] %v651_v31 }
 0x12c   : > { %v655_v33 = vld [vmem:[%s1125_s19 + $0x20] sm:$0xff]  ;;  %650 = vst [vmem:[%s634_s24 + $0x8] sm:$0xff] %v649_v30  ;;  %654 = vst [vmem:[%s634_s24 + $0x18] sm:$0xff] %v653_v32  ;;  %v659_v35 = vld [vmem:[%s1125_s19 + $0x30] sm:$0xff] }
 0x12d   : > { %v657_v34 = vld [vmem:[%s1125_s19 + $0x28] sm:$0xff]  ;;  %656 = vst [vmem:[%s634_s24 + $0x40] sm:$0xff] %v655_v33  ;;  %v661_v36 = vld [vmem:[%s1125_s19 + $0x38] sm:$0xff]  ;;  %660 = vst [vmem:[%s634_s24 + $0x50] sm:$0xff] %v659_v35 }
 0x12e   : > { %658 = vst [vmem:[%s634_s24 + $0x48] sm:$0xff] %v657_v34  ;;  %662 = vst [vmem:[%s634_s24 + $0x58] sm:$0xff] %v661_v36 }
 0x12f PF: > { %s13_s16 = sadd.s32 1, %s938_s16   ;;  %s1169_s12 = smov %s926_s13 }
 0x130   : > { %p10_p12 = scmp.ge.s32.totalorder %s13_s16, 4   ;;  %s1170_s13 = smov %s1001_s22 }
 0x131   : > { %s1171_s14 = smov %s934_s15  ;;  %s1172_s15 = smov %s1174_s17 }
 0x132   :  { %12 = sbr.rel (!%p10_p12) target bundleno = 3 (0x3), region = 119 }

// kernel: ada_forward.7
= control target key start
LH: loop header
LB: loop body
LE: loop exit
PB: predicated region body
PF: predicated region fallthrough
CT: control target
= control target key end

     0   :  { %s2341_s17 = smov 0   ;;  %s2637_s0 = inlined_call_operand.vmem [shape: f32[2,8,2,512], index: 0, kind: input, shape index: {}]   ;;  %s2638_s1 = inlined_call_operand.vmem [shape: f32[2,8,2,2], index: 1, kind: input, shape index: {}]   ;;  %s2639_s2 = inlined_call_operand.vmem [shape: bf16[2,128,512], index: 2, kind: input, shape index: {}]   ;;  %s2640_s3 = inlined_call_operand.vmem [shape: f32[2,128,2], index: 3, kind: input, shape index: {}]   ;;  %s2641_s4 = inlined_call_operand.vmem [shape: f32[2,1,2], index: 4, kind: input, shape index: {}]   ;;  %s2642_s5 = inlined_call_operand.vmem [shape: f32[2,128,3], index: 5, kind: input, shape index: {}]   ;;  %s2643_s6 = inlined_call_operand.vmem [shape: f32[2,1,3], index: 6, kind: input, shape index: {}]   ;;  %s2644_s7 = inlined_call_operand.vmem [shape: f32[2,128,2], index: 7, kind: input, shape index: {}]   ;;  %s2645_s8 = inlined_call_operand.vmem [shape: f32[2,1,2], index: 8, kind: input, shape index: {}]   ;;  %s2646_s9 = inlined_call_operand.vmem [shape: f32[2,8,2,2], index: 9, kind: output, shape index: {0}]   ;;  %s2647_s10 = inlined_call_operand.vmem [shape: f32[2,8,2,2], index: 10, kind: output, shape index: {1}]   ;;  %s2648_s11 = inlined_call_operand.vmem [shape: f32[2,8,2,1], index: 11, kind: output, shape index: {2}]  }
   0x1   :  { %2649 = sst [smem:[#allocation4_spill]] %s2637_s0 }
   0x2   :  { %2650 = sst [smem:[#allocation5_spill]] %s2639_s2 }
   0x3   :  { %2651 = sst [smem:[#allocation6_spill]] %s2640_s3 }
   0x4 LB: > { %s1673_s18 = sadd.s32 4294967295, %s2264_s17   ;;  %p1677_p0 = scmp.ge.s32.totalorder %s2264_s17, 1  ;;  %s2264_s17 = sphi %s2341_s17, %s22_s17  }
   0x5   : > { %p416_p1 = scmp.lt.s32.totalorder %s2264_s17, 3 }
   0x7   : > { %p417_p2 = pnand %p1677_p0, %p416_p1 }
   0x8   : > { %p500_p3 = scmp.lt.s32.totalorder (!%p417_p2), %s1673_s18, 1  ;;  %v2270_v0 = vmov (!%p417_p2), 0.0|0.0   ;;  %vm2271_vm0 = vmmov (!%p417_p2), 0   ;;  %v2272_v1 = vmov (!%p417_p2), 0.0   ;;  %s2652_s2 = sld [smem:[#allocation5_spill]] (!%p417_p2)  ;;  %vm775_vm1 = vcmask (!%p417_p2), 9216  }
   0x9   : > { %420 = sbr.rel (%p417_p2) target bundleno = 1698 (0x6a2), region = 56  ;;  %2020 = vmatprep.subr.bf16.mxu0 (!%p417_p2), %v2270_v0  ;;  %1877 = vmatprep.mubr.msk.f32.mxu0 (!%p417_p2), %vm2271_vm0, %v2272_v1  ;;  %s2653_s3 = sld [smem:[#allocation6_spill]] (!%p417_p2)  ;;  %vm781_vm2 = vcmask (!%p417_p2), 1024  }
   0xa   : > { %2044 = vmatprep.subr.bf16.mxu1 (!%p417_p2), %v2270_v0  ;;  %1912 = vmatprep.mubr.msk.f32.mxu1 (!%p417_p2), %vm2271_vm0, %v2272_v1  ;;  %s2654_s0 = sld [smem:[#allocation4_spill]] (!%p417_p2)  ;;  %s2273_s16 = smov (!%p417_p2), 126  }
   0xb   : > { %s2477_s27 = smov (!%p417_p2), 0  }
  0x10   : > { %s2658_s18 = smov (!%p500_p3, %s1673_s18), 1 }
  0x11   : > { %s1753_s19 = sshll.u32 %s2658_s18, 8  ;;  %s1754_s20 = sshll.u32 %s2658_s18, 7 }
  0x12   : > { %s2358_s23 = scalar_lea.vmem %s2652_s2, %s1753_s19  ;;  %s2363_s26 = scalar_lea.vmem %s2653_s3, %s1754_s20 }
  0x13   : > { %s2372_s13 = scalar_lea.vmem %s2642_s5, %s1754_s20  ;;  %s1751_s14 = sshll.u32 %s2658_s18, 6 }
  0x14   : > { %v589_v2 = vld [vmem:[%s2372_s13] sm:$0xff]  ;;  %v590_v3 = vld [vmem:[%s2372_s13 + $0x8] sm:$0xff]  ;;  %v591_v4 = vld [vmem:[%s2372_s13 + $0x10] sm:$0xff]  ;;  %s2382_s19 = scalar_lea.vmem %s2644_s7, %s1754_s20  ;;  %s2385_s21 = sshll.u32 %s2658_s18, 4 }
  0x15   : > { %v2021_v5 = vpack.c.bf16 %v590_v3, %v589_v2  ;;  %v592_v6 = vld [vmem:[%s2372_s13 + $0x18] sm:$0xff]  ;;  %s2390_s25 = scalar_lea.vmem %s2654_s0, %s1751_s14  ;;  %v593_v8 = vld [vmem:[%s2372_s13 + $0x20] sm:$0xff]  ;;  %v594_v9 = vld [vmem:[%s2372_s13 + $0x28] sm:$0xff]  ;;  %s2443_s14 = scalar_lea.vmem %s2645_s8, %s2658_s18 }
  0x16   : > { %v2024_v7 = vpack.c.bf16 %v592_v6, %v591_v4  ;;  %v555_v10 = vld [vmem:[%s2390_s25] sm:$0xff]  ;;  %v683_v14 = vld [vmem:[%s2382_s19 + $0x8] sm:$0xff]  ;;  %v684_v15 = vld [vmem:[%s2382_s19 + $0x10] sm:$0xff]  ;;  %v2027_v16 = vpack.c.bf16 %v594_v9, %v593_v8  ;;  %s2450_s22 = scalar_lea.vmem %s2647_s10, %s2385_s21  ;;  %s2458_s28 = scalar_lea.vmem %s2643_s6, %s2658_s18 }
  0x17   : > { %2022 = vmatpush3.bf16.msra.mxu0 %v2021_v5  ;;  %v682_v11 = vld [vmem:[%s2382_s19] sm:$0xff]  ;;  %v1696_v12 = vmul.f32 -1.442695, %v555_v10  ;;  %v563_v13 = vrot.slane %v555_v10, 2  ;;  %v685_v18 = vld [vmem:[%s2382_s19 + $0x18] sm:$0xff]  ;;  %v595_v19 = vld [vmem:[%s2372_s13 + $0x30] sm:$0xff]  ;;  %s2465_s15 = scalar_lea.vmem %s2646_s9, %s2385_s21  ;;  %s2473_s24 = scalar_lea.vmem %s2648_s11, %s2385_s21 }
  0x18   : > { %2023 = vmatprep.subr.bf16.mxu0 %v2270_v0  ;;  %v2045_v17 = vpack.c.bf16 %v683_v14, %v682_v11  ;;  %v596_v20 = vld [vmem:[%s2372_s13 + $0x38] sm:$0xff]  ;;  %v2048_v22 = vpack.c.bf16 %v685_v18, %v684_v15  ;;  %v686_v23 = vld [vmem:[%s2382_s19 + $0x20] sm:$0xff]  ;;  %v687_v24 = vld [vmem:[%s2382_s19 + $0x28] sm:$0xff]  ;;  %v574_v26 = vrot.slane %v555_v10, 6  ;;  %v571_v30 = vrot.slane %v555_v10, 4 }
  0x19   : > { %2167 = vpow2.f32 %v1696_v12  ;;  %v1697_v21 = vmul.f32 -1.442695, %v563_v13  ;;  %v2030_v25 = vpack.c.bf16 %v596_v20, %v595_v19  ;;  %v597_v27 = vld [vmem:[%s2372_s13 + $0x40] sm:$0xff]  ;;  %v598_v28 = vld [vmem:[%s2372_s13 + $0x48] sm:$0xff]  ;;  %v2051_v29 = vpack.c.bf16 %v687_v24, %v686_v23  ;;  %v688_v31 = vld [vmem:[%s2382_s19 + $0x30] sm:$0xff] }
  0x1a   : > { %2046 = vmatpush3.bf16.msra.mxu1 %v2045_v17  ;;  %v689_v32 = vld [vmem:[%s2382_s19 + $0x38] sm:$0xff]  ;;  %v2033_v33 = vpack.c.bf16 %v598_v28, %v597_v27  ;;  %v1698_v34 = vmul.f32 -1.442695, %v574_v26  ;;  %v599_v35 = vld [vmem:[%s2372_s13 + $0x50] sm:$0xff]  ;;  %v690_v39 = vld [vmem:[%s2382_s19 + $0x40] sm:$0xff] }
  0x1b   : > { %2025 = vmatpush3.bf16.msra.mxu0 %v2024_v7  ;;  %2169 = vpow2.f32 %v1697_v21  ;;  %2047 = vmatprep.subr.bf16.mxu1 %v2270_v0  ;;  %v600_v36 = vld [vmem:[%s2372_s13 + $0x58] sm:$0xff]  ;;  %v2054_v37 = vpack.c.bf16 %v689_v32, %v688_v31  ;;  %v691_v40 = vld [vmem:[%s2382_s19 + $0x48] sm:$0xff]  ;;  %v601_v44 = vld [vmem:[%s2372_s13 + $0x60] sm:$0xff] }
  0x1c   : > { %2026 = vmatprep.subr.bf16.mxu0 %v2270_v0  ;;  %2171 = vtanh.f32 %v571_v30  ;;  %v2036_v41 = vpack.c.bf16 %v600_v36, %v599_v35  ;;  %v602_v45 = vld [vmem:[%s2372_s13 + $0x68] sm:$0xff]  ;;  %v2057_v47 = vpack.c.bf16 %v691_v40, %v690_v39  ;;  %v692_v48 = vld [vmem:[%s2382_s19 + $0x50] sm:$0xff]  ;;  %v693_v49 = vld [vmem:[%s2382_s19 + $0x58] sm:$0xff] }
  0x1d   : > { %2173 = vpow2.f32 %v1698_v34  ;;  %v2039_v50 = vpack.c.bf16 %v602_v45, %v601_v44  ;;  %v603_v51 = vld [vmem:[%s2372_s13 + $0x70] sm:$0xff]  ;;  %v604_v52 = vld [vmem:[%s2372_s13 + $0x78] sm:$0xff]  ;;  %v2060_v53 = vpack.c.bf16 %v693_v49, %v692_v48  ;;  %v694_v54 = vld [vmem:[%s2382_s19 + $0x60] sm:$0xff] }
  0x1e   : > { %2049 = vmatpush3.bf16.msra.mxu1 %v2048_v22  ;;  %v695_v55 = vld [vmem:[%s2382_s19 + $0x68] sm:$0xff]  ;;  %v2042_v56 = vpack.c.bf16 %v604_v52, %v603_v51  ;;  %v696_v60 = vld [vmem:[%s2382_s19 + $0x70] sm:$0xff]  ;;  %v697_v61 = vld [vmem:[%s2382_s19 + $0x78] sm:$0xff] }
  0x1f   : > { %2028 = vmatpush3.bf16.msra.mxu0 %v2027_v16  ;;  %2050 = vmatprep.subr.bf16.mxu1 %v2270_v0  ;;  %v2063_v59 = vpack.c.bf16 %v695_v55, %v694_v54  ;;  %v2066_v3 = vpack.c.bf16 %v697_v61, %v696_v60  ;;  %v1699_v12 = vld [vmem:[%s2458_s28] ss:$0 sm:$0xff] }
  0x20   : > { %2029 = vmatprep.subr.bf16.mxu0 %v2270_v0 }
  0x22   : > { %2052 = vmatpush3.bf16.msra.mxu1 %v2051_v29 }
  0x23   : > { %2031 = vmatpush3.bf16.msra.mxu0 %v2030_v25  ;;  %v2168_v38 = vpop.eup %2167  ;;  %2053 = vmatprep.subr.bf16.mxu1 %v2270_v0 }
  0x24   : > { %2032 = vmatprep.subr.bf16.mxu0 %v2270_v0  ;;  %v559_v42 = vadd.f32 1.0, %v2168_v38 }
  0x25   : > { %v2170_v43 = vpop.eup %2169 }
  0x26   : > { %2175 = vrcp.f32 %v559_v42  ;;  %v568_v46 = vadd.f32 1.0, %v2170_v43  ;;  %2055 = vmatpush3.bf16.msra.mxu1 %v2054_v37  ;;  %v2172_v57 = vpop.eup %2171 }
  0x27   : > { %2034 = vmatpush3.bf16.msra.mxu0 %v2033_v33  ;;  %2056 = vmatprep.subr.bf16.mxu1 %v2270_v0  ;;  %v2174_v58 = vpop.eup %2173 }
  0x28   : > { %2035 = vmatprep.subr.bf16.mxu0 %v2270_v0  ;;  %2177 = vrcp.f32 %v568_v46  ;;  %v579_v63 = vadd.f32 1.0, %v2174_v58 }
  0x2a   : > { %2058 = vmatpush3.bf16.msra.mxu1 %v2057_v47  ;;  %2179 = vrcp.f32 %v579_v63 }
  0x2b   : > { %2037 = vmatpush3.bf16.msra.mxu0 %v2036_v41  ;;  %2059 = vmatprep.subr.bf16.mxu1 %v2270_v0 }
  0x2c   : > { %2038 = vmatprep.subr.bf16.mxu0 %v2270_v0 }
  0x2e   : > { %2061 = vmatpush3.bf16.msra.mxu1 %v2060_v53 }
  0x2f   : > { %2040 = vmatpush3.bf16.msra.mxu0 %v2039_v50  ;;  %2062 = vmatprep.subr.bf16.mxu1 %v2270_v0 }
  0x30   : > { %2041 = vmatprep.subr.bf16.mxu0 %v2270_v0  ;;  %v2176_v62 = vpop.eup %2175 }
  0x31   : > { %v583_v1 = vmul.f32 %v2176_v62, %v2172_v57 }
  0x32   : > { %v2178_v2 = vpop.eup %2177  ;;  %2064 = vmatpush3.bf16.msra.mxu1 %v2063_v59 }
  0x33   : > { %2043 = vmatpush3.bf16.msra.mxu0 %v2042_v56  ;;  %v582_v4 = vmul.f32 0.0, %v2178_v2  ;;  %2065 = vmatprep.subr.bf16.mxu1 %v2270_v0  ;;  %v1700_v0 = vld [vmem:[%s2443_s14] ss:$0 sm:$0xff] }
  0x34   : > { %v2180_v6 = vpop.eup %2179 }
  0x35   : > { %v584_v5 = vadd.f32 %v583_v1, %v582_v4 }
  0x36   : > { %2067 = vmatpush3.bf16.msra.mxu1 %v2066_v3 }
  0x37   : > { %2181 = vtanh.f32 %v584_v5  ;;  %588 = vst [vmem:[#allocation3] sm:$0x3] %v584_v5 }
  0x39   : > { %1913 = vmatmul.mubr.f32.vlgmr.msra.gmra.mrb[0].mxu1 %v584_v5 }
  0x41   : > { %v2182_v7 = vpop.eup %2181 }
  0x42   : > { %v586_v8 = vmul.f32 %v2182_v7, %v2180_v6 }
  0x44   : > { %587 = vst [vmem:[#allocation2] sm:$0x3] %v586_v8  ;;  %1878 = vmatmul.mubr.f32.vlgmr.msra.gmra.mrb[0].mxu0 %v586_v8 }
 0x10c   : > { %v771_v9 = vpop.f32.mrb[0].mxu1 }
 0x10d   : > { %v772_v10 = vadd.f32 %v1700_v0, %v771_v9  ;;  %v1914_v11 = vpop.f32.mrb[1].mxu1 }
 0x10f   : > { %783 = vst.msk [vmem:[%s2450_s22] sm:$0x3] %vm775_vm1, %v772_v10 }
 0x117   : > { %v678_v13 = vpop.f32.mrb[0].mxu0 }
 0x118   : > { %v679_v14 = vadd.f32 %v1699_v12, %v678_v13  ;;  %v1879_v15 = vpop.f32.mrb[1].mxu0 }
 0x11a   : > { %776 = vst.msk [vmem:[%s2465_s15] sm:$0x3] %vm775_vm1, %v679_v14  ;;  %778 = vrot.lane.b32.xlu0 %v679_v14, %s2273_s16 }
 0x18c   : > { %v779_v16 = vpop.permute.xlu0 %778 }
 0x18d   : > { %782 = vst.msk [vmem:[%s2473_s24] sm:$0x3] %vm781_vm2, %v779_v16 }
 0x18e LB: >> { %v2186_v17 = vld [vmem:[%s2358_s23 + $0x4] ss:$16 sps:$4 sm:$0xff]   ;;  %v2188_v18 = vld [vmem:[%s2358_s23 + $0xc] ss:$16 sps:$4 sm:$0xff]   ;;  %v2274_v19 = vmov 0   ;;  %v2275_v55 = vmov 0.0|0.0   ;;  %v1081_v16 = vlaneseq  ;;  %s2656_s3 = scalar_lea.vmem %s2641_s4, %s2658_s18  ;;  %s2268_s27 = sphi %s2477_s27, %s789_s27  }
 0x18f   : >> { %1022 = vmatprep.mubr.bf16.mxu0 %v2274_v19  ;;  %1063 = vmatprep.mubr.bf16.mxu1 %v2274_v19  ;;  %v2190_v20 = vld [vmem:[%s2358_s23] ss:$16 sps:$4 sm:$0xff]   ;;  %v2191_v21 = vld [vmem:[%s2358_s23 + $0x8] ss:$16 sps:$4 sm:$0xff]   ;;  %v2192_v22 = vld [vmem:[%s2358_s23 + $0x24] ss:$16 sps:$4 sm:$0xff]  }
 0x190   : >> { %990 = vmatprep.subr.bf16.mxu0 %v2186_v17  ;;  %2183 = vset.pattern.permute.xlu1 %v2274_v19  ;;  %v2194_v23 = vld [vmem:[%s2358_s23 + $0x2c] ss:$16 sps:$4 sm:$0xff]   ;;  %v2196_v24 = vld [vmem:[%s2358_s23 + $0x20] ss:$16 sps:$4 sm:$0xff]   ;;  %v2197_v25 = vld [vmem:[%s2358_s23 + $0x28] ss:$16 sps:$4 sm:$0xff]  }
 0x191   : >> { %1031 = vmatprep.subr.bf16.mxu1 %v2188_v18  ;;  %991 = vmatpush1.bf16.msra.mxu0 %v2190_v20  ;;  %v2198_v26 = vld [vmem:[%s2358_s23 + $0x44] ss:$16 sps:$4 sm:$0xff]   ;;  %v2200_v27 = vld [vmem:[%s2358_s23 + $0x4c] ss:$16 sps:$4 sm:$0xff]   ;;  %v2202_v28 = vld [vmem:[%s2358_s23 + $0x40] ss:$16 sps:$4 sm:$0xff]  }
 0x192   : >> { %1032 = vmatpush1.bf16.msra.mxu1 %v2191_v21  ;;  %992 = vmatprep.subr.bf16.mxu0 %v2192_v22  ;;  %v2203_v29 = vld [vmem:[%s2358_s23 + $0x48] ss:$16 sps:$4 sm:$0xff]   ;;  %v2204_v30 = vld [vmem:[%s2358_s23 + $0x64] ss:$16 sps:$4 sm:$0xff]   ;;  %v2206_v31 = vld [vmem:[%s2358_s23 + $0x6c] ss:$16 sps:$4 sm:$0xff]  }
 0x193   : >> { %1033 = vmatprep.subr.bf16.mxu1 %v2194_v23  ;;  %v2208_v32 = vld [vmem:[%s2358_s23 + $0x60] ss:$16 sps:$4 sm:$0xff]   ;;  %v2209_v33 = vld [vmem:[%s2358_s23 + $0x68] ss:$16 sps:$4 sm:$0xff]   ;;  %v2210_v34 = vld [vmem:[%s2358_s23 + $0x84] ss:$16 sps:$4 sm:$0xff]  }
 0x194   : >> { %v2212_v35 = vld [vmem:[%s2358_s23 + $0x8c] ss:$16 sps:$4 sm:$0xff]   ;;  %v2214_v36 = vld [vmem:[%s2358_s23 + $0x80] ss:$16 sps:$4 sm:$0xff]   ;;  %v2215_v37 = vld [vmem:[%s2358_s23 + $0x88] ss:$16 sps:$4 sm:$0xff]  }
 0x195   : >> { %993 = vmatpush1.bf16.msra.mxu0 %v2196_v24  ;;  %v2216_v38 = vld [vmem:[%s2358_s23 + $0xa4] ss:$16 sps:$4 sm:$0xff]   ;;  %v2218_v39 = vld [vmem:[%s2358_s23 + $0xac] ss:$16 sps:$4 sm:$0xff]   ;;  %v2220_v40 = vld [vmem:[%s2358_s23 + $0xa0] ss:$16 sps:$4 sm:$0xff]  }
 0x196   : >> { %1034 = vmatpush1.bf16.msra.mxu1 %v2197_v25  ;;  %994 = vmatprep.subr.bf16.mxu0 %v2198_v26  ;;  %v2221_v41 = vld [vmem:[%s2358_s23 + $0xa8] ss:$16 sps:$4 sm:$0xff]   ;;  %v2222_v42 = vld [vmem:[%s2358_s23 + $0xc4] ss:$16 sps:$4 sm:$0xff]   ;;  %v2224_v43 = vld [vmem:[%s2358_s23 + $0xcc] ss:$16 sps:$4 sm:$0xff]  }
 0x197   : >> { %1035 = vmatprep.subr.bf16.mxu1 %v2200_v27  ;;  %v2226_v44 = vld [vmem:[%s2358_s23 + $0xc0] ss:$16 sps:$4 sm:$0xff]   ;;  %v2227_v45 = vld [vmem:[%s2358_s23 + $0xc8] ss:$16 sps:$4 sm:$0xff]   ;;  %v2228_v46 = vld [vmem:[%s2358_s23 + $0xe4] ss:$16 sps:$4 sm:$0xff]  }
 0x198   : >> { %v2230_v47 = vld [vmem:[%s2358_s23 + $0xec] ss:$16 sps:$4 sm:$0xff]   ;;  %v2232_v48 = vld [vmem:[%s2358_s23 + $0xe0] ss:$16 sps:$4 sm:$0xff]   ;;  %v2233_v49 = vld [vmem:[%s2358_s23 + $0xe8] ss:$16 sps:$4 sm:$0xff]  }
 0x199   : >> { %995 = vmatpush1.bf16.msra.mxu0 %v2202_v28  ;;  %v2514_v50 = vld [vmem:[#allocation2] sm:$0x3]  ;;  %v1128_v53 = vld [vmem:[%s2363_s26 + $0x8] sm:$0xff]  ;;  %v1129_v56 = vld [vmem:[%s2363_s26 + $0x10] sm:$0xff]  ;;  %vm2276_vm3 = vmmov 0   ;;  %v2277_v4 = vmov 0.0  }
 0x19a   : >> { %1036 = vmatpush1.bf16.msra.mxu1 %v2203_v29  ;;  %996 = vmatprep.subr.bf16.mxu0 %v2204_v30  ;;  %v797_v51 = vpack.c.bf16 %v2514_v50, %v2514_v50  ;;  %v1127_v52 = vld [vmem:[%s2363_s26] sm:$0xff]  ;;  %v1130_v57 = vld [vmem:[%s2363_s26 + $0x18] sm:$0xff]  ;;  %v1132_v60 = vld [vmem:[%s2363_s26 + $0x28] sm:$0xff]  ;;  %v2278_v14 = vmov 1983009808   ;;  %v1082_v18 = vshrl.u32 %v1081_v16, 7 }
 0x19b   : >> { %1037 = vmatprep.subr.bf16.mxu1 %v2206_v31  ;;  %v2069_v54 = vpack.c.bf16 %v1128_v53, %v1127_v52  ;;  %v2072_v58 = vpack.c.bf16 %v1130_v57, %v1129_v56  ;;  %v1131_v59 = vld [vmem:[%s2363_s26 + $0x20] sm:$0xff]  ;;  %v1133_v62 = vld [vmem:[%s2363_s26 + $0x30] sm:$0xff]  ;;  %v1134_v63 = vld [vmem:[%s2363_s26 + $0x38] sm:$0xff]  ;;  %v1079_v15 = vunpack.c.l.s4 %v2278_v14  ;;  %s1701_s29 = sshll.u32 %s2268_s27, 3  ;;  %s2580_s20 = sshll.u32 %s2268_s27, 1 }
 0x19c   : >> { %v2075_v61 = vpack.c.bf16 %v1132_v60, %v1131_v59  ;;  %v2078_v1 = vpack.c.bf16 %v1134_v63, %v1133_v62  ;;  %v1135_v2 = vld [vmem:[%s2363_s26 + $0x40] sm:$0xff]  ;;  %v1136_v3 = vld [vmem:[%s2363_s26 + $0x48] sm:$0xff]  ;;  %v1137_v6 = vld [vmem:[%s2363_s26 + $0x50] sm:$0xff]  ;;  %s1556_s30 = scalar_lea.vmem %s2390_s25, %s1701_s29  ;;  %s2655_s29 = scalar_lea.vmem %s2638_s1, %s2385_s21 }
 0x19d   : >> { %997 = vmatpush1.bf16.msra.mxu0 %v2208_v32  ;;  %v2081_v5 = vpack.c.bf16 %v1136_v3, %v1135_v2  ;;  %v1138_v7 = vld [vmem:[%s2363_s26 + $0x58] sm:$0xff]  ;;  %v1139_v0 = vld [vmem:[%s2363_s26 + $0x60] sm:$0xff]  ;;  %v1140_v9 = vld [vmem:[%s2363_s26 + $0x68] sm:$0xff]  ;;  %v1080_v17 = vunpack.c.0.s8 %v1079_v15  ;;  %s1568_s12 = scalar_lea.vmem %s2450_s22, %s2580_s20  ;;  %s1562_s0 = scalar_lea.vmem %s2465_s15, %s2580_s20 }
 0x19e   : >> { %1038 = vmatpush1.bf16.msra.mxu1 %v2209_v33  ;;  %998 = vmatprep.subr.bf16.mxu0 %v2210_v34  ;;  %v2084_v8 = vpack.c.bf16 %v1138_v7, %v1137_v6  ;;  %v2087_v10 = vpack.c.bf16 %v1140_v9, %v1139_v0  ;;  %v1141_v11 = vld [vmem:[%s2363_s26 + $0x70] sm:$0xff]  ;;  %v1142_v12 = vld [vmem:[%s2363_s26 + $0x78] sm:$0xff]  ;;  %v1702_v32 = vld [vmem:[%s1556_s30 + $0x8] sm:$0xff]  ;;  %s1559_s30 = scalar_lea.vmem %s2655_s29, %s2580_s20  ;;  %s2280_s2 = smov 126  }
 0x19f   : >> { %1039 = vmatprep.subr.bf16.mxu1 %v2212_v35  ;;  %v2090_v13 = vpack.c.bf16 %v1142_v12, %v1141_v11  ;;  %v1083_v21 = vsub.s32 %v1080_v17, %v1082_v18  ;;  %v1342_v57 = vld [vmem:[%s2382_s19] sm:$0xff]  ;;  %v1344_v63 = vld [vmem:[%s2382_s19 + $0x10] sm:$0xff]  ;;  %v1351_v9 = vld [vmem:[%s2382_s19 + $0x48] sm:$0xff]  ;;  %s789_s27 = sadd.s32 1, %s2268_s27  }
 0x1a0   : >> { %v1346_v3 = vld [vmem:[%s2382_s19 + $0x20] sm:$0xff]  ;;  %v1348_v7 = vld [vmem:[%s2382_s19 + $0x30] sm:$0xff]  ;;  %v1353_v12 = vld [vmem:[%s2382_s19 + $0x58] sm:$0xff]  ;;  %p786_p4 = scmp.ge.s32.totalorder %s789_s27, 7  }
 0x1a1   : >> { %999 = vmatpush1.bf16.msra.mxu0 %v2214_v36  ;;  %v1352_v11 = vld [vmem:[%s2382_s19 + $0x50] sm:$0xff]  ;;  %v1354_v14 = vld [vmem:[%s2382_s19 + $0x60] sm:$0xff]  ;;  %v1355_v15 = vld [vmem:[%s2382_s19 + $0x68] sm:$0xff] }
 0x1a2   : >> { %1040 = vmatpush1.bf16.msra.mxu1 %v2215_v37  ;;  %1000 = vmatprep.subr.bf16.mxu0 %v2216_v38  ;;  %v2135_v16 = vpack.c.bf16 %v1355_v15, %v1354_v14  ;;  %v1356_v17 = vld [vmem:[%s2382_s19 + $0x70] sm:$0xff]  ;;  %v1357_v18 = vld [vmem:[%s2382_s19 + $0x78] sm:$0xff] }
 0x1a3   : >> { %1041 = vmatprep.subr.bf16.mxu1 %v2218_v39 }
 0x1a5   : >> { %1001 = vmatpush1.bf16.msra.mxu0 %v2220_v40 }
 0x1a6   : >> { %1042 = vmatpush1.bf16.msra.mxu1 %v2221_v41  ;;  %1002 = vmatprep.subr.bf16.mxu0 %v2222_v42 }
 0x1a7   : >> { %1043 = vmatprep.subr.bf16.mxu1 %v2224_v43 }
 0x1a9   : >> { %1003 = vmatpush1.bf16.msra.mxu0 %v2226_v44 }
 0x1aa   : >> { %1044 = vmatpush1.bf16.msra.mxu1 %v2227_v45  ;;  %1004 = vmatprep.subr.bf16.mxu0 %v2228_v46 }
 0x1ab   : >> { %1045 = vmatprep.subr.bf16.mxu1 %v2230_v47  ;;  %v792_v47 = vld [vmem:[#allocation3] sm:$0x3] }
 0x1ad   : >> { %1005 = vmatpush1.bf16.msra.mxu0 %v2232_v48 }
 0x1ae   : >> { %1046 = vmatpush1.bf16.msra.mxu1 %v2233_v49  ;;  %2068 = vmatprep.subr.bf16.mxu0 %v2275_v55 }
 0x1af   : >> { %2092 = vmatprep.subr.bf16.mxu1 %v2275_v55 }
 0x1b0   : >> { %1023 = vmatmul.mubr.bf16.vlgmr.msra.gmra.mrb[0].mxu0 %v797_v51 }
 0x1b1   : >> { %1064 = vmatmul.mubr.bf16.vlgmr.msra.gmra.mrb[0].mxu1 %v797_v51  ;;  %2070 = vmatpush3.bf16.msra.mxu0 %v2069_v54 }
 0x1b2   : >> { %2071 = vmatprep.subr.bf16.mxu0 %v2275_v55  ;;  %1947 = vmatprep.mubr.msk.f32.mxu0 %vm2276_vm3, %v2277_v4 }
 0x1b3   : >> { %1982 = vmatprep.mubr.msk.f32.mxu1 %vm2276_vm3, %v2277_v4 }
 0x1b5   : >> { %2073 = vmatpush3.bf16.msra.mxu0 %v2072_v58  ;;  %v1343_v58 = vld [vmem:[%s2382_s19 + $0x8] sm:$0xff] }
 0x1b6   : >> { %2074 = vmatprep.subr.bf16.mxu0 %v2275_v55 }
 0x1b9   : >> { %2076 = vmatpush3.bf16.msra.mxu0 %v2075_v61  ;;  %v2117_v61 = vpack.c.bf16 %v1343_v58, %v1342_v57 }
 0x1ba   : >> { %2077 = vmatprep.subr.bf16.mxu0 %v2275_v55 }
 0x1bd   : >> { %2079 = vmatpush3.bf16.msra.mxu0 %v2078_v1  ;;  %v1345_v1 = vld [vmem:[%s2382_s19 + $0x18] sm:$0xff] }
 0x1be   : >> { %2080 = vmatprep.subr.bf16.mxu0 %v2275_v55  ;;  %v2120_v2 = vpack.c.bf16 %v1345_v1, %v1344_v63  ;;  %v1263_v1 = vld [vmem:[%s2372_s13 + $0x70] sm:$0xff] }
 0x1c1   : >> { %2082 = vmatpush3.bf16.msra.mxu0 %v2081_v5  ;;  %v1347_v5 = vld [vmem:[%s2382_s19 + $0x28] sm:$0xff] }
 0x1c2   : >> { %2083 = vmatprep.subr.bf16.mxu0 %v2275_v55  ;;  %v2123_v6 = vpack.c.bf16 %v1347_v5, %v1346_v3 }
 0x1c5   : >> { %2085 = vmatpush3.bf16.msra.mxu0 %v2084_v8  ;;  %v1349_v8 = vld [vmem:[%s2382_s19 + $0x38] sm:$0xff] }
 0x1c6   : >> { %2086 = vmatprep.subr.bf16.mxu0 %v2275_v55  ;;  %v2126_v0 = vpack.c.bf16 %v1349_v8, %v1348_v7 }
 0x1c9   : >> { %2088 = vmatpush3.bf16.msra.mxu0 %v2087_v10 }
 0x1ca   : >> { %2089 = vmatprep.subr.bf16.mxu0 %v2275_v55 }
 0x1cd   : >> { %2091 = vmatpush3.bf16.msra.mxu0 %v2090_v13  ;;  %v2132_v13 = vpack.c.bf16 %v1353_v12, %v1352_v11 }
 0x1ce   : >> { %2116 = vmatprep.subr.bf16.mxu0 %v2275_v55 }
 0x283   : >> { %v1024_v19 = vpop.f32.mrb[0].mxu0 }
 0x284   : >> { %v1065_v20 = vpop.f32.mrb[0].mxu1  ;;  %v1026_v22 = vpop.f32.mrb[1].mxu0 }
 0x285   : >> { %v1067_v23 = vpop.f32.mrb[1].mxu1  ;;  %v1076_v24 = vcombine.low %v1024_v19, %v1026_v22  ;;  %v1028_v26 = vpop.f32.mrb[2].mxu0  ;;  %v2138_v19 = vpack.c.bf16 %v1357_v18, %v1356_v17  ;;  %v1740_v22 = vld [vmem:[%s1559_s30 + $0x2] sm:$0x3] }
 0x286   : >> { %v1077_v25 = vcombine.low %v1065_v20, %v1067_v23  ;;  %v1069_v27 = vpop.f32.mrb[2].mxu1  ;;  %v1029_v28 = vpop.f32.mrb[3].mxu0  ;;  %v1738_v20 = vld [vmem:[%s2656_s3] ss:$0 sm:$0xff]  ;;  %s1565_s3 = scalar_lea.vmem %s2473_s24, %s2580_s20 }
 0x287   : >> { %v1070_v29 = vpop.f32.mrb[3].mxu1  ;;  %v1084_v30 = vrot.slane %v1076_v24, %v1083_v21  ;;  %v1742_v27 = vld [vmem:[%s2443_s14] ss:$0 sm:$0xff] }
 0x288   : >> { %v1091_v31 = vrot.slane %v1077_v25, %v1083_v21 }
 0x28a   : >> { %v1092_v33 = vcombine.low %v1084_v30, %v1091_v31 }
 0x28c   : >> { %v1094_v34 = vadd.f32 %v1702_v32, %v1092_v33 }
 0x28e   : >> { %v1735_v35 = vmul.f32 -1.442695, %v1094_v34  ;;  %v1102_v36 = vrot.slane %v1094_v34, 2  ;;  %v1113_v38 = vrot.slane %v1094_v34, 6  ;;  %v1110_v41 = vrot.slane %v1094_v34, 4 }
 0x290   : >> { %2234 = vpow2.f32 %v1735_v35  ;;  %v1736_v37 = vmul.f32 -1.442695, %v1102_v36  ;;  %v1737_v39 = vmul.f32 -1.442695, %v1113_v38  ;;  %v2279_v36 = vmov 1   ;;  %v1250_v38 = vld [vmem:[%s2372_s13 + $0x8] sm:$0xff] }
 0x291   : >> { %2185 = vset.pattern.permute.xlu0 %v2279_v36 }
 0x292   : >> { %2236 = vpow2.f32 %v1736_v37  ;;  %v1249_v37 = vld [vmem:[%s2372_s13] sm:$0xff] }
 0x293   : >> { %2238 = vpow2.f32 %v1737_v39  ;;  %v1251_v39 = vld [vmem:[%s2372_s13 + $0x10] sm:$0xff] }
 0x29a   : >> { %v2235_v40 = vpop.eup %2234 }
 0x29b   : >> { %v1098_v42 = vadd.f32 1.0, %v2235_v40  ;;  %v2093_v40 = vpack.c.bf16 %v1250_v38, %v1249_v37 }
 0x29c   : >> { %v2237_v43 = vpop.eup %2236 }
 0x29d   : >> { %2240 = vrcp.f32 %v1098_v42  ;;  %v1107_v44 = vadd.f32 1.0, %v2237_v43  ;;  %v2239_v45 = vpop.eup %2238  ;;  %2094 = vmatpush3.bf16.msra.mxu1 %v2093_v40  ;;  %v1253_v43 = vld [vmem:[%s2372_s13 + $0x20] sm:$0xff] }
 0x29e   : >> { %2242 = vtanh.f32 %v1110_v41  ;;  %v1118_v51 = vadd.f32 1.0, %v2239_v45  ;;  %v1252_v41 = vld [vmem:[%s2372_s13 + $0x18] sm:$0xff]  ;;  %2095 = vmatprep.subr.bf16.mxu1 %v2275_v55 }
 0x29f   : >> { %2244 = vrcp.f32 %v1107_v44  ;;  %v2096_v42 = vpack.c.bf16 %v1252_v41, %v1251_v39  ;;  %v1254_v44 = vld [vmem:[%s2372_s13 + $0x28] sm:$0xff] }
 0x2a0   : >> { %2246 = vrcp.f32 %v1118_v51  ;;  %v2099_v45 = vpack.c.bf16 %v1254_v44, %v1253_v43  ;;  %v1258_v51 = vld [vmem:[%s2372_s13 + $0x48] sm:$0xff] }
 0x2a1   : >> { %2097 = vmatpush3.bf16.msra.mxu1 %v2096_v42 }
 0x2a2   : >> { %2098 = vmatprep.subr.bf16.mxu1 %v2275_v55 }
 0x2a5   : >> { %2100 = vmatpush3.bf16.msra.mxu1 %v2099_v45 }
 0x2a6   : >> { %2101 = vmatprep.subr.bf16.mxu1 %v2275_v55 }
 0x2a7   : >> { %v2241_v46 = vpop.eup %2240 }
 0x2a8   : >> { %v2243_v48 = vpop.eup %2242 }
 0x2a9   : >> { %v2245_v49 = vpop.eup %2244  ;;  %v1122_v52 = vmul.f32 %v2243_v48, %v2241_v46  ;;  %v1255_v46 = vld [vmem:[%s2372_s13 + $0x30] sm:$0xff] }
 0x2aa   : >> { %v1121_v53 = vmul.f32 %v2245_v49, %v792_v47  ;;  %v2247_v56 = vpop.eup %2246  ;;  %v1256_v47 = vld [vmem:[%s2372_s13 + $0x38] sm:$0xff]  ;;  %v1257_v49 = vld [vmem:[%s2372_s13 + $0x40] sm:$0xff] }
 0x2ab   : >> { %v2102_v48 = vpack.c.bf16 %v1256_v47, %v1255_v46 }
 0x2ac   : >> { %v1123_v54 = vadd.f32 %v1122_v52, %v1121_v53  ;;  %v2105_v52 = vpack.c.bf16 %v1258_v51, %v1257_v49  ;;  %v1259_v53 = vld [vmem:[%s2372_s13 + $0x50] sm:$0xff] }
 0x2ad   : >> { %2103 = vmatpush3.bf16.msra.mxu1 %v2102_v48 }
 0x2ae   : >> { %2248 = vtanh.f32 %v1123_v54  ;;  %1248 = vst [vmem:[#allocation3] sm:$0x3] %v1123_v54  ;;  %2104 = vmatprep.subr.bf16.mxu1 %v2275_v55 }
 0x2b1   : >> { %2106 = vmatpush3.bf16.msra.mxu1 %v2105_v52 }
 0x2b2   : >> { %2107 = vmatprep.subr.bf16.mxu1 %v2275_v55 }
 0x2b8   : >> { %v2249_v59 = vpop.eup %2248 }
 0x2b9   : >> { %v2552_v60 = vmul.f32 %v2249_v59, %v2247_v56 }
 0x2bb   : >> { %v1126_v62 = vsub.f32 %v2552_v60, %v2514_v50 }
 0x2bd   : >> { %1948 = vmatmul.mubr.f32.vlgmr.msra.gmra.mrb[4].mxu0 %v1126_v62  ;;  %v1262_v62 = vld [vmem:[%s2372_s13 + $0x68] sm:$0xff] }
 0x2be   : >> { %2118 = vmatpush3.bf16.msra.mxu0 %v2117_v61  ;;  %2017 = vmatprep.mubr.msk.f32.mxu0 %vm2276_vm3, %v2277_v4  ;;  %v1350_v4 = vld [vmem:[%s2382_s19 + $0x40] sm:$0xff] }
 0x2bf   : >> { %2119 = vmatprep.subr.bf16.mxu0 %v2275_v55  ;;  %v2129_v10 = vpack.c.bf16 %v1351_v9, %v1350_v4  ;;  %v1261_v61 = vld [vmem:[%s2372_s13 + $0x60] sm:$0xff] }
 0x2c0   : >> { %v2111_v63 = vpack.c.bf16 %v1262_v62, %v1261_v61  ;;  %v1741_v4 = vld [vmem:[%s2458_s28] ss:$0 sm:$0xff] }
 0x2c2   : >> { %2121 = vmatpush3.bf16.msra.mxu0 %v2120_v2  ;;  %v1264_v2 = vld [vmem:[%s2372_s13 + $0x78] sm:$0xff] }
 0x2c3   : >> { %2122 = vmatprep.subr.bf16.mxu0 %v2275_v55  ;;  %v2114_v3 = vpack.c.bf16 %v1264_v2, %v1263_v1 }
 0x2c6   : >> { %2124 = vmatpush3.bf16.msra.mxu0 %v2123_v6 }
 0x2c7   : >> { %2125 = vmatprep.subr.bf16.mxu0 %v2275_v55 }
 0x2ca   : >> { %2127 = vmatpush3.bf16.msra.mxu0 %v2126_v0 }
 0x2cb   : >> { %2128 = vmatprep.subr.bf16.mxu0 %v2275_v55 }
 0x2ce   : >> { %2130 = vmatpush3.bf16.msra.mxu0 %v2129_v10 }
 0x2cf   : >> { %2131 = vmatprep.subr.bf16.mxu0 %v2275_v55 }
 0x2d2   : >> { %2133 = vmatpush3.bf16.msra.mxu0 %v2132_v13 }
 0x2d3   : >> { %2134 = vmatprep.subr.bf16.mxu0 %v2275_v55 }
 0x2d6   : >> { %2136 = vmatpush3.bf16.msra.mxu0 %v2135_v16 }
 0x2d7   : >> { %2137 = vmatprep.subr.bf16.mxu0 %v2275_v55 }
 0x2da   : >> { %2139 = vmatpush3.bf16.msra.mxu0 %v2138_v19 }
 0x2dd   : >> { %2018 = vmatmul.mubr.f32.vlgmr.msra.gmra.mrb[6].mxu0 %v1123_v54  ;;  %v1260_v54 = vld [vmem:[%s2372_s13 + $0x58] sm:$0xff] }
 0x2de   : >> { %v2108_v56 = vpack.c.bf16 %v1260_v54, %v1259_v53 }
 0x2e0   : >> { %2109 = vmatpush3.bf16.msra.mxu1 %v2108_v56 }
 0x2e1   : >> { %2110 = vmatprep.subr.bf16.mxu1 %v2275_v55 }
 0x2e4   : >> { %2112 = vmatpush3.bf16.msra.mxu1 %v2111_v63 }
 0x2e5   : >> { %2113 = vmatprep.subr.bf16.mxu1 %v2275_v55 }
 0x2e8   : >> { %2115 = vmatpush3.bf16.msra.mxu1 %v2114_v3 }
 0x390   : >> { %v1216_v21 = vpop.f32.mrb[4].mxu0 }
 0x391   : >> { %v1217_v23 = vadd.f32 %v1738_v20, %v1216_v21  ;;  %v1949_v24 = vpop.f32.mrb[5].mxu0 }
 0x393   : >> { %v1223_v25 = vadd.f32 %v1740_v22, %v1217_v23 }
 0x395   : >> { %v1224_v26 = vsel %vm775_vm1, %v1223_v25, -inf }
 0x396   : >> { %1225 = vmax.xlane.f32.xlu0 %v1224_v26 }
 0x3b0   : >> { %v1431_v28 = vpop.f32.mrb[6].mxu0 }
 0x3b1   : >> { %v1432_v29 = vadd.f32 %v1742_v27, %v1431_v28  ;;  %v2019_v30 = vpop.f32.mrb[7].mxu0 }
 0x3b3   : >> { %1748 = vst.msk [vmem:[%s1568_s12 + $0x2] sm:$0x3] %vm775_vm1, %v1432_v29 }
 0x423   : >> { %v1226_v31 = vpop.xlane.xlu0 %1225 }
 0x424   : >> { %v1227_v32 = vsub.f32 %v1223_v25, %v1226_v31 }
 0x426   : >> { %v1228_v33 = vmul.f32 1.442695, %v1227_v32 }
 0x428   : >> { %2250 = vpow2.f32 %v1228_v33 }
 0x432   : >> { %v2251_v34 = vpop.eup %2250 }
 0x433   : >> { %v1230_v35 = vsel %vm775_vm1, %v2251_v34, 0.0 }
 0x434   : >> { %1231 = vadd.xlane.f32.xlu0 %v1230_v35 }
 0x4c1   : >> { %v1232_v57 = vpop.xlane.xlu0 %1231 }
 0x4c2   : >> { %2252 = vrcp.f32 %v1232_v57 }
 0x4cc   : >> { %v2253_v58 = vpop.eup %2252 }
 0x4cd   : >> { %v1234_v59 = vmul.f32 %v2253_v58, %v2251_v34 }
 0x4cf   : >> { %1237 = vperm.xlu1 %2183, %v1234_v59  }
 0x4d3   : >> { %2184 = vset.pattern.permute.xlu1 %v2279_v36 }
 0x4d4   : >> { %1242 = vperm.xlu1 %2184, %v1234_v59  }
 0x54e   : >> { %v1238_v5 = vpop.permute.xlu1 %1237 }
 0x54f   : >> { %v1240_v7 = vmul.f32 %v1238_v5, %v2514_v50 }
 0x553   : >> { %v1243_v6 = vpop.permute.xlu1 %1242 }
 0x554   : >> { %v1245_v8 = vmul.f32 %v1243_v6, %v2552_v60 }
 0x556   : >> { %v1246_v0 = vadd.f32 %v1245_v8, %v1240_v7 }
 0x558   : >> { %1247 = vst [vmem:[#allocation2] sm:$0x3] %v1246_v0  ;;  %1983 = vmatmul.mubr.f32.vlgmr.msra.gmra.mrb[4].mxu1 %v1246_v0 }
 0x62b   : >> { %v1338_v9 = vpop.f32.mrb[4].mxu1 }
 0x62c   : >> { %v1339_v55 = vadd.f32 %v1741_v4, %v1338_v9  ;;  %v1984_v10 = vpop.f32.mrb[5].mxu1 }
 0x62e   : >> { %1744 = vst.msk [vmem:[%s1562_s0 + $0x2] sm:$0x3] %vm775_vm1, %v1339_v55  ;;  %1438 = vrot.lane.b32.xlu0 %v1339_v55, %s2280_s2 }
 0x69b   : > { %788 = sbr.rel (!%p786_p4) target bundleno = 398 (0x18e), region = 146 }
 0x6a0   : >> { %v1439_v11 = vpop.permute.xlu0 %1438 }
 0x6a1   : >> { %1746 = vst.msk [vmem:[%s1565_s3 + $0x2] sm:$0x3] %vm781_vm2, %v1439_v11 }
 0x6a2 PF: > { %s22_s17 = sadd.s32 1, %s2264_s17  }
 0x6a3   : > { %p19_p5 = scmp.ge.s32.totalorder %s22_s17, 4  }
 0x6a5   :  { %21 = sbr.rel (!%p19_p5) target bundleno = 4 (0x4), region = 157 }

</bundles_post_ra>
